<compile_context>
chip_gen: v7x
topology: tpu7x:2x2x1
jax: 0.10.0
libtpu: 0.0.40
codegen_flags: <defaults>
</compile_context>

<pallas_src>
import jax
import jax.numpy as jnp
import numpy as np
from jax.experimental import pallas as pl
from jax.experimental.pallas import tpu as pltpu

LANE = 128


# --------------------------------------------------------------------------
# Pallas kernel (one batch element per grid step)
# --------------------------------------------------------------------------
def _make_kernel(stride, Ho, Wo, Cin_p, Cout_p):
    HW = Ho * Wo

    def kernel(x_ref, sc_ref, w1_ref, w2_ref, b2_ref, b3_ref, o_ref,
               p1_ref, p2_ref, h1p_ref):
        # ---- im2col patches for conv1 (BN1 already applied, spatial zero pad) ----
        for dy in range(3):
            for dx in range(3):
                t = dy * 3 + dx
                if stride == 1:
                    tap = x_ref[0, 0, dy:dy + Ho, dx:dx + Wo, :]
                else:
                    ph = (dy % 2) * 2 + (dx % 2)            # phase-split input
                    tap = x_ref[0, ph, dy // 2:dy // 2 + Ho, dx // 2:dx // 2 + Wo, :]
                # lane-group-aligned store; cast to bf16 once, at pack time
                p1_ref[:, t * Cin_p:(t + 1) * Cin_p] = (
                    tap.reshape(HW, Cin_p).astype(jnp.bfloat16))

        # conv1 (+ folded BN2 scale) as ONE bf16 MXU matmul, then bias + ReLU
        h1 = jnp.dot(p1_ref[...], w1_ref[...], preferred_element_type=jnp.float32)
        h1 = jnp.maximum(h1 + b2_ref[...], 0.0)

        # zero-padded h1 for conv2: zero only the 1-wide border, overwrite interior
        zr = jnp.zeros((1, Wo + 2, Cout_p), jnp.float32)
        zc = jnp.zeros((Ho, 1, Cout_p), jnp.float32)
        h1p_ref[0:1, :, :] = zr
        h1p_ref[Ho + 1:Ho + 2, :, :] = zr
        h1p_ref[1:Ho + 1, 0:1, :] = zc
        h1p_ref[1:Ho + 1, Wo + 1:Wo + 2, :] = zc
        h1p_ref[1:Ho + 1, 1:Wo + 1, :] = h1.reshape(Ho, Wo, Cout_p)

        # ---- im2col patches for conv2 (stride 1) ----
        for dy in range(3):
            for dx in range(3):
                t = dy * 3 + dx
                p2_ref[:, t * Cout_p:(t + 1) * Cout_p] = (
                    h1p_ref[dy:dy + Ho, dx:dx + Wo, :]
                    .reshape(HW, Cout_p).astype(jnp.bfloat16))

        # conv2 (+ folded BN3 scale and ShakeDrop keep) + bias
        h2 = jnp.dot(p2_ref[...], w2_ref[...], preferred_element_type=jnp.float32)
        hb = h2 + b3_ref[...]

        # shortcut only lives in the first Cin_p lanes (narrow shortcut DMA);
        # both stores below are lane-group aligned and unmasked.
        o_ref[0, :, 0:Cin_p] = hb[:, 0:Cin_p] + sc_ref[0]
        if Cout_p > Cin_p:
            o_ref[0, :, Cin_p:Cout_p] = hb[:, Cin_p:Cout_p]

    return kernel


# --------------------------------------------------------------------------
# Wrapper: parameter folding + layout prep + pallas_call
# --------------------------------------------------------------------------
def shake_basic_block_forward(x_nchw, params, stride, p_shakedrop):
    assert stride in (1, 2)
    x = jnp.transpose(x_nchw, (0, 2, 3, 1)).astype(jnp.float32)      # NCHW -> NHWC
    N, H, W, Cin = x.shape
    Cout = params["w1"].shape[-1]
    assert H % stride == 0 and W % stride == 0 and Cout >= Cin
    Ho, Wo = H // stride, W // stride
    # free (layout-preserving) in-kernel reshapes between (HW,C) and (Ho,Wo,C)
    assert Wo % 8 == 0, "Wo must be a multiple of 8"   # TODO(synk): general shapes
    HW = Ho * Wo
    eps = 1e-5
    Cin_p = -(-Cin // LANE) * LANE                                   # lane-dense pad
    Cout_p = -(-Cout // LANE) * LANE

    def fold(p):                                  # BN eval -> per-channel affine
        g, b, m, v = p
        s = g / jnp.sqrt(v + eps)
        return s.astype(jnp.float32), (b - m * s).astype(jnp.float32)

    s1, b1 = fold(params["bn1"])
    s2, b2 = fold(params["bn2"])
    s3, b3 = fold(params["bn3"])
    keep = jnp.float32(1.0 - p_shakedrop)         # ShakeDrop eval expectation

    # BN1 applied here in f32; conv zero-padding is then an exact zero.
    xb = x * s1 + b1
    xb = jnp.pad(xb, ((0, 0), (1, 1), (1, 1), (0, Cin_p - Cin)))     # spatial + lane pad
    if stride == 1:
        xprep = xb[:, None]                               # (N, 1, H+2, W+2, Cin_p)
    else:
        # parity phase split -> every stride-2 tap is a static contiguous slice
        xprep = jnp.stack([xb[:, a::2, b_::2, :] for a in (0, 1) for b_ in (0, 1)],
                          axis=1)                          # (N, 4, Ho+1, Wo+1, Cin_p)
    ss, Hp, Wp = xprep.shape[1:4]

    # Fold BN2 scale into w1's output columns and (BN3 scale * keep) into w2's.
    w1 = params["w1"].astype(jnp.float32) * s2[None, None, None, :]
    w2 = params["w2"].astype(jnp.float32) * (s3 * keep)[None, None, None, :]
    w1p = jnp.zeros((3, 3, Cin_p, Cout_p), jnp.float32).at[:, :, :Cin, :Cout].set(w1)
    w2p = jnp.zeros((3, 3, Cout_p, Cout_p), jnp.float32).at[:, :, :Cout, :Cout].set(w2)
    w1p = w1p.reshape(9 * Cin_p, Cout_p).astype(jnp.bfloat16)
    w2p = w2p.reshape(9 * Cout_p, Cout_p).astype(jnp.bfloat16)

    b2p = jnp.zeros((1, Cout_p), jnp.float32).at[0, :Cout].set(b2)
    b3p = jnp.zeros((1, Cout_p), jnp.float32).at[0, :Cout].set(b3 * keep)

    # Shortcut (identity or AvgPool2d(2)) on RAW x, padded only to Cin_p lanes.
    h0 = x if stride == 1 else x.reshape(N, Ho, 2, Wo, 2, Cin).mean(axis=(2, 4))
    sc = jnp.zeros((N, HW, Cin_p), jnp.float32).at[:, :, :Cin].set(
        h0.reshape(N, HW, Cin))

    kernel = _make_kernel(stride, Ho, Wo, Cin_p, Cout_p)

    # Size the VMEM budget from the real footprint (double-buffered I/O + scratch)
    # with ~50% headroom, clamped to sane bounds across v5e/v6e/v7x.
    bytes_io = (ss * Hp * Wp * Cin_p * 4          # xprep block (f32)
                + HW * Cin_p * 4                  # shortcut block (f32)
                + 9 * Cin_p * Cout_p * 2          # w1p (bf16)
                + 9 * Cout_p * Cout_p * 2         # w2p (bf16)
                + 2 * Cout_p * 4                  # biases
                + HW * Cout_p * 4)                # output block (f32)
    bytes_scratch = (HW * 9 * Cin_p * 2           # p1 im2col (bf16)
                     + HW * 9 * Cout_p * 2        # p2 im2col (bf16)
                     + (Ho + 2) * (Wo + 2) * Cout_p * 4)   # padded h1 (f32)
    footprint = 2 * bytes_io + bytes_scratch
    vmem_limit = int(min(112 * 2 ** 20, max(32 * 2 ** 20, int(footprint * 1.5))))

    out = pl.pallas_call(
        kernel,
        out_shape=jax.ShapeDtypeStruct((N, HW, Cout_p), jnp.float32),
        grid_spec=pltpu.PrefetchScalarGridSpec(
            num_scalar_prefetch=0,
            grid=(N,),
            in_specs=[
                pl.BlockSpec((1, ss, Hp, Wp, Cin_p), lambda n: (n, 0, 0, 0, 0)),
                pl.BlockSpec((1, HW, Cin_p), lambda n: (n, 0, 0)),
                pl.BlockSpec((9 * Cin_p, Cout_p), lambda n: (0, 0)),
                pl.BlockSpec((9 * Cout_p, Cout_p), lambda n: (0, 0)),
                pl.BlockSpec((1, Cout_p), lambda n: (0, 0)),
                pl.BlockSpec((1, Cout_p), lambda n: (0, 0)),
            ],
            out_specs=pl.BlockSpec((1, HW, Cout_p), lambda n: (n, 0, 0)),
            scratch_shapes=[
                pltpu.VMEM((HW, 9 * Cin_p), jnp.bfloat16),          # conv1 im2col
                pltpu.VMEM((HW, 9 * Cout_p), jnp.bfloat16),         # conv2 im2col
                pltpu.VMEM((Ho + 2, Wo + 2, Cout_p), jnp.float32),  # zero-padded h1
            ],
        ),
        compiler_params=pltpu.CompilerParams(
            dimension_semantics=("parallel",),       # batch steps independent (v7x 2 TCs)
            vmem_limit_bytes=vmem_limit,
        ),
    )(xprep, sc, w1p, w2p, b2p, b3p)

    out = out.reshape(N, Ho, Wo, Cout_p)[..., :Cout]
    return jnp.transpose(out, (0, 3, 1, 2))          # NHWC -> NCHW


# --------------------------------------------------------------------------
# Deterministic parameter init (shapes from the module's __init__)
# --------------------------------------------------------------------------
def init_params(key, in_ch, out_ch):
    ks = jax.random.split(key, 5)

    def bn(k, c):
        k1, k2, k3, k4 = jax.random.split(k, 4)
        gamma = jax.random.uniform(k1, (c,), jnp.float32, 0.8, 1.2)
        beta = 0.1 * jax.random.normal(k2, (c,), jnp.float32)
        mean = 0.1 * jax.random.normal(k3, (c,), jnp.float32)
        var = jax.random.uniform(k4, (c,), jnp.float32, 0.5, 1.5)
        return gamma, beta, mean, var

    s1 = float(np.sqrt(2.0 / (9 * in_ch)))     # He-like scale keeps activations O(1)
    s2 = float(np.sqrt(2.0 / (9 * out_ch)))
    return dict(
        bn1=bn(ks[0], in_ch),
        w1=s1 * jax.random.normal(ks[1], (3, 3, in_ch, out_ch), jnp.float32),
        bn2=bn(ks[2], out_ch),
        w2=s2 * jax.random.normal(ks[3], (3, 3, out_ch, out_ch), jnp.float32),
        bn3=bn(ks[4], out_ch),
    )


# --------------------------------------------------------------------------
# Pure-JAX reference (same eval semantics) for correctness checking
# --------------------------------------------------------------------------
def ref_forward(x_nchw, params, stride, p_shakedrop):
    x = jnp.transpose(x_nchw, (0, 2, 3, 1)).astype(jnp.float32)
    eps = 1e-5

    def bn(h, p):
        g, b, m, v = p
        return (h - m) / jnp.sqrt(v + eps) * g + b

    h = bn(x, params["bn1"])
    h = jax.lax.conv_general_dilated(h, params["w1"], (stride, stride),
                                     ((1, 1), (1, 1)),
                                     dimension_numbers=("NHWC", "HWIO", "NHWC"),
                                     precision=jax.lax.Precision.HIGHEST)
    h = jnp.maximum(bn(h, params["bn2"]), 0.0)
    h = jax.lax.conv_general_dilated(h, params["w2"], (1, 1),
                                     ((1, 1), (1, 1)),
                                     dimension_numbers=("NHWC", "HWIO", "NHWC"),
                                     precision=jax.lax.Precision.HIGHEST)
    h = bn(h, params["bn3"])
    h = (1.0 - p_shakedrop) * h
    if stride == 2:
        N, H, W, C = x.shape
        h0 = x.reshape(N, H // 2, 2, W // 2, 2, C).mean(axis=(2, 4))
    else:
        h0 = x
    h0 = jnp.pad(h0, ((0, 0), (0, 0), (0, 0), (0, h.shape[-1] - h0.shape[-1])))
    return jnp.transpose(h + h0, (0, 3, 1, 2))


# --------------------------------------------------------------------------
if __name__ == "__main__":
    key = jax.random.PRNGKey(0)

    configs = [
        # (in_ch, out_ch, H, W, p_shakedrop)
        (4, 8, 16, 16, 0.5),       # tiny: single 128-lane group, Cin_p == Cout_p
        (96, 144, 32, 32, 0.3),    # Cout_p=256 > Cin_p=128: multi-lane-group path
    ]
    for in_ch, out_ch, H, W, p_sd in configs:
        kx, kp, key = jax.random.split(key, 3)
        x = jax.random.normal(kx, (2, in_ch, H, W), jnp.float32)     # NCHW, like PyTorch
        params = init_params(kp, in_ch, out_ch)

        for stride in (1, 2):      # stride=1: identity shortcut; stride=2: AvgPool2d(2)
            y = shake_basic_block_forward(x, params, stride, p_sd)
            y = jax.block_until_ready(y)
            y_ref = ref_forward(x, params, stride, p_sd)
            assert y.shape == y_ref.shape, (y.shape, y_ref.shape)
            # tolerance accounts for bf16 MXU operands (f32 accumulation) with
            # contraction depths up to K = 9*144 at unit-scale activations
            np.testing.assert_allclose(np.asarray(y), np.asarray(y_ref),
                                       rtol=5e-2, atol=1e-1)

    print("KERNEL_OK")
</pallas_src>

<mosaic_0001>
module attributes {stable_mosaic.version = 11 : i64} {
  func.func @kernel(%arg0: i32, %arg1: memref<1x1x18x18x128xf32, #tpu.memory_space<vmem>>, %arg2: memref<1x256x128xf32, #tpu.memory_space<vmem>>, %arg3: memref<1152x128xbf16, #tpu.memory_space<vmem>>, %arg4: memref<1152x128xbf16, #tpu.memory_space<vmem>>, %arg5: memref<1x128xf32, #tpu.memory_space<vmem>>, %arg6: memref<1x128xf32, #tpu.memory_space<vmem>>, %arg7: memref<1x256x128xf32, #tpu.memory_space<vmem>>, %arg8: memref<256x1152xbf16, #tpu.memory_space<vmem>>, %arg9: memref<256x1152xbf16, #tpu.memory_space<vmem>>, %arg10: memref<18x18x128xf32, #tpu.memory_space<vmem>>) attributes {dimension_semantics = [#tpu.dimension_semantics<parallel>], iteration_bounds = array<i64: 2>, scalar_prefetch = 0 : i64, scratch_operands = 3 : i64, tpu.core_type = #tpu.core_type<tc>, window_params = [{transform_indices = @transform_0, window_bounds = array<i64: 1, 1, 18, 18, 128>}, {transform_indices = @transform_1, window_bounds = array<i64: 1, 256, 128>}, {pipeline_mode = #tpu.pipeline_mode<synchronous>, transform_indices = @transform_2, window_bounds = array<i64: 1152, 128>}, {pipeline_mode = #tpu.pipeline_mode<synchronous>, transform_indices = @transform_3, window_bounds = array<i64: 1152, 128>}, {pipeline_mode = #tpu.pipeline_mode<synchronous>, transform_indices = @transform_4, window_bounds = array<i64: 1, 128>}, {pipeline_mode = #tpu.pipeline_mode<synchronous>, transform_indices = @transform_5, window_bounds = array<i64: 1, 128>}, {transform_indices = @transform_6, window_bounds = array<i64: 1, 256, 128>}]} {
    %c0 = arith.constant 0 : index
    %c0_0 = arith.constant 0 : index
    %c0_1 = arith.constant 0 : index
    %c0_2 = arith.constant 0 : index
    %c0_3 = arith.constant 0 : index
    %0 = vector.load %arg1[%c0, %c0_0, %c0_1, %c0_2, %c0_3] : memref<1x1x18x18x128xf32, #tpu.memory_space<vmem>>, vector<1x1x16x16x128xf32>
    %1 = vector.shape_cast %0 : vector<1x1x16x16x128xf32> to vector<16x16x128xf32>
    %2 = vector.shape_cast %1 : vector<16x16x128xf32> to vector<256x128xf32>
    %3 = arith.truncf %2 : vector<256x128xf32> to vector<256x128xbf16>
    %c0_4 = arith.constant 0 : index
    %c0_5 = arith.constant 0 : index
    %4 = vector.load %arg8[%c0_4, %c0_5] : memref<256x1152xbf16, #tpu.memory_space<vmem>>, vector<256x128xbf16>
    tpu.vector_store %arg8[%c0_4, %c0_5], %3 {strides = array<i32>} : memref<256x1152xbf16, #tpu.memory_space<vmem>>, vector<256x128xbf16>,
    %c0_6 = arith.constant 0 : index
    %c0_7 = arith.constant 0 : index
    %c0_8 = arith.constant 0 : index
    %c1 = arith.constant 1 : index
    %c0_9 = arith.constant 0 : index
    %5 = vector.load %arg1[%c0_6, %c0_7, %c0_8, %c1, %c0_9] : memref<1x1x18x18x128xf32, #tpu.memory_space<vmem>>, vector<1x1x16x16x128xf32>
    %6 = vector.shape_cast %5 : vector<1x1x16x16x128xf32> to vector<16x16x128xf32>
    %7 = vector.shape_cast %6 : vector<16x16x128xf32> to vector<256x128xf32>
    %8 = arith.truncf %7 : vector<256x128xf32> to vector<256x128xbf16>
    %c0_10 = arith.constant 0 : index
    %c128 = arith.constant 128 : index
    %9 = vector.load %arg8[%c0_10, %c128] : memref<256x1152xbf16, #tpu.memory_space<vmem>>, vector<256x128xbf16>
    tpu.vector_store %arg8[%c0_10, %c128], %8 {strides = array<i32>} : memref<256x1152xbf16, #tpu.memory_space<vmem>>, vector<256x128xbf16>,
    %c0_11 = arith.constant 0 : index
    %c0_12 = arith.constant 0 : index
    %c0_13 = arith.constant 0 : index
    %c2 = arith.constant 2 : index
    %c0_14 = arith.constant 0 : index
    %10 = vector.load %arg1[%c0_11, %c0_12, %c0_13, %c2, %c0_14] : memref<1x1x18x18x128xf32, #tpu.memory_space<vmem>>, vector<1x1x16x16x128xf32>
    %11 = vector.shape_cast %10 : vector<1x1x16x16x128xf32> to vector<16x16x128xf32>
    %12 = vector.shape_cast %11 : vector<16x16x128xf32> to vector<256x128xf32>
    %13 = arith.truncf %12 : vector<256x128xf32> to vector<256x128xbf16>
    %c0_15 = arith.constant 0 : index
    %c256 = arith.constant 256 : index
    %14 = vector.load %arg8[%c0_15, %c256] : memref<256x1152xbf16, #tpu.memory_space<vmem>>, vector<256x128xbf16>
    tpu.vector_store %arg8[%c0_15, %c256], %13 {strides = array<i32>} : memref<256x1152xbf16, #tpu.memory_space<vmem>>, vector<256x128xbf16>,
    %c0_16 = arith.constant 0 : index
    %c0_17 = arith.constant 0 : index
    %c1_18 = arith.constant 1 : index
    %c0_19 = arith.constant 0 : index
    %c0_20 = arith.constant 0 : index
    %15 = vector.load %arg1[%c0_16, %c0_17, %c1_18, %c0_19, %c0_20] : memref<1x1x18x18x128xf32, #tpu.memory_space<vmem>>, vector<1x1x16x16x128xf32>
    %16 = vector.shape_cast %15 : vector<1x1x16x16x128xf32> to vector<16x16x128xf32>
    %17 = vector.shape_cast %16 : vector<16x16x128xf32> to vector<256x128xf32>
    %18 = arith.truncf %17 : vector<256x128xf32> to vector<256x128xbf16>
    %c0_21 = arith.constant 0 : index
    %c384 = arith.constant 384 : index
    %19 = vector.load %arg8[%c0_21, %c384] : memref<256x1152xbf16, #tpu.memory_space<vmem>>, vector<256x128xbf16>
    tpu.vector_store %arg8[%c0_21, %c384], %18 {strides = array<i32>} : memref<256x1152xbf16, #tpu.memory_space<vmem>>, vector<256x128xbf16>,
    %c0_22 = arith.constant 0 : index
    %c0_23 = arith.constant 0 : index
    %c1_24 = arith.constant 1 : index
    %c1_25 = arith.constant 1 : index
    %c0_26 = arith.constant 0 : index
    %20 = vector.load %arg1[%c0_22, %c0_23, %c1_24, %c1_25, %c0_26] : memref<1x1x18x18x128xf32, #tpu.memory_space<vmem>>, vector<1x1x16x16x128xf32>
    %21 = vector.shape_cast %20 : vector<1x1x16x16x128xf32> to vector<16x16x128xf32>
    %22 = vector.shape_cast %21 : vector<16x16x128xf32> to vector<256x128xf32>
    %23 = arith.truncf %22 : vector<256x128xf32> to vector<256x128xbf16>
    %c0_27 = arith.constant 0 : index
    %c512 = arith.constant 512 : index
    %24 = vector.load %arg8[%c0_27, %c512] : memref<256x1152xbf16, #tpu.memory_space<vmem>>, vector<256x128xbf16>
    tpu.vector_store %arg8[%c0_27, %c512], %23 {strides = array<i32>} : memref<256x1152xbf16, #tpu.memory_space<vmem>>, vector<256x128xbf16>,
    %c0_28 = arith.constant 0 : index
    %c0_29 = arith.constant 0 : index
    %c1_30 = arith.constant 1 : index
    %c2_31 = arith.constant 2 : index
    %c0_32 = arith.constant 0 : index
    %25 = vector.load %arg1[%c0_28, %c0_29, %c1_30, %c2_31, %c0_32] : memref<1x1x18x18x128xf32, #tpu.memory_space<vmem>>, vector<1x1x16x16x128xf32>
    %26 = vector.shape_cast %25 : vector<1x1x16x16x128xf32> to vector<16x16x128xf32>
    %27 = vector.shape_cast %26 : vector<16x16x128xf32> to vector<256x128xf32>
    %28 = arith.truncf %27 : vector<256x128xf32> to vector<256x128xbf16>
    %c0_33 = arith.constant 0 : index
    %c640 = arith.constant 640 : index
    %29 = vector.load %arg8[%c0_33, %c640] : memref<256x1152xbf16, #tpu.memory_space<vmem>>, vector<256x128xbf16>
    tpu.vector_store %arg8[%c0_33, %c640], %28 {strides = array<i32>} : memref<256x1152xbf16, #tpu.memory_space<vmem>>, vector<256x128xbf16>,
    %c0_34 = arith.constant 0 : index
    %c0_35 = arith.constant 0 : index
    %c2_36 = arith.constant 2 : index
    %c0_37 = arith.constant 0 : index
    %c0_38 = arith.constant 0 : index
    %30 = vector.load %arg1[%c0_34, %c0_35, %c2_36, %c0_37, %c0_38] : memref<1x1x18x18x128xf32, #tpu.memory_space<vmem>>, vector<1x1x16x16x128xf32>
    %31 = vector.shape_cast %30 : vector<1x1x16x16x128xf32> to vector<16x16x128xf32>
    %32 = vector.shape_cast %31 : vector<16x16x128xf32> to vector<256x128xf32>
    %33 = arith.truncf %32 : vector<256x128xf32> to vector<256x128xbf16>
    %c0_39 = arith.constant 0 : index
    %c768 = arith.constant 768 : index
    %34 = vector.load %arg8[%c0_39, %c768] : memref<256x1152xbf16, #tpu.memory_space<vmem>>, vector<256x128xbf16>
    tpu.vector_store %arg8[%c0_39, %c768], %33 {strides = array<i32>} : memref<256x1152xbf16, #tpu.memory_space<vmem>>, vector<256x128xbf16>,
    %c0_40 = arith.constant 0 : index
    %c0_41 = arith.constant 0 : index
    %c2_42 = arith.constant 2 : index
    %c1_43 = arith.constant 1 : index
    %c0_44 = arith.constant 0 : index
    %35 = vector.load %arg1[%c0_40, %c0_41, %c2_42, %c1_43, %c0_44] : memref<1x1x18x18x128xf32, #tpu.memory_space<vmem>>, vector<1x1x16x16x128xf32>
    %36 = vector.shape_cast %35 : vector<1x1x16x16x128xf32> to vector<16x16x128xf32>
    %37 = vector.shape_cast %36 : vector<16x16x128xf32> to vector<256x128xf32>
    %38 = arith.truncf %37 : vector<256x128xf32> to vector<256x128xbf16>
    %c0_45 = arith.constant 0 : index
    %c896 = arith.constant 896 : index
    %39 = vector.load %arg8[%c0_45, %c896] : memref<256x1152xbf16, #tpu.memory_space<vmem>>, vector<256x128xbf16>
    tpu.vector_store %arg8[%c0_45, %c896], %38 {strides = array<i32>} : memref<256x1152xbf16, #tpu.memory_space<vmem>>, vector<256x128xbf16>,
    %c0_46 = arith.constant 0 : index
    %c0_47 = arith.constant 0 : index
    %c2_48 = arith.constant 2 : index
    %c2_49 = arith.constant 2 : index
    %c0_50 = arith.constant 0 : index
    %40 = vector.load %arg1[%c0_46, %c0_47, %c2_48, %c2_49, %c0_50] : memref<1x1x18x18x128xf32, #tpu.memory_space<vmem>>, vector<1x1x16x16x128xf32>
    %41 = vector.shape_cast %40 : vector<1x1x16x16x128xf32> to vector<16x16x128xf32>
    %42 = vector.shape_cast %41 : vector<16x16x128xf32> to vector<256x128xf32>
    %43 = arith.truncf %42 : vector<256x128xf32> to vector<256x128xbf16>
    %c0_51 = arith.constant 0 : index
    %c1024 = arith.constant 1024 : index
    %44 = vector.load %arg8[%c0_51, %c1024] : memref<256x1152xbf16, #tpu.memory_space<vmem>>, vector<256x128xbf16>
    tpu.vector_store %arg8[%c0_51, %c1024], %43 {strides = array<i32>} : memref<256x1152xbf16, #tpu.memory_space<vmem>>, vector<256x128xbf16>,
    %c0_52 = arith.constant 0 : index
    %c0_53 = arith.constant 0 : index
    %45 = vector.load %arg8[%c0_52, %c0_53] : memref<256x1152xbf16, #tpu.memory_space<vmem>>, vector<256x1152xbf16>
    %c0_54 = arith.constant 0 : index
    %c0_55 = arith.constant 0 : index
    %46 = vector.load %arg3[%c0_54, %c0_55] : memref<1152x128xbf16, #tpu.memory_space<vmem>>, vector<1152x128xbf16>
    %cst = arith.constant dense<0.000000e+00> : vector<256x128xf32>
    %47 = tpu.matmul %45, %46, %cst {dimension_numbers = #tpu.dot_dimension_numbers<[1], [0], [0], [1], [0, 0, 1, 1], [], []>} : vector<256x1152xbf16>, vector<1152x128xbf16>, vector<256x128xf32> -> vector<256x128xf32>
    %c0_56 = arith.constant 0 : index
    %c0_57 = arith.constant 0 : index
    %48 = vector.load %arg5[%c0_56, %c0_57] : memref<1x128xf32, #tpu.memory_space<vmem>>, vector<1x128xf32>
    %49 = vector.broadcast %48 : vector<1x128xf32> to vector<256x128xf32>
    %50 = arith.addf %47, %49 : vector<256x128xf32>
    %cst_58 = arith.constant 0.000000e+00 : f32
    %51 = vector.broadcast %cst_58 : f32 to vector<256x128xf32>
    %52 = arith.maximumf %50, %51 : vector<256x128xf32>
    %cst_59 = arith.constant 0.000000e+00 : f32
    %53 = vector.broadcast %cst_59 : f32 to vector<1x18x128xf32>
    %cst_60 = arith.constant 0.000000e+00 : f32
    %54 = vector.broadcast %cst_60 : f32 to vector<16x1x128xf32>
    %c0_61 = arith.constant 0 : index
    %c0_62 = arith.constant 0 : index
    %c0_63 = arith.constant 0 : index
    %55 = vector.load %arg10[%c0_61, %c0_62, %c0_63] : memref<18x18x128xf32, #tpu.memory_space<vmem>>, vector<1x18x128xf32>
    tpu.vector_store %arg10[%c0_61, %c0_62, %c0_63], %53 {strides = array<i32>} : memref<18x18x128xf32, #tpu.memory_space<vmem>>, vector<1x18x128xf32>,
    %c17 = arith.constant 17 : index
    %c0_64 = arith.constant 0 : index
    %c0_65 = arith.constant 0 : index
    %56 = vector.load %arg10[%c17, %c0_64, %c0_65] : memref<18x18x128xf32, #tpu.memory_space<vmem>>, vector<1x18x128xf32>
    tpu.vector_store %arg10[%c17, %c0_64, %c0_65], %53 {strides = array<i32>} : memref<18x18x128xf32, #tpu.memory_space<vmem>>, vector<1x18x128xf32>,
    %c1_66 = arith.constant 1 : index
    %c0_67 = arith.constant 0 : index
    %c0_68 = arith.constant 0 : index
    %57 = vector.load %arg10[%c1_66, %c0_67, %c0_68] : memref<18x18x128xf32, #tpu.memory_space<vmem>>, vector<16x1x128xf32>
    tpu.vector_store %arg10[%c1_66, %c0_67, %c0_68], %54 {strides = array<i32>} : memref<18x18x128xf32, #tpu.memory_space<vmem>>, vector<16x1x128xf32>,
    %c1_69 = arith.constant 1 : index
    %c17_70 = arith.constant 17 : index
    %c0_71 = arith.constant 0 : index
    %58 = vector.load %arg10[%c1_69, %c17_70, %c0_71] : memref<18x18x128xf32, #tpu.memory_space<vmem>>, vector<16x1x128xf32>
    tpu.vector_store %arg10[%c1_69, %c17_70, %c0_71], %54 {strides = array<i32>} : memref<18x18x128xf32, #tpu.memory_space<vmem>>, vector<16x1x128xf32>,
    %59 = vector.shape_cast %52 : vector<256x128xf32> to vector<16x16x128xf32>
    %c1_72 = arith.constant 1 : index
    %c1_73 = arith.constant 1 : index
    %c0_74 = arith.constant 0 : index
    %60 = vector.load %arg10[%c1_72, %c1_73, %c0_74] : memref<18x18x128xf32, #tpu.memory_space<vmem>>, vector<16x16x128xf32>
    tpu.vector_store %arg10[%c1_72, %c1_73, %c0_74], %59 {strides = array<i32>} : memref<18x18x128xf32, #tpu.memory_space<vmem>>, vector<16x16x128xf32>,
    %c0_75 = arith.constant 0 : index
    %c0_76 = arith.constant 0 : index
    %c0_77 = arith.constant 0 : index
    %61 = vector.load %arg10[%c0_75, %c0_76, %c0_77] : memref<18x18x128xf32, #tpu.memory_space<vmem>>, vector<16x16x128xf32>
    %62 = vector.shape_cast %61 : vector<16x16x128xf32> to vector<256x128xf32>
    %63 = arith.truncf %62 : vector<256x128xf32> to vector<256x128xbf16>
    %c0_78 = arith.constant 0 : index
    %c0_79 = arith.constant 0 : index
    %64 = vector.load %arg9[%c0_78, %c0_79] : memref<256x1152xbf16, #tpu.memory_space<vmem>>, vector<256x128xbf16>
    tpu.vector_store %arg9[%c0_78, %c0_79], %63 {strides = array<i32>} : memref<256x1152xbf16, #tpu.memory_space<vmem>>, vector<256x128xbf16>,
    %c0_80 = arith.constant 0 : index
    %c1_81 = arith.constant 1 : index
    %c0_82 = arith.constant 0 : index
    %65 = vector.load %arg10[%c0_80, %c1_81, %c0_82] : memref<18x18x128xf32, #tpu.memory_space<vmem>>, vector<16x16x128xf32>
    %66 = vector.shape_cast %65 : vector<16x16x128xf32> to vector<256x128xf32>
    %67 = arith.truncf %66 : vector<256x128xf32> to vector<256x128xbf16>
    %c0_83 = arith.constant 0 : index
    %c128_84 = arith.constant 128 : index
    %68 = vector.load %arg9[%c0_83, %c128_84] : memref<256x1152xbf16, #tpu.memory_space<vmem>>, vector<256x128xbf16>
    tpu.vector_store %arg9[%c0_83, %c128_84], %67 {strides = array<i32>} : memref<256x1152xbf16, #tpu.memory_space<vmem>>, vector<256x128xbf16>,
    %c0_85 = arith.constant 0 : index
    %c2_86 = arith.constant 2 : index
    %c0_87 = arith.constant 0 : index
    %69 = vector.load %arg10[%c0_85, %c2_86, %c0_87] : memref<18x18x128xf32, #tpu.memory_space<vmem>>, vector<16x16x128xf32>
    %70 = vector.shape_cast %69 : vector<16x16x128xf32> to vector<256x128xf32>
    %71 = arith.truncf %70 : vector<256x128xf32> to vector<256x128xbf16>
    %c0_88 = arith.constant 0 : index
    %c256_89 = arith.constant 256 : index
    %72 = vector.load %arg9[%c0_88, %c256_89] : memref<256x1152xbf16, #tpu.memory_space<vmem>>, vector<256x128xbf16>
    tpu.vector_store %arg9[%c0_88, %c256_89], %71 {strides = array<i32>} : memref<256x1152xbf16, #tpu.memory_space<vmem>>, vector<256x128xbf16>,
    %c1_90 = arith.constant 1 : index
    %c0_91 = arith.constant 0 : index
    %c0_92 = arith.constant 0 : index
    %73 = vector.load %arg10[%c1_90, %c0_91, %c0_92] : memref<18x18x128xf32, #tpu.memory_space<vmem>>, vector<16x16x128xf32>
    %74 = vector.shape_cast %73 : vector<16x16x128xf32> to vector<256x128xf32>
    %75 = arith.truncf %74 : vector<256x128xf32> to vector<256x128xbf16>
    %c0_93 = arith.constant 0 : index
    %c384_94 = arith.constant 384 : index
    %76 = vector.load %arg9[%c0_93, %c384_94] : memref<256x1152xbf16, #tpu.memory_space<vmem>>, vector<256x128xbf16>
    tpu.vector_store %arg9[%c0_93, %c384_94], %75 {strides = array<i32>} : memref<256x1152xbf16, #tpu.memory_space<vmem>>, vector<256x128xbf16>,
    %c1_95 = arith.constant 1 : index
    %c1_96 = arith.constant 1 : index
    %c0_97 = arith.constant 0 : index
    %77 = vector.load %arg10[%c1_95, %c1_96, %c0_97] : memref<18x18x128xf32, #tpu.memory_space<vmem>>, vector<16x16x128xf32>
    %78 = vector.shape_cast %77 : vector<16x16x128xf32> to vector<256x128xf32>
    %79 = arith.truncf %78 : vector<256x128xf32> to vector<256x128xbf16>
    %c0_98 = arith.constant 0 : index
    %c512_99 = arith.constant 512 : index
    %80 = vector.load %arg9[%c0_98, %c512_99] : memref<256x1152xbf16, #tpu.memory_space<vmem>>, vector<256x128xbf16>
    tpu.vector_store %arg9[%c0_98, %c512_99], %79 {strides = array<i32>} : memref<256x1152xbf16, #tpu.memory_space<vmem>>, vector<256x128xbf16>,
    %c1_100 = arith.constant 1 : index
    %c2_101 = arith.constant 2 : index
    %c0_102 = arith.constant 0 : index
    %81 = vector.load %arg10[%c1_100, %c2_101, %c0_102] : memref<18x18x128xf32, #tpu.memory_space<vmem>>, vector<16x16x128xf32>
    %82 = vector.shape_cast %81 : vector<16x16x128xf32> to vector<256x128xf32>
    %83 = arith.truncf %82 : vector<256x128xf32> to vector<256x128xbf16>
    %c0_103 = arith.constant 0 : index
    %c640_104 = arith.constant 640 : index
    %84 = vector.load %arg9[%c0_103, %c640_104] : memref<256x1152xbf16, #tpu.memory_space<vmem>>, vector<256x128xbf16>
    tpu.vector_store %arg9[%c0_103, %c640_104], %83 {strides = array<i32>} : memref<256x1152xbf16, #tpu.memory_space<vmem>>, vector<256x128xbf16>,
    %c2_105 = arith.constant 2 : index
    %c0_106 = arith.constant 0 : index
    %c0_107 = arith.constant 0 : index
    %85 = vector.load %arg10[%c2_105, %c0_106, %c0_107] : memref<18x18x128xf32, #tpu.memory_space<vmem>>, vector<16x16x128xf32>
    %86 = vector.shape_cast %85 : vector<16x16x128xf32> to vector<256x128xf32>
    %87 = arith.truncf %86 : vector<256x128xf32> to vector<256x128xbf16>
    %c0_108 = arith.constant 0 : index
    %c768_109 = arith.constant 768 : index
    %88 = vector.load %arg9[%c0_108, %c768_109] : memref<256x1152xbf16, #tpu.memory_space<vmem>>, vector<256x128xbf16>
    tpu.vector_store %arg9[%c0_108, %c768_109], %87 {strides = array<i32>} : memref<256x1152xbf16, #tpu.memory_space<vmem>>, vector<256x128xbf16>,
    %c2_110 = arith.constant 2 : index
    %c1_111 = arith.constant 1 : index
    %c0_112 = arith.constant 0 : index
    %89 = vector.load %arg10[%c2_110, %c1_111, %c0_112] : memref<18x18x128xf32, #tpu.memory_space<vmem>>, vector<16x16x128xf32>
    %90 = vector.shape_cast %89 : vector<16x16x128xf32> to vector<256x128xf32>
    %91 = arith.truncf %90 : vector<256x128xf32> to vector<256x128xbf16>
    %c0_113 = arith.constant 0 : index
    %c896_114 = arith.constant 896 : index
    %92 = vector.load %arg9[%c0_113, %c896_114] : memref<256x1152xbf16, #tpu.memory_space<vmem>>, vector<256x128xbf16>
    tpu.vector_store %arg9[%c0_113, %c896_114], %91 {strides = array<i32>} : memref<256x1152xbf16, #tpu.memory_space<vmem>>, vector<256x128xbf16>,
    %c2_115 = arith.constant 2 : index
    %c2_116 = arith.constant 2 : index
    %c0_117 = arith.constant 0 : index
    %93 = vector.load %arg10[%c2_115, %c2_116, %c0_117] : memref<18x18x128xf32, #tpu.memory_space<vmem>>, vector<16x16x128xf32>
    %94 = vector.shape_cast %93 : vector<16x16x128xf32> to vector<256x128xf32>
    %95 = arith.truncf %94 : vector<256x128xf32> to vector<256x128xbf16>
    %c0_118 = arith.constant 0 : index
    %c1024_119 = arith.constant 1024 : index
    %96 = vector.load %arg9[%c0_118, %c1024_119] : memref<256x1152xbf16, #tpu.memory_space<vmem>>, vector<256x128xbf16>
    tpu.vector_store %arg9[%c0_118, %c1024_119], %95 {strides = array<i32>} : memref<256x1152xbf16, #tpu.memory_space<vmem>>, vector<256x128xbf16>,
    %c0_120 = arith.constant 0 : index
    %c0_121 = arith.constant 0 : index
    %97 = vector.load %arg9[%c0_120, %c0_121] : memref<256x1152xbf16, #tpu.memory_space<vmem>>, vector<256x1152xbf16>
    %c0_122 = arith.constant 0 : index
    %c0_123 = arith.constant 0 : index
    %98 = vector.load %arg4[%c0_122, %c0_123] : memref<1152x128xbf16, #tpu.memory_space<vmem>>, vector<1152x128xbf16>
    %cst_124 = arith.constant dense<0.000000e+00> : vector<256x128xf32>
    %99 = tpu.matmul %97, %98, %cst_124 {dimension_numbers = #tpu.dot_dimension_numbers<[1], [0], [0], [1], [0, 0, 1, 1], [], []>} : vector<256x1152xbf16>, vector<1152x128xbf16>, vector<256x128xf32> -> vector<256x128xf32>
    %c0_125 = arith.constant 0 : index
    %c0_126 = arith.constant 0 : index
    %100 = vector.load %arg6[%c0_125, %c0_126] : memref<1x128xf32, #tpu.memory_space<vmem>>, vector<1x128xf32>
    %101 = vector.broadcast %100 : vector<1x128xf32> to vector<256x128xf32>
    %102 = arith.addf %99, %101 : vector<256x128xf32>
    %c0_127 = arith.constant 0 : index
    %c0_128 = arith.constant 0 : index
    %c0_129 = arith.constant 0 : index
    %103 = vector.load %arg2[%c0_127, %c0_128, %c0_129] : memref<1x256x128xf32, #tpu.memory_space<vmem>>, vector<1x256x128xf32>
    %104 = vector.shape_cast %103 : vector<1x256x128xf32> to vector<256x128xf32>
    %105 = arith.addf %102, %104 : vector<256x128xf32>
    %c0_130 = arith.constant 0 : index
    %c0_131 = arith.constant 0 : index
    %c0_132 = arith.constant 0 : index
    %106 = vector.load %arg7[%c0_130, %c0_131, %c0_132] : memref<1x256x128xf32, #tpu.memory_space<vmem>>, vector<1x256x128xf32>
    %107 = vector.shape_cast %106 : vector<1x256x128xf32> to vector<256x128xf32>
    %108 = vector.shape_cast %105 : vector<256x128xf32> to vector<1x256x128xf32>
    tpu.vector_store %arg7[%c0_130, %c0_131, %c0_132], %108 {strides = array<i32>} : memref<1x256x128xf32, #tpu.memory_space<vmem>>, vector<1x256x128xf32>,
    return
  }
  func.func @transform_0(%arg0: i32) -> (i32, i32, i32, i32, i32) {
    %c0_i32 = arith.constant 0 : i32
    %c0_i32_0 = arith.constant 0 : i32
    %c0_i32_1 = arith.constant 0 : i32
    %c0_i32_2 = arith.constant 0 : i32
    %c0_i32_3 = arith.constant 0 : i32
    return %arg0, %c0_i32, %c0_i32_0, %c0_i32_1, %c0_i32_2 : i32, i32, i32, i32, i32
  }
  func.func @transform_1(%arg0: i32) -> (i32, i32, i32) {
    %c0_i32 = arith.constant 0 : i32
    %c0_i32_0 = arith.constant 0 : i32
    %c0_i32_1 = arith.constant 0 : i32
    return %arg0, %c0_i32, %c0_i32_0 : i32, i32, i32
  }
  func.func @transform_2(%arg0: i32) -> (i32, i32) {
    %c0_i32 = arith.constant 0 : i32
    %c0_i32_0 = arith.constant 0 : i32
    %c0_i32_1 = arith.constant 0 : i32
    return %c0_i32, %c0_i32_0 : i32, i32
  }
  func.func @transform_3(%arg0: i32) -> (i32, i32) {
    %c0_i32 = arith.constant 0 : i32
    %c0_i32_0 = arith.constant 0 : i32
    %c0_i32_1 = arith.constant 0 : i32
    return %c0_i32, %c0_i32_0 : i32, i32
  }
  func.func @transform_4(%arg0: i32) -> (i32, i32) {
    %c0_i32 = arith.constant 0 : i32
    %c0_i32_0 = arith.constant 0 : i32
    %c0_i32_1 = arith.constant 0 : i32
    return %c0_i32, %c0_i32_0 : i32, i32
  }
  func.func @transform_5(%arg0: i32) -> (i32, i32) {
    %c0_i32 = arith.constant 0 : i32
    %c0_i32_0 = arith.constant 0 : i32
    %c0_i32_1 = arith.constant 0 : i32
    return %c0_i32, %c0_i32_0 : i32, i32
  }
  func.func @transform_6(%arg0: i32) -> (i32, i32, i32) {
    %c0_i32 = arith.constant 0 : i32
    %c0_i32_0 = arith.constant 0 : i32
    %c0_i32_1 = arith.constant 0 : i32
    return %arg0, %c0_i32, %c0_i32_0 : i32, i32, i32
  }
}

</mosaic_0001>

<bundles_post_ra>
// kernel: tpu_custom_call.1
= control target key start
LH: loop header
LB: loop body
LE: loop exit
PB: predicated region body
PF: predicated region fallthrough
CT: control target
= control target key end

     0   :  { %11 = vsyncpa [#allocation6], 0  ;;  %s8210_s0 = inlined_call_operand.vmem [shape: f32[2,1,18,18,128], index: 0, kind: input, shape index: {}]   ;;  %s8211_s1 = inlined_call_operand.hbm [shape: f32[2,256,128], index: 1, kind: input, shape index: {}]   ;;  %s8212_s2 = inlined_call_operand.vmem [shape: bf16[1152,128], index: 2, kind: input, shape index: {}]   ;;  %s8213_s3 = inlined_call_operand.vmem [shape: bf16[1152,128], index: 3, kind: input, shape index: {}]   ;;  %s8214_s4 = inlined_call_operand.vmem [shape: f32[1,128], index: 4, kind: input, shape index: {}]   ;;  %s8215_s5 = inlined_call_operand.vmem [shape: f32[1,128], index: 5, kind: input, shape index: {}]   ;;  %s8216_s6 = inlined_call_operand.hbm [shape: f32[2,256,128], index: 6, kind: output, shape index: {}]  }
   0x1   :  { %13 = vsyncpa [#allocation6 + $0x1], 0 }
   0x2   :  { %14 = vsyncpa [#allocation7], 0 }
   0x3   :  { %16 = vsyncpa [#allocation7 + $0x1], 0  ;;  %s6542_s21 = smov 0   ;;  %s6544_s22 = smov 0  }
   0x4   :  { %s6546_s23 = smov 0   ;;  %s6548_s24 = smov 0  }
   0x5 LB: > { %s6563_s25 = sadd.s32 4294967295, %s6497_s24   ;;  %s4809_s26 = sadd.s32 4294967294, %s6497_s24   ;;  %s6497_s24 = sphi %s6548_s24, %s8229_s24   ;;  %s6493_s23 = sphi %s6546_s23, %s8228_s23   ;;  %s6489_s22 = sphi %s6544_s22, %s8227_s22   ;;  %s6485_s21 = sphi %s6542_s21, %s8226_s21  }
   0x6   : > { %s6567_s27 = sadd.s32 1, %s6497_s24   ;;  %s55_s28 = sadd.s32 1, %s6493_s23 }
   0x7   : > { %s52_s29 = ssub.s32 %s6497_s24, %s6567_s27  ;;  %p62_p0 = scmp.ne.s32.totalorder %s6493_s23, %s6489_s22 }
   0x8   : > { %p53_p1 = scmp.eq.s32.totalorder %s52_s29, 0  ;;  %p63_p2 = scmp.eq.s32.totalorder %s6497_s24, 0 }
   0x9   : > { %p68_p3 = scmp.ne.s32.totalorder %s6489_s22, %s6485_s21  ;;  %p69_p4 = scmp.eq.s32.totalorder %s6563_s25, 0 }
   0xa   : > { %s6579_s30 = scalar_select %p53_p1, %s6493_s23, %s55_s28  }
   0xb   : > { %p6581_p5 = por %p63_p2, %p62_p0  ;;  %p6585_p6 = por %p69_p4, %p68_p3 }
   0xc   : > { %p176_p7 = scmp.eq.s32.totalorder %s6563_s25, 1  ;;  %p182_p8 = scmp.eq.s32.totalorder %s4809_s26, 1 }
   0xd   : > { %p6217_p10 = scmp.lt.s32.totalorder %s6497_s24, 2  ;;  %s222_s11 = sand.u32 1, %s6493_s23  }
   0xe   : > { %p6592_p11 = por %p176_p7, %p62_p0  ;;  %p6596_p12 = por %p182_p8, %p68_p3 }
   0xf   : > { %s5162_s12 = sshll.u32 %s6497_s24, 12  ;;  %s4812_s13 = sshll.u32 %s222_s11, 8 }
  0x10   : > { %s8220_s9 = scalar_select %p6592_p11, 1, 0 }
  0x11   : > { %s8221_s10 = scalar_select %p6596_p12, 1, 0 }
  0x12   : > { %s6605_s16 = scalar_lea.hbm %s8211_s1, %s5162_s12  ;;  %s226_s17 = scalar_lea.vmem [#allocation5], %s4812_s13 }
  0x13   : > { %s233_s18 = sshll.u32 %s226_s17, 4  ;;  %p6609_p13 = pnand %p6217_p10, %p6581_p5  ;;  %s6613_s18 = int_to_ptr.vmem [resolvable:$true] %s233_s18 }
  0x14   : > { %s6615_s20 = scalar_lea.sflag [#allocation6], %s222_s11  ;;  %s6401_s26 = scalar_lea.hbm %s6605_s16, 4096 }
  0x15   : > { %p6402_p0 = scmp.ne.s32.totalorder %s6605_s16, %s6401_s26  ;;  %p6403_p1 = pneg %p6609_p13 }
  0x16   : > { %s6406_s7 = scalar_lea.hbm %s8211_s1, 8192  ;;  %p6407_p4 = scmp.lt.u32.totalorder %s6605_s16, %s8211_s1 }
  0x17   : > { %p6404_p2 = pnand %p6403_p1, %p6402_p0  ;;  %p6408_p5 = scmp.lt.u32.totalorder %s6406_s7, %s6401_s26 }
  0x18   : > { %p6410_p8 = scmp.lt.u32.totalorder %s6401_s26, %s6605_s16 }
  0x19   : > { %p6405_p3 = pneg %p6404_p2  ;;  %p6409_p7 = por %p6408_p5, %p6407_p4 }
  0x1b   : > { %p6411_p10 = por %p6410_p8, %p6409_p7 }
  0x1d   : > { %p6412_p9 = pnand %p6411_p10, %p6405_p3 }
  0x1f   : > { %6415 = shalt.err (!%p6412_p9)
}
  0x20   : > { %s6416_s11 = scalar_lea.vmem %s6613_s18, 4096  ;;  %s6499_s14 = smov [#allocation5]  }
  0x21   : > { %p6417_p0 = scmp.ne.s32.totalorder %s6613_s18, %s6416_s11  ;;  %s6421_s15 = sshll.u32 %s6499_s14, 4  ;;  %s6422_s15 = int_to_ptr.vmem [resolvable:$false] %s6421_s15 }
  0x22   : > { %s6423_s17 = scalar_lea.vmem %s6422_s15, 8192  ;;  %p6424_p11 = scmp.lt.s32.totalorder %s6613_s18, %s6422_s15 }
  0x23   : > { %p6419_p2 = pnand %p6417_p0, %p6403_p1  ;;  %p6425_p4 = scmp.lt.s32.totalorder %s6423_s17, %s6416_s11 }
  0x25   : > { %p6420_p12 = pneg %p6419_p2  ;;  %p6426_p5 = por %p6425_p4, %p6424_p11 }
  0x27   : > { %p6427_p7 = pnand %p6426_p5, %p6420_p12 }
  0x29   : > { %6430 = shalt.err (!%p6427_p7)
}
  0x2a   : > { %s6500_s26 = smov 128   ;;  %s6501_s28 = smov 8  }
  0x2b   : > { %6212 = dma.hbm_to_vmem [thread:$0]  (!%p6609_p13), %s6605_s16, 4096, %s6613_s18, %s6615_s20, %s6500_s26, %s6500_s26, %s6501_s28  }
  0x2c   : > { %p4815_p9 = scmp.ge.s32.totalorder %s6497_s24, 1  ;;  %p241_p1 = scmp.lt.s32.totalorder %s6497_s24, 3 }
  0x2e   : > { %p242_p3 = pnand %p4815_p9, %p241_p1 }
  0x2f   : > { %s6646_s29 = sand.u32 (!%p242_p3), 1, %s6489_s22  }
  0x30   : > { %245 = sbr.rel (%p242_p3) target bundleno = 1112 (0x458), region = 44  ;;  %s4816_s7 = sshll.u32 (!%p242_p3), %s6646_s29, 8 }
  0x31   : > { %s248_s12 = scalar_lea.sflag (!%p242_p3), [#allocation6], %s6646_s29  ;;  %s6652_s13 = scalar_lea.vmem (!%p242_p3), [#allocation5], %s4816_s7 }
  0x37   : > { %6476 = dma.done.wait (%p6585_p6), %s248_s12, 4096  }
  0x38   : > { %6478 = vsyncadd (%p6585_p6), %s248_s12, 4294963200  ;;  %v6256_v0 = vld [vmem:[%s8212_s2 + $0x40] sm:$0xff]   ;;  %v6260_v4 = vld [vmem:[%s8212_s2 + $0x48] sm:$0xff]   ;;  %p285_p6 = scmp.lt.s32.totalorder %s6563_s25, 1  ;;  %s8065_s8 = scalar_lea.vmem [#allocation8], %s4816_s7 }
  0x39   : > { %v6257_v1 = vld [vmem:[%s8212_s2] sm:$0xff]   ;;  %5164 = vmatprep.subr.bf16.mxu0 %v6256_v0  ;;  %v6261_v5 = vld [vmem:[%s8212_s2 + $0x8] sm:$0xff]   ;;  %v6264_v8 = vld [vmem:[%s8212_s2 + $0x50] sm:$0xff]   ;;  %s5163_s7 = sshll.u32 %s6563_s25, 12  ;;  %p8223_p12 = scmp.ne.s32.totalorder %s8220_s9, 0 }
  0x3a   : > { %v6258_v2 = vld [vmem:[%s8212_s2 + $0xc0] sm:$0xff]   ;;  %5165 = vmatpush3.bf16.msra.mxu0 %v6257_v1  ;;  %v6262_v6 = vld [vmem:[%s8212_s2 + $0xc8] sm:$0xff]   ;;  %v6265_v9 = vld [vmem:[%s8212_s2 + $0x10] sm:$0xff]   ;;  %s286_s15 = scalar_select %p285_p6, %s6563_s25, 1 }
  0x3b   : > { %v6259_v3 = vld [vmem:[%s8212_s2 + $0x80] sm:$0xff]   ;;  %5276 = vmatprep.subr.bf16.mxu1 %v6258_v2  ;;  %5166 = vmatprep.subr.bf16.mxu0 %v6260_v4  ;;  %v6263_v7 = vld [vmem:[%s8212_s2 + $0x88] sm:$0xff]   ;;  %v6266_v10 = vld [vmem:[%s8212_s2 + $0xd0] sm:$0xff]   ;;  %s8161_s12 = scalar_lea.hbm %s8216_s6, %s5163_s7  ;;  %s4711_s25 = scalar_lea.sflag [#allocation7], %s6646_s29 }
  0x3c   : > { %5277 = vmatpush3.bf16.msra.mxu1 %v6259_v3  ;;  %v6267_v11 = vld [vmem:[%s8212_s2 + $0x90] sm:$0xff]   ;;  %v6268_v12 = vld [vmem:[%s8212_s2 + $0x58] sm:$0xff]   ;;  %v6272_v16 = vld [vmem:[%s8212_s2 + $0x60] sm:$0xff]   ;;  %s6204_s20 = smul.u32 432, %s286_s15  ;;  %s6504_s16 = smov [#allocation8]  }
  0x3d   : > { %5278 = vmatprep.subr.bf16.mxu1 %v6262_v6  ;;  %v6269_v13 = vld [vmem:[%s8212_s2 + $0x18] sm:$0xff]   ;;  %v6273_v17 = vld [vmem:[%s8212_s2 + $0x20] sm:$0xff]   ;;  %v6276_v20 = vld [vmem:[%s8212_s2 + $0x68] sm:$0xff]   ;;  %s6435_s15 = sshll.u32 %s6504_s16, 4  ;;  %s6436_s15 = int_to_ptr.vmem [resolvable:$false] %s6435_s15 }
  0x3e   : > { %5167 = vmatpush3.bf16.msra.mxu0 %v6261_v5  ;;  %v6270_v14 = vld [vmem:[%s8212_s2 + $0xd8] sm:$0xff]   ;;  %v6274_v18 = vld [vmem:[%s8212_s2 + $0xe0] sm:$0xff]   ;;  %v6277_v21 = vld [vmem:[%s8212_s2 + $0x28] sm:$0xff]   ;;  %s6750_s19 = scalar_lea.vmem %s8210_s0, %s6204_s20  ;;  %s4724_s20 = sshll.u32 %s8065_s8, 4  ;;  %s8163_s20 = int_to_ptr.vmem [resolvable:$true] %s4724_s20 }
  0x3f   : > { %5168 = vmatprep.subr.bf16.mxu0 %v6264_v8  ;;  %v6271_v15 = vld [vmem:[%s8212_s2 + $0x98] sm:$0xff]   ;;  %v6275_v19 = vld [vmem:[%s8212_s2 + $0xa0] sm:$0xff]   ;;  %v6278_v22 = vld [vmem:[%s8212_s2 + $0xe8] sm:$0xff]   ;;  %s6437_s18 = scalar_lea.vmem %s6436_s15, 8192  ;;  %p6438_p10 = scmp.lt.s32.totalorder %s8163_s20, %s6436_s15 }
  0x40   : > { %5279 = vmatpush3.bf16.msra.mxu1 %v6263_v7  ;;  %v6279_v23 = vld [vmem:[%s8212_s2 + $0xa8] sm:$0xff]   ;;  %v6280_v24 = vld [vmem:[%s8212_s2 + $0x70] sm:$0xff]   ;;  %v6284_v28 = vld [vmem:[%s8212_s2 + $0x78] sm:$0xff]  }
  0x41   : > { %5280 = vmatprep.subr.bf16.mxu1 %v6266_v10  ;;  %v6281_v25 = vld [vmem:[%s8212_s2 + $0x30] sm:$0xff]   ;;  %v6285_v29 = vld [vmem:[%s8212_s2 + $0x38] sm:$0xff]   ;;  %v355_v31 = vld [vmem:[%s6750_s19 + $0x1] sm:$0xff] }
  0x42   : > { %5169 = vmatpush3.bf16.msra.mxu0 %v6265_v9  ;;  %v6282_v26 = vld [vmem:[%s8212_s2 + $0xf0] sm:$0xff]   ;;  %v6286_v30 = vld [vmem:[%s8212_s2 + $0xf8] sm:$0xff]   ;;  %v291_v35 = vld [vmem:[%s6750_s19] sm:$0xff] }
  0x43   : > { %5170 = vmatprep.subr.bf16.mxu0 %v6268_v12  ;;  %v6283_v27 = vld [vmem:[%s8212_s2 + $0xb0] sm:$0xff]   ;;  %v6287_v34 = vld [vmem:[%s8212_s2 + $0xb8] sm:$0xff]   ;;  %v292_v36 = vld [vmem:[%s6750_s19 + $0x8] sm:$0xff] }
  0x44   : > { %5281 = vmatpush3.bf16.msra.mxu1 %v6267_v11  ;;  %v356_v32 = vld [vmem:[%s6750_s19 + $0x9] sm:$0xff]  ;;  %v323_v37 = vpack.c.bf16 %v292_v36, %v291_v35  ;;  %v6288_v38 = vld [vmem:[%s8212_s2 + $0x140] sm:$0xff]   ;;  %v4819_v39 = vld [vmem:[%s6750_s19 + $0x18] sm:$0xff] }
  0x45   : > { %5282 = vmatprep.subr.bf16.mxu1 %v6270_v14  ;;  %v387_v33 = vpack.c.bf16 %v356_v32, %v355_v31  ;;  %v4820_v40 = vld [vmem:[%s6750_s19 + $0x20] sm:$0xff]  ;;  %v420_v44 = vld [vmem:[%s6750_s19 + $0xa] sm:$0xff]  ;;  %v4822_v49 = vld [vmem:[%s6750_s19 + $0x38] sm:$0xff] }
  0x46   : > { %5171 = vmatpush3.bf16.msra.mxu0 %v6269_v13  ;;  %v516_v41 = vpack.c.bf16 %v4820_v40, %v4819_v39  ;;  %v6289_v42 = vld [vmem:[%s8212_s2 + $0x100] sm:$0xff]   ;;  %v4821_v48 = vld [vmem:[%s6750_s19 + $0x30] sm:$0xff]  ;;  %v6290_v56 = vld [vmem:[%s8212_s2 + $0x148] sm:$0xff]  }
  0x47   : > { %5172 = vmatprep.subr.bf16.mxu0 %v6272_v16  ;;  %1628 = vmatprep.mubr.bf16.mxu0 %v387_v33  ;;  %v419_v43 = vld [vmem:[%s6750_s19 + $0x2] sm:$0xff]  ;;  %v357_v45 = vld [vmem:[%s6750_s19 + $0x19] sm:$0xff]  ;;  %v6781_v51 = vpack.c.bf16 %v4822_v49, %v4821_v48  ;;  %v359_v54 = vld [vmem:[%s6750_s19 + $0x31] sm:$0xff] }
  0x48   : > { %5283 = vmatpush3.bf16.msra.mxu1 %v6271_v15  ;;  %1789 = vmatprep.mubr.bf16.mxu1 %v516_v41  ;;  %v451_v46 = vpack.c.bf16 %v420_v44, %v419_v43  ;;  %v358_v47 = vld [vmem:[%s6750_s19 + $0x21] sm:$0xff]  ;;  %v360_v55 = vld [vmem:[%s6750_s19 + $0x39] sm:$0xff]  ;;  %v4824_v58 = vld [vmem:[%s6750_s19 + $0x50] sm:$0xff] }
  0x49   : > { %5284 = vmatprep.subr.bf16.mxu1 %v6274_v18  ;;  %v6779_v50 = vpack.c.bf16 %v358_v47, %v357_v45  ;;  %v421_v52 = vld [vmem:[%s6750_s19 + $0x1a] sm:$0xff]  ;;  %v422_v53 = vld [vmem:[%s6750_s19 + $0x22] sm:$0xff]  ;;  %v6794_v59 = vpack.c.bf16 %v360_v55, %v359_v54  ;;  %v362_v0 = vld [vmem:[%s6750_s19 + $0x51] sm:$0xff] }
  0x4a   : > { %5173 = vmatpush3.bf16.msra.mxu0 %v6273_v17  ;;  %v4823_v57 = vld [vmem:[%s6750_s19 + $0x48] sm:$0xff]  ;;  %v6799_v61 = vpack.c.bf16 %v422_v53, %v421_v52  ;;  %v6292_v1 = vld [vmem:[%s8212_s2 + $0x150] sm:$0xff]   ;;  %v424_v4 = vld [vmem:[%s6750_s19 + $0x3a] sm:$0xff] }
  0x4b   : > { %5174 = vmatprep.subr.bf16.mxu0 %v6276_v20  ;;  %v6291_v60 = vld [vmem:[%s8212_s2 + $0x108] sm:$0xff]   ;;  %v6801_v62 = vpack.c.bf16 %v4824_v58, %v4823_v57  ;;  %v6293_v2 = vld [vmem:[%s8212_s2 + $0x110] sm:$0xff]   ;;  %v4825_v6 = vld [vmem:[%s6750_s19 + $0x60] sm:$0xff] }
  0x4c   : > { %5285 = vmatpush3.bf16.msra.mxu1 %v6275_v19  ;;  %v361_v63 = vld [vmem:[%s6750_s19 + $0x49] sm:$0xff]  ;;  %v423_v3 = vld [vmem:[%s6750_s19 + $0x32] sm:$0xff]  ;;  %v363_v12 = vld [vmem:[%s6750_s19 + $0x61] sm:$0xff] }
  0x4d   : > { %5286 = vmatprep.subr.bf16.mxu1 %v6278_v22  ;;  %v6816_v5 = vpack.c.bf16 %v362_v0, %v361_v63  ;;  %v4826_v7 = vld [vmem:[%s6750_s19 + $0x68] sm:$0xff]  ;;  %v6820_v8 = vpack.c.bf16 %v424_v4, %v423_v3  ;;  %v6294_v10 = vld [vmem:[%s8212_s2 + $0x158] sm:$0xff]   ;;  %v4828_v18 = vld [vmem:[%s6750_s19 + $0x80] sm:$0xff] }
  0x4e   : > { %5175 = vmatpush3.bf16.msra.mxu0 %v6277_v21  ;;  %v6823_v9 = vpack.c.bf16 %v4826_v7, %v4825_v6  ;;  %v6295_v11 = vld [vmem:[%s8212_s2 + $0x118] sm:$0xff]   ;;  %v364_v13 = vld [vmem:[%s6750_s19 + $0x69] sm:$0xff]  ;;  %v6296_v19 = vld [vmem:[%s8212_s2 + $0x160] sm:$0xff]  }
  0x4f   : > { %5176 = vmatprep.subr.bf16.mxu0 %v6280_v24  ;;  %v425_v14 = vld [vmem:[%s6750_s19 + $0x4a] sm:$0xff]  ;;  %v426_v15 = vld [vmem:[%s6750_s19 + $0x52] sm:$0xff]  ;;  %v6839_v17 = vpack.c.bf16 %v364_v13, %v363_v12  ;;  %v6297_v21 = vld [vmem:[%s8212_s2 + $0x120] sm:$0xff]  }
  0x50   : > { %5287 = vmatpush3.bf16.msra.mxu1 %v6279_v23  ;;  %v4827_v16 = vld [vmem:[%s6750_s19 + $0x78] sm:$0xff]  ;;  %v6845_v20 = vpack.c.bf16 %v426_v15, %v425_v14  ;;  %v427_v23 = vld [vmem:[%s6750_s19 + $0x62] sm:$0xff]  ;;  %v6301_v39 = vld [vmem:[%s8212_s2 + $0x130] sm:$0xff]  }
  0x51   : > { %5288 = vmatprep.subr.bf16.mxu1 %v6282_v26  ;;  %v6851_v22 = vpack.c.bf16 %v4828_v18, %v4827_v16  ;;  %v365_v24 = vld [vmem:[%s6750_s19 + $0x79] sm:$0xff]  ;;  %v428_v26 = vld [vmem:[%s6750_s19 + $0x6a] sm:$0xff]  ;;  %v430_v35 = vld [vmem:[%s6750_s19 + $0x82] sm:$0xff] }
  0x52   : > { %5177 = vmatpush3.bf16.msra.mxu0 %v6281_v25  ;;  %v366_v25 = vld [vmem:[%s6750_s19 + $0x81] sm:$0xff]  ;;  %v6870_v32 = vpack.c.bf16 %v428_v26, %v427_v23  ;;  %v367_v36 = vld [vmem:[%s6750_s19 + $0x91] sm:$0xff]  ;;  %v369_v53 = vld [vmem:[%s6750_s19 + $0xa9] sm:$0xff] }
  0x53   : > { %5178 = vmatprep.subr.bf16.mxu0 %v6284_v28  ;;  %v4830_v28 = vld [vmem:[%s6750_s19 + $0x98] sm:$0xff]  ;;  %v6299_v31 = vld [vmem:[%s8212_s2 + $0x128] sm:$0xff]   ;;  %v6302_v43 = vld [vmem:[%s8212_s2 + $0x1c0] sm:$0xff]  }
  0x54   : > { %5289 = vmatpush3.bf16.msra.mxu1 %v6283_v27  ;;  %v4829_v27 = vld [vmem:[%s6750_s19 + $0x90] sm:$0xff]  ;;  %v4831_v40 = vld [vmem:[%s6750_s19 + $0xa8] sm:$0xff]  ;;  %v6303_v44 = vld [vmem:[%s8212_s2 + $0x180] sm:$0xff]  }
  0x55   : > { %5290 = vmatprep.subr.bf16.mxu1 %v6286_v30  ;;  %v6865_v30 = vpack.c.bf16 %v366_v25, %v365_v24  ;;  %v6873_v33 = vpack.c.bf16 %v4830_v28, %v4829_v27  ;;  %v6305_v48 = vld [vmem:[%s8212_s2 + $0x188] sm:$0xff]   ;;  %v431_v49 = vld [vmem:[%s6750_s19 + $0x92] sm:$0xff]  ;;  %v432_v52 = vld [vmem:[%s6750_s19 + $0x9a] sm:$0xff] }
  0x56   : > { %5179 = vmatpush3.bf16.msra.mxu0 %v6285_v29  ;;  %v6298_v29 = vld [vmem:[%s8212_s2 + $0x168] sm:$0xff]   ;;  %v370_v54 = vld [vmem:[%s6750_s19 + $0xb1] sm:$0xff]  ;;  %v4833_v55 = vld [vmem:[%s6750_s19 + $0xc0] sm:$0xff]  ;;  %v6929_v0 = vpack.c.bf16 %v432_v52, %v431_v49 }
  0x57   : > { %5388 = vmatprep.subr.bf16.mxu0 %v6288_v38  ;;  %v6300_v38 = vld [vmem:[%s8212_s2 + $0x170] sm:$0xff]   ;;  %v6923_v58 = vpack.c.bf16 %v370_v54, %v369_v53  ;;  %v6308_v63 = vld [vmem:[%s8212_s2 + $0x1d8] sm:$0xff]   ;;  %v6312_v13 = vld [vmem:[%s8212_s2 + $0x1e0] sm:$0xff]  }
  0x58   : > { %5291 = vmatpush3.bf16.msra.mxu1 %v6287_v34  ;;  %v429_v34 = vld [vmem:[%s6750_s19 + $0x7a] sm:$0xff]  ;;  %v6307_v57 = vld [vmem:[%s8212_s2 + $0x190] sm:$0xff]   ;;  %v6314_v18 = vld [vmem:[%s8212_s2 + $0x1e8] sm:$0xff]  }
  0x59   : > { %1629 = vmatmul.mubr.bf16.vlgmr.msra.gmra.mrb[0].mxu0 %v323_v37  ;;  %v368_v37 = vld [vmem:[%s6750_s19 + $0x99] sm:$0xff]  ;;  %v6898_v45 = vpack.c.bf16 %v430_v35, %v429_v34  ;;  %5500 = vmatprep.subr.bf16.mxu1 %v6302_v43  ;;  %v433_v6 = vld [vmem:[%s6750_s19 + $0xaa] sm:$0xff]  ;;  %v435_v26 = vld [vmem:[%s6750_s19 + $0xc2] sm:$0xff] }
  0x5a   : > { %5389 = vmatpush3.bf16.msra.mxu0 %v6289_v42  ;;  %1636 = vmatprep.mubr.bf16.mxu0 %v6779_v50  ;;  %v6890_v42 = vpack.c.bf16 %v368_v37, %v367_v36  ;;  %v6310_v3 = vld [vmem:[%s8212_s2 + $0x178] sm:$0xff]   ;;  %v6313_v14 = vld [vmem:[%s8212_s2 + $0x1a0] sm:$0xff]   ;;  %v6315_v24 = vld [vmem:[%s8212_s2 + $0x1a8] sm:$0xff]  }
  0x5b   : > { %1790 = vmatmul.mubr.bf16.vlgmr.msra.gmra.mrb[0].mxu1 %v451_v46  ;;  %5390 = vmatprep.subr.bf16.mxu0 %v6290_v56  ;;  %v6304_v46 = vld [vmem:[%s8212_s2 + $0x1c8] sm:$0xff]   ;;  %v6306_v56 = vld [vmem:[%s8212_s2 + $0x1d0] sm:$0xff]   ;;  %v6311_v4 = vld [vmem:[%s8212_s2 + $0x138] sm:$0xff]  }
  0x5c   : > { %1797 = vmatprep.mubr.bf16.mxu1 %v6781_v51  ;;  %5501 = vmatpush3.bf16.msra.mxu1 %v6303_v44  ;;  %v434_v7 = vld [vmem:[%s6750_s19 + $0xb2] sm:$0xff]  ;;  %v4836_v16 = vld [vmem:[%s6750_s19 + $0xe0] sm:$0xff]  ;;  %v436_v27 = vld [vmem:[%s6750_s19 + $0xca] sm:$0xff] }
  0x5d   : > { %5502 = vmatprep.subr.bf16.mxu1 %v6304_v46  ;;  %v4835_v12 = vld [vmem:[%s6750_s19 + $0xd8] sm:$0xff]  ;;  %v6316_v25 = vld [vmem:[%s8212_s2 + $0x1f0] sm:$0xff]   ;;  %v374_v28 = vld [vmem:[%s6750_s19 + $0xe1] sm:$0xff] }
  0x5e   : > { %5391 = vmatpush3.bf16.msra.mxu0 %v6291_v60  ;;  %v4834_v60 = vld [vmem:[%s6750_s19 + $0xc8] sm:$0xff]  ;;  %v373_v23 = vld [vmem:[%s6750_s19 + $0xd9] sm:$0xff]  ;;  %v6317_v34 = vld [vmem:[%s8212_s2 + $0x1b0] sm:$0xff]  }
  0x5f   : > { %5392 = vmatprep.subr.bf16.mxu0 %v6292_v1  ;;  %v6932_v1 = vpack.c.bf16 %v4834_v60, %v4833_v55  ;;  %v6318_v35 = vld [vmem:[%s8212_s2 + $0x1f8] sm:$0xff]   ;;  %v6989_v36 = vpack.c.bf16 %v374_v28, %v373_v23  ;;  %v6994_v37 = vld [vmem:[%s8212_s2 + $0x200] sm:$0xff]   ;;  %v4840_v49 = vld [vmem:[%s6750_s19 + $0x110] sm:$0xff] }
  0x60   : > { %5503 = vmatpush3.bf16.msra.mxu1 %v6305_v48  ;;  %v376_v43 = vld [vmem:[%s6750_s19 + $0xf9] sm:$0xff]  ;;  %v438_v46 = vld [vmem:[%s6750_s19 + $0xe2] sm:$0xff]  ;;  %v4845_v28 = vld [vmem:[%s6750_s19 + $0x150] sm:$0xff] }
  0x61   : > { %1637 = vmatmul.mubr.bf16.gmra.mrb[4].mxu0 %v516_v41  ;;  %v4832_v41 = vld [vmem:[%s6750_s19 + $0xb0] sm:$0xff]  ;;  %5504 = vmatprep.subr.bf16.mxu1 %v6306_v56  ;;  %v437_v44 = vld [vmem:[%s6750_s19 + $0xda] sm:$0xff]  ;;  %v4839_v48 = vld [vmem:[%s6750_s19 + $0x108] sm:$0xff] }
  0x62   : > { %1644 = vmatprep.mubr.bf16.mxu0 %v6794_v59  ;;  %5393 = vmatpush3.bf16.msra.mxu0 %v6293_v2  ;;  %v6904_v47 = vpack.c.bf16 %v4832_v41, %v4831_v40  ;;  %v6309_v2 = vld [vmem:[%s8212_s2 + $0x198] sm:$0xff]   ;;  %v7016_v53 = vpack.c.bf16 %v438_v46, %v437_v44  ;;  %v7019_v54 = vpack.c.bf16 %v4840_v49, %v4839_v48  ;;  %v377_v55 = vld [vmem:[%s6750_s19 + $0x109] sm:$0xff] }
  0x63   : > { %1798 = vmatmul.mubr.bf16.gmra.mrb[4].mxu1 %v6799_v61  ;;  %5394 = vmatprep.subr.bf16.mxu0 %v6294_v10  ;;  %v371_v10 = vld [vmem:[%s6750_s19 + $0xc1] sm:$0xff]  ;;  %v375_v40 = vld [vmem:[%s6750_s19 + $0xf1] sm:$0xff]  ;;  %v384_v44 = vld [vmem:[%s6750_s19 + $0x159] sm:$0xff] }
  0x64   : > { %1805 = vmatprep.mubr.bf16.mxu1 %v6801_v62  ;;  %5505 = vmatpush3.bf16.msra.mxu1 %v6307_v57  ;;  %v6319_v41 = vld [vmem:[%s8212_s2 + $0x1b8] sm:$0xff]   ;;  %v7014_v52 = vpack.c.bf16 %v376_v43, %v375_v40  ;;  %v446_v43 = vld [vmem:[%s6750_s19 + $0x142] sm:$0xff]  ;;  %v4848_v48 = vld [vmem:[%s6750_s19 + $0x170] sm:$0xff] }
  0x65   : > { %5506 = vmatprep.subr.bf16.mxu1 %v6308_v63  ;;  %v378_v56 = vld [vmem:[%s6750_s19 + $0x111] sm:$0xff]  ;;  %v440_v60 = vld [vmem:[%s6750_s19 + $0xfa] sm:$0xff]  ;;  %v4847_v46 = vld [vmem:[%s6750_s19 + $0x168] sm:$0xff] }
  0x66   : > { %5395 = vmatpush3.bf16.msra.mxu0 %v6295_v11  ;;  %v372_v11 = vld [vmem:[%s6750_s19 + $0xc9] sm:$0xff]  ;;  %v439_v57 = vld [vmem:[%s6750_s19 + $0xf2] sm:$0xff]  ;;  %v4841_v63 = vld [vmem:[%s6750_s19 + $0x120] sm:$0xff] }
  0x67   : > { %5396 = vmatprep.subr.bf16.mxu0 %v6296_v19  ;;  %v6957_v15 = vpack.c.bf16 %v372_v11, %v371_v10  ;;  %v6963_v19 = vpack.c.bf16 %v434_v7, %v433_v6  ;;  %v379_v7 = vld [vmem:[%s6750_s19 + $0x121] sm:$0xff]  ;;  %v380_v10 = vld [vmem:[%s6750_s19 + $0x129] sm:$0xff]  ;;  %v383_v40 = vld [vmem:[%s6750_s19 + $0x151] sm:$0xff] }
  0x68   : > { %5507 = vmatpush3.bf16.msra.mxu1 %v6309_v2  ;;  %v4842_v2 = vld [vmem:[%s6750_s19 + $0x128] sm:$0xff]  ;;  %v7078_v49 = vpack.c.bf16 %v384_v44, %v383_v40 }
  0x69   : > { %1645 = vmatmul.mubr.bf16.gmra.mrb[8].mxu0 %v6781_v51  ;;  %5508 = vmatprep.subr.bf16.mxu1 %v6312_v13  ;;  %v7035_v6 = vpack.c.bf16 %v4842_v2, %v4841_v63  ;;  %v441_v11 = vld [vmem:[%s6750_s19 + $0x10a] sm:$0xff]  ;;  %v4843_v13 = vld [vmem:[%s6750_s19 + $0x138] sm:$0xff] }
  0x6a   : > { %1652 = vmatprep.mubr.bf16.mxu0 %v6816_v5  ;;  %5397 = vmatpush3.bf16.msra.mxu0 %v6297_v21  ;;  %v6966_v21 = vpack.c.bf16 %v4836_v16, %v4835_v12  ;;  %v442_v12 = vld [vmem:[%s6750_s19 + $0x112] sm:$0xff]  ;;  %v7046_v16 = vpack.c.bf16 %v380_v10, %v379_v7  ;;  %v448_v2 = vld [vmem:[%s6750_s19 + $0x15a] sm:$0xff]  ;;  %v4850_v10 = vld [vmem:[%s6750_s19 + $0x188] sm:$0xff] }
  0x6b   : > { %1806 = vmatmul.mubr.bf16.gmra.mrb[8].mxu1 %v6820_v8  ;;  %5398 = vmatprep.subr.bf16.mxu0 %v6298_v29  ;;  %v4837_v29 = vld [vmem:[%s6750_s19 + $0xf0] sm:$0xff]  ;;  %v4849_v7 = vld [vmem:[%s6750_s19 + $0x180] sm:$0xff] }
  0x6c   : > { %1813 = vmatprep.mubr.bf16.mxu1 %v6823_v9  ;;  %5509 = vmatpush3.bf16.msra.mxu1 %v6313_v14  ;;  %v4844_v14 = vld [vmem:[%s6750_s19 + $0x140] sm:$0xff]  ;;  %v447_v63 = vld [vmem:[%s6750_s19 + $0x152] sm:$0xff] }
  0x6d   : > { %5510 = vmatprep.subr.bf16.mxu1 %v6314_v18  ;;  %v7048_v18 = vpack.c.bf16 %v442_v12, %v441_v11  ;;  %v7051_v23 = vpack.c.bf16 %v4844_v14, %v4843_v13  ;;  %v7096_v12 = vpack.c.bf16 %v448_v2, %v447_v63  ;;  %v7099_v13 = vpack.c.bf16 %v4850_v10, %v4849_v7  ;;  %v449_v14 = vld [vmem:[%s6750_s19 + $0x16a] sm:$0xff] }
  0x6e   : > { %5399 = vmatpush3.bf16.msra.mxu0 %v6299_v31  ;;  %v4838_v31 = vld [vmem:[%s6750_s19 + $0xf8] sm:$0xff] }
  0x6f   : > { %5400 = vmatprep.subr.bf16.mxu0 %v6300_v38  ;;  %v6996_v38 = vpack.c.bf16 %v436_v27, %v435_v26  ;;  %v443_v26 = vld [vmem:[%s6750_s19 + $0x122] sm:$0xff]  ;;  %v444_v27 = vld [vmem:[%s6750_s19 + $0x12a] sm:$0xff] }
  0x70   : > { %5511 = vmatpush3.bf16.msra.mxu1 %v6315_v24  ;;  %v381_v24 = vld [vmem:[%s6750_s19 + $0x139] sm:$0xff] }
  0x71   : > { %1653 = vmatmul.mubr.bf16.gmra.mrb[12].mxu0 %v6801_v62  ;;  %5512 = vmatprep.subr.bf16.mxu1 %v6316_v25  ;;  %v382_v25 = vld [vmem:[%s6750_s19 + $0x141] sm:$0xff] }
  0x72   : > { %1660 = vmatprep.mubr.bf16.mxu0 %v6839_v17  ;;  %5401 = vmatpush3.bf16.msra.mxu0 %v6301_v39  ;;  %v7000_v39 = vpack.c.bf16 %v4838_v31, %v4837_v29  ;;  %v4846_v29 = vld [vmem:[%s6750_s19 + $0x158] sm:$0xff]  ;;  %v7062_v31 = vpack.c.bf16 %v382_v25, %v381_v24 }
  0x73   : > { %1814 = vmatmul.mubr.bf16.gmra.mrb[12].mxu1 %v6845_v20  ;;  %5402 = vmatprep.subr.bf16.mxu0 %v6310_v3  ;;  %v7030_v3 = vpack.c.bf16 %v378_v56, %v377_v55  ;;  %v7083_v56 = vpack.c.bf16 %v4848_v48, %v4847_v46  ;;  %v450_v24 = vld [vmem:[%s6750_s19 + $0x172] sm:$0xff]  ;;  %v4975_v46 = vld [vmem:[%s6750_s19 + $0x181] sm:$0xff]  ;;  %v4976_v48 = vld [vmem:[%s6750_s19 + $0x189] sm:$0xff] }
  0x74   : > { %1821 = vmatprep.mubr.bf16.mxu1 %v6851_v22  ;;  %5513 = vmatpush3.bf16.msra.mxu1 %v6317_v34  ;;  %v7064_v34 = vpack.c.bf16 %v444_v27, %v443_v26  ;;  %v7106_v25 = vpack.c.bf16 %v450_v24, %v449_v14  ;;  %v6321_v26 = vld [vmem:[%s8212_s2 + $0x208] sm:$0xff]   ;;  %v6322_v27 = vld [vmem:[%s8212_s2 + $0x210] sm:$0xff]   ;;  %v787_v10 = vpack.c.bf16 %v4976_v48, %v4975_v46 }
  0x75   : > { %5514 = vmatprep.subr.bf16.mxu1 %v6318_v35  ;;  %v7067_v35 = vpack.c.bf16 %v4846_v29, %v4845_v28  ;;  %v6329_v28 = vld [vmem:[%s8213_s3] sm:$0xff]   ;;  %v4982_v46 = vld [vmem:[%s6750_s19 + $0x52] sm:$0xff] }
  0x76   : > { %5403 = vmatpush3.bf16.msra.mxu0 %v6311_v4  ;;  %v7032_v4 = vpack.c.bf16 %v440_v60, %v439_v57  ;;  %v385_v57 = vld [vmem:[%s6750_s19 + $0x169] sm:$0xff]  ;;  %v386_v60 = vld [vmem:[%s6750_s19 + $0x171] sm:$0xff] }
  0x77   : > { %6108 = vmatprep.subr.bf16.mxu0 %v6994_v37  ;;  %v7094_v11 = vpack.c.bf16 %v386_v60, %v385_v57 }
  0x78   : > { %5515 = vmatpush3.bf16.msra.mxu1 %v6319_v41  ;;  %v445_v41 = vld [vmem:[%s6750_s19 + $0x13a] sm:$0xff] }
  0x79   : > { %1661 = vmatmul.mubr.bf16.gmra.mrb[16].mxu0 %v6823_v9  ;;  %v7080_v55 = vpack.c.bf16 %v446_v43, %v445_v41 }
  0x7a   : > { %1668 = vmatprep.mubr.bf16.mxu0 %v6865_v30 }
  0x7b   : > { %1822 = vmatmul.mubr.bf16.gmra.mrb[16].mxu1 %v6870_v32 }
  0x7c   : > { %1829 = vmatprep.mubr.bf16.mxu1 %v6873_v33 }
  0x81   : > { %1669 = vmatmul.mubr.bf16.gmra.mrb[20].mxu0 %v6851_v22 }
  0x82   : > { %1676 = vmatprep.mubr.bf16.mxu0 %v6890_v42 }
  0x83   : > { %1830 = vmatmul.mubr.bf16.gmra.mrb[20].mxu1 %v6898_v45 }
  0x84   : > { %1837 = vmatprep.mubr.bf16.mxu1 %v6904_v47 }
  0x89   : > { %1677 = vmatmul.mubr.bf16.gmra.mrb[24].mxu0 %v6873_v33 }
  0x8a   : > { %1684 = vmatprep.mubr.bf16.mxu0 %v6923_v58 }
  0x8b   : > { %1838 = vmatmul.mubr.bf16.gmra.mrb[24].mxu1 %v6929_v0 }
  0x8c   : > { %1845 = vmatprep.mubr.bf16.mxu1 %v6932_v1 }
  0x91   : > { %1685 = vmatmul.mubr.bf16.gmra.mrb[28].mxu0 %v6904_v47 }
  0x92   : > { %1692 = vmatprep.mubr.bf16.mxu0 %v6957_v15 }
  0x93   : > { %1846 = vmatmul.mubr.bf16.gmra.mrb[28].mxu1 %v6963_v19 }
  0x94   : > { %1853 = vmatprep.mubr.bf16.mxu1 %v6966_v21 }
  0x99   : > { %1693 = vmatmul.mubr.bf16.gmra.mrb[32].mxu0 %v6932_v1 }
  0x9a   : > { %1700 = vmatprep.mubr.bf16.mxu0 %v6989_v36 }
  0x9b   : > { %1854 = vmatmul.mubr.bf16.gmra.mrb[32].mxu1 %v6996_v38 }
  0x9c   : > { %1861 = vmatprep.mubr.bf16.mxu1 %v7000_v39 }
  0xa1   : > { %1701 = vmatmul.mubr.bf16.gmra.mrb[36].mxu0 %v6966_v21 }
  0xa2   : > { %1708 = vmatprep.mubr.bf16.mxu0 %v7014_v52 }
  0xa3   : > { %1862 = vmatmul.mubr.bf16.gmra.mrb[36].mxu1 %v7016_v53 }
  0xa4   : > { %1869 = vmatprep.mubr.bf16.mxu1 %v7019_v54 }
  0xa9   : > { %1709 = vmatmul.mubr.bf16.gmra.mrb[40].mxu0 %v7000_v39 }
  0xaa   : > { %1716 = vmatprep.mubr.bf16.mxu0 %v7030_v3 }
  0xab   : > { %1870 = vmatmul.mubr.bf16.gmra.mrb[40].mxu1 %v7032_v4 }
  0xac   : > { %1877 = vmatprep.mubr.bf16.mxu1 %v7035_v6 }
  0xb1   : > { %1717 = vmatmul.mubr.bf16.gmra.mrb[44].mxu0 %v7019_v54 }
  0xb2   : > { %1724 = vmatprep.mubr.bf16.mxu0 %v7046_v16 }
  0xb3   : > { %1878 = vmatmul.mubr.bf16.gmra.mrb[44].mxu1 %v7048_v18 }
  0xb4   : > { %1885 = vmatprep.mubr.bf16.mxu1 %v7051_v23 }
  0xb9   : > { %1725 = vmatmul.mubr.bf16.gmra.mrb[48].mxu0 %v7035_v6 }
  0xba   : > { %1732 = vmatprep.mubr.bf16.mxu0 %v7062_v31 }
  0xbb   : > { %1886 = vmatmul.mubr.bf16.gmra.mrb[48].mxu1 %v7064_v34 }
  0xbc   : > { %1893 = vmatprep.mubr.bf16.mxu1 %v7067_v35 }
  0xc1   : > { %1733 = vmatmul.mubr.bf16.gmra.mrb[52].mxu0 %v7051_v23 }
  0xc2   : > { %1740 = vmatprep.mubr.bf16.mxu0 %v7078_v49 }
  0xc3   : > { %1894 = vmatmul.mubr.bf16.gmra.mrb[52].mxu1 %v7080_v55 }
  0xc4   : > { %1901 = vmatprep.mubr.bf16.mxu1 %v7083_v56 }
  0xc9   : > { %1741 = vmatmul.mubr.bf16.gmra.mrb[56].mxu0 %v7067_v35 }
  0xca   : > { %1748 = vmatprep.mubr.bf16.mxu0 %v7094_v11 }
  0xcb   : > { %1902 = vmatmul.mubr.bf16.gmra.mrb[56].mxu1 %v7096_v12 }
  0xcc   : > { %1909 = vmatprep.mubr.bf16.mxu1 %v7099_v13 }
  0xd1   : > { %1749 = vmatmul.mubr.bf16.gmra.mrb[60].mxu0 %v7083_v56 }
  0xd2   : > { %1950 = vmatprep.mubr.bf16.mxu0 %v6799_v61  ;;  %v6323_v61 = vld [vmem:[%s8212_s2 + $0x218] sm:$0xff]  }
  0xd3   : > { %1910 = vmatmul.mubr.bf16.gmra.mrb[60].mxu1 %v7106_v25 }
  0xd4   : > { %2111 = vmatprep.mubr.bf16.mxu1 %v6794_v59 }
  0xd9   : > { %1951 = vmatmul.mubr.bf16.vlgmr.msra.gmra.mrb[64].mxu0 %v6779_v50  ;;  %v6324_v50 = vld [vmem:[%s8212_s2 + $0x220] sm:$0xff]  }
  0xda   : > { %6109 = vmatpush3.bf16.msra.mxu0 %v6994_v37  ;;  %1958 = vmatprep.mubr.bf16.mxu0 %v6820_v8  ;;  %v7180_v8 = vld [vmem:[%s8214_s4] ss:$0 sm:$0xff] }
  0xdb   : > { %6110 = vmatprep.subr.bf16.mxu0 %v6321_v26  ;;  %2112 = vmatmul.mubr.bf16.vlgmr.msra.gmra.mrb[64].mxu1 %v6781_v51  ;;  %v6325_v51 = vld [vmem:[%s8212_s2 + $0x228] sm:$0xff]  }
  0xdc   : > { %2119 = vmatprep.mubr.bf16.mxu1 %v6816_v5 }
  0xde   : > { %6111 = vmatpush3.bf16.msra.mxu0 %v6321_v26  ;;  %v4913_v26 = vld [vmem:[%s6750_s19 + $0x182] sm:$0xff] }
  0xdf   : > { %6112 = vmatprep.subr.bf16.mxu0 %v6322_v27 }
  0xe1   : > { %1959 = vmatmul.mubr.bf16.gmra.mrb[68].mxu0 %v6794_v59  ;;  %v6326_v59 = vld [vmem:[%s8212_s2 + $0x230] sm:$0xff]  }
  0xe2   : > { %1966 = vmatprep.mubr.bf16.mxu0 %v6845_v20  ;;  %6113 = vmatpush3.bf16.msra.mxu0 %v6322_v27  ;;  %v4914_v27 = vld [vmem:[%s6750_s19 + $0x18a] sm:$0xff] }
  0xe3   : > { %6114 = vmatprep.subr.bf16.mxu0 %v6323_v61  ;;  %2120 = vmatmul.mubr.bf16.gmra.mrb[68].mxu1 %v6801_v62  ;;  %v6327_v62 = vld [vmem:[%s8212_s2 + $0x238] sm:$0xff]  }
  0xe4   : > { %2127 = vmatprep.mubr.bf16.mxu1 %v6839_v17 }
  0xe6   : > { %6115 = vmatpush3.bf16.msra.mxu0 %v6323_v61 }
  0xe7   : > { %6116 = vmatprep.subr.bf16.mxu0 %v6324_v50 }
  0xe9   : > { %1967 = vmatmul.mubr.bf16.gmra.mrb[72].mxu0 %v6816_v5 }
  0xea   : > { %1974 = vmatprep.mubr.bf16.mxu0 %v6870_v32  ;;  %6117 = vmatpush3.bf16.msra.mxu0 %v6324_v50 }
  0xeb   : > { %6118 = vmatprep.subr.bf16.mxu0 %v6325_v51  ;;  %2128 = vmatmul.mubr.bf16.gmra.mrb[72].mxu1 %v6823_v9 }
  0xec   : > { %2135 = vmatprep.mubr.bf16.mxu1 %v6865_v30 }
  0xee   : > { %6119 = vmatpush3.bf16.msra.mxu0 %v6325_v51 }
  0xef   : > { %6120 = vmatprep.subr.bf16.mxu0 %v6326_v59 }
  0xf1   : > { %1975 = vmatmul.mubr.bf16.gmra.mrb[76].mxu0 %v6839_v17 }
  0xf2   : > { %1982 = vmatprep.mubr.bf16.mxu0 %v6898_v45  ;;  %6121 = vmatpush3.bf16.msra.mxu0 %v6326_v59 }
  0xf3   : > { %6122 = vmatprep.subr.bf16.mxu0 %v6327_v62  ;;  %2136 = vmatmul.mubr.bf16.gmra.mrb[76].mxu1 %v6851_v22 }
  0xf4   : > { %2143 = vmatprep.mubr.bf16.mxu1 %v6890_v42 }
  0xf6   : > { %6123 = vmatpush3.bf16.msra.mxu0 %v6327_v62 }
  0xf9   : > { %1983 = vmatmul.mubr.bf16.gmra.mrb[80].mxu0 %v6865_v30 }
  0xfa   : > { %1990 = vmatprep.mubr.bf16.mxu0 %v6929_v0 }
  0xfb   : > { %2144 = vmatmul.mubr.bf16.gmra.mrb[80].mxu1 %v6873_v33 }
  0xfc   : > { %2151 = vmatprep.mubr.bf16.mxu1 %v6923_v58 }
 0x101   : > { %1991 = vmatmul.mubr.bf16.gmra.mrb[84].mxu0 %v6890_v42 }
 0x102   : > { %1998 = vmatprep.mubr.bf16.mxu0 %v6963_v19 }
 0x103   : > { %2152 = vmatmul.mubr.bf16.gmra.mrb[84].mxu1 %v6904_v47 }
 0x104   : > { %2159 = vmatprep.mubr.bf16.mxu1 %v6957_v15 }
 0x109   : > { %1999 = vmatmul.mubr.bf16.gmra.mrb[88].mxu0 %v6923_v58 }
 0x10a   : > { %2006 = vmatprep.mubr.bf16.mxu0 %v6996_v38 }
 0x10b   : > { %2160 = vmatmul.mubr.bf16.gmra.mrb[88].mxu1 %v6932_v1 }
 0x10c   : > { %2167 = vmatprep.mubr.bf16.mxu1 %v6989_v36 }
 0x111   : > { %2007 = vmatmul.mubr.bf16.gmra.mrb[92].mxu0 %v6957_v15 }
 0x112   : > { %2014 = vmatprep.mubr.bf16.mxu0 %v7016_v53 }
 0x113   : > { %2168 = vmatmul.mubr.bf16.gmra.mrb[92].mxu1 %v6966_v21 }
 0x114   : > { %2175 = vmatprep.mubr.bf16.mxu1 %v7014_v52 }
 0x119   : > { %2015 = vmatmul.mubr.bf16.gmra.mrb[96].mxu0 %v6989_v36 }
 0x11a   : > { %2022 = vmatprep.mubr.bf16.mxu0 %v7032_v4 }
 0x11b   : > { %2176 = vmatmul.mubr.bf16.gmra.mrb[96].mxu1 %v7000_v39 }
 0x11c   : > { %2183 = vmatprep.mubr.bf16.mxu1 %v7030_v3 }
 0x121   : > { %2023 = vmatmul.mubr.bf16.gmra.mrb[100].mxu0 %v7014_v52 }
 0x122   : > { %2030 = vmatprep.mubr.bf16.mxu0 %v7048_v18 }
 0x123   : > { %2184 = vmatmul.mubr.bf16.gmra.mrb[100].mxu1 %v7019_v54 }
 0x124   : > { %2191 = vmatprep.mubr.bf16.mxu1 %v7046_v16 }
 0x129   : > { %2031 = vmatmul.mubr.bf16.gmra.mrb[104].mxu0 %v7030_v3 }
 0x12a   : > { %2038 = vmatprep.mubr.bf16.mxu0 %v7064_v34 }
 0x12b   : > { %2192 = vmatmul.mubr.bf16.gmra.mrb[104].mxu1 %v7035_v6 }
 0x12c   : > { %v5180_v5 = vpop.f32.mrb[0].mxu0  ;;  %2199 = vmatprep.mubr.bf16.mxu1 %v7062_v31 }
 0x12d   : > { %v5181_v9 = vpop.f32.mrb[1].mxu0 }
 0x12e   : > { %v5182_v17 = vadd.f32 %v5181_v9, %v5180_v5  ;;  %v5183_v20 = vpop.f32.mrb[2].mxu0  ;;  %v5292_v22 = vpop.f32.mrb[0].mxu1  ;;  %v7222_v5 = vpack.c.bf16 %v4914_v27, %v4913_v26  ;;  %v4977_v9 = vld [vmem:[%s6750_s19 + $0x199] sm:$0xff] }
 0x12f   : > { %v5184_v30 = vpop.f32.mrb[3].mxu0  ;;  %v5293_v42 = vpop.f32.mrb[1].mxu1 }
 0x130   : > { %v1631_v32 = vadd.f32 %v5182_v17, %v7180_v8  ;;  %v5185_v33 = vadd.f32 %v5184_v30, %v5183_v20  ;;  %v5294_v45 = vadd.f32 %v5293_v42, %v5292_v22  ;;  %v5295_v47 = vpop.f32.mrb[2].mxu1  ;;  %v4978_v17 = vld [vmem:[%s6750_s19 + $0x1a1] sm:$0xff] }
 0x131   : > { %2039 = vmatmul.mubr.bf16.gmra.mrb[108].mxu0 %v7046_v16  ;;  %v5296_v0 = vpop.f32.mrb[3].mxu1  ;;  %v788_v42 = vpack.c.bf16 %v4978_v17, %v4977_v9  ;;  %v4985_v9 = vld [vmem:[%s6750_s19 + $0x7a] sm:$0xff] }
 0x132   : > { %v1634_v58 = vadd.f32 %v5185_v33, %v7180_v8  ;;  %2046 = vmatprep.mubr.bf16.mxu0 %v7080_v55  ;;  %v5297_v1 = vadd.f32 %v5296_v0, %v5295_v47  ;;  %v7187_v15 = vadd.f32 %v5294_v45, %v1631_v32  ;;  %v6331_v0 = vld [vmem:[%s8213_s3 + $0x8] sm:$0xff]  }
 0x133   : > { %2200 = vmatmul.mubr.bf16.gmra.mrb[108].mxu1 %v7051_v23  ;;  %v6328_v23 = vld [vmem:[%s8213_s3 + $0x40] sm:$0xff]  }
 0x134   : > { %v5186_v19 = vpop.f32.mrb[4].mxu0  ;;  %2207 = vmatprep.mubr.bf16.mxu1 %v7078_v49  ;;  %v7191_v36 = vadd.f32 %v5297_v1, %v1634_v58  ;;  %5636 = vmatprep.subr.bf16.mxu1 %v6328_v23  ;;  %v6330_v58 = vld [vmem:[%s8213_s3 + $0x48] sm:$0xff]  }
 0x135   : > { %v5187_v21 = vpop.f32.mrb[5].mxu0  ;;  %5637 = vmatpush3.bf16.msra.mxu1 %v6329_v28 }
 0x136   : > { %v5188_v37 = vadd.f32 %v5187_v21, %v5186_v19  ;;  %v5189_v38 = vpop.f32.mrb[6].mxu0  ;;  %v5298_v39 = vpop.f32.mrb[4].mxu1  ;;  %v4979_v19 = vld [vmem:[%s6750_s19 + $0x32] sm:$0xff]  ;;  %v4980_v21 = vld [vmem:[%s6750_s19 + $0x3a] sm:$0xff]  ;;  %5638 = vmatprep.subr.bf16.mxu1 %v6330_v58 }
 0x137   : > { %v5190_v52 = vpop.f32.mrb[7].mxu0  ;;  %v5299_v3 = vpop.f32.mrb[5].mxu1 }
 0x138   : > { %v1639_v53 = vadd.f32 %v5188_v37, %v7180_v8  ;;  %v5191_v54 = vadd.f32 %v5190_v52, %v5189_v38  ;;  %v5300_v4 = vadd.f32 %v5299_v3, %v5298_v39  ;;  %v5301_v6 = vpop.f32.mrb[6].mxu1  ;;  %v4945_v39 = vld [vmem:[%s6750_s19 + $0x198] sm:$0xff]  ;;  %v4946_v52 = vld [vmem:[%s6750_s19 + $0x1a0] sm:$0xff] }
 0x139   : > { %2047 = vmatmul.mubr.bf16.gmra.mrb[112].mxu0 %v7062_v31  ;;  %v5302_v18 = vpop.f32.mrb[7].mxu1  ;;  %5639 = vmatpush3.bf16.msra.mxu1 %v6331_v0  ;;  %v724_v28 = vpack.c.bf16 %v4946_v52, %v4945_v39 }
 0x13a   : > { %v1642_v16 = vadd.f32 %v5191_v54, %v7180_v8  ;;  %2054 = vmatprep.mubr.bf16.mxu0 %v7096_v12  ;;  %v5303_v29 = vadd.f32 %v5302_v18, %v5301_v6  ;;  %v7203_v34 = vadd.f32 %v5300_v4, %v1639_v53  ;;  %v837_v4 = vpack.c.bf16 %v4980_v21, %v4979_v19 }
 0x13b   : > { %2208 = vmatmul.mubr.bf16.gmra.mrb[112].mxu1 %v7067_v35 }
 0x13c   : > { %v5192_v31 = vpop.f32.mrb[8].mxu0  ;;  %2215 = vmatprep.mubr.bf16.mxu1 %v7094_v11  ;;  %v7207_v41 = vadd.f32 %v5303_v29, %v1642_v16 }
 0x13d   : > { %v5193_v40 = vpop.f32.mrb[9].mxu0 }
 0x13e   : > { %v5194_v43 = vadd.f32 %v5193_v40, %v5192_v31  ;;  %v5195_v44 = vpop.f32.mrb[10].mxu0  ;;  %v5304_v55 = vpop.f32.mrb[8].mxu1 }
 0x13f   : > { %v5196_v57 = vpop.f32.mrb[11].mxu0  ;;  %v5305_v35 = vpop.f32.mrb[9].mxu1 }
 0x140   : > { %v1647_v60 = vadd.f32 %v5194_v43, %v7180_v8  ;;  %v5197_v63 = vadd.f32 %v5196_v57, %v5195_v44  ;;  %v5306_v2 = vadd.f32 %v5305_v35, %v5304_v55  ;;  %v5307_v7 = vpop.f32.mrb[10].mxu1  ;;  %v4981_v44 = vld [vmem:[%s6750_s19 + $0x4a] sm:$0xff]  ;;  %v4983_v55 = vld [vmem:[%s6750_s19 + $0x62] sm:$0xff] }
 0x141   : > { %2055 = vmatmul.mubr.bf16.gmra.mrb[116].mxu0 %v7078_v49  ;;  %v5308_v14 = vpop.f32.mrb[11].mxu1  ;;  %v4984_v57 = vld [vmem:[%s6750_s19 + $0x6a] sm:$0xff] }
 0x142   : > { %v1650_v12 = vadd.f32 %v5197_v63, %v7180_v8  ;;  %2062 = vmatprep.mubr.bf16.mxu0 %v7106_v25  ;;  %v5309_v24 = vadd.f32 %v5308_v14, %v5307_v7  ;;  %v7217_v61 = vadd.f32 %v5306_v2, %v1647_v60  ;;  %v838_v2 = vpack.c.bf16 %v4982_v46, %v4981_v44 }
 0x143   : > { %2216 = vmatmul.mubr.bf16.gmra.mrb[116].mxu1 %v7083_v56  ;;  %v839_v14 = vpack.c.bf16 %v4984_v57, %v4983_v55 }
 0x144   : > { %v5198_v50 = vpop.f32.mrb[12].mxu0  ;;  %2223 = vmatprep.mubr.bf16.mxu1 %v787_v10  ;;  %v7220_v59 = vadd.f32 %v5309_v24, %v1650_v12 }
 0x145   : > { %v5199_v51 = vpop.f32.mrb[13].mxu0 }
 0x146   : > { %v5200_v49 = vadd.f32 %v5199_v51, %v5198_v50  ;;  %v5201_v62 = vpop.f32.mrb[14].mxu0  ;;  %v5310_v25 = vpop.f32.mrb[12].mxu1 }
 0x147   : > { %v5202_v20 = vpop.f32.mrb[15].mxu0  ;;  %v5311_v32 = vpop.f32.mrb[13].mxu1 }
 0x148   : > { %v1655_v22 = vadd.f32 %v5200_v49, %v7180_v8  ;;  %v5203_v30 = vadd.f32 %v5202_v20, %v5201_v62  ;;  %v5312_v56 = vadd.f32 %v5311_v32, %v5310_v25  ;;  %v5313_v33 = vpop.f32.mrb[14].mxu1  ;;  %v4986_v20 = vld [vmem:[%s6750_s19 + $0x82] sm:$0xff] }
 0x149   : > { %2063 = vmatmul.mubr.bf16.gmra.mrb[120].mxu0 %v7094_v11  ;;  %v5314_v47 = vpop.f32.mrb[15].mxu1  ;;  %v840_v58 = vpack.c.bf16 %v4986_v20, %v4985_v9 }
 0x14a   : > { %v1658_v45 = vadd.f32 %v5203_v30, %v7180_v8  ;;  %2070 = vmatprep.mubr.bf16.mxu0 %v7222_v5  ;;  %v5315_v1 = vadd.f32 %v5314_v47, %v5313_v33  ;;  %v7238_v11 = vadd.f32 %v5312_v56, %v1655_v22  ;;  %v6332_v22 = vld [vmem:[%s8213_s3 + $0x50] sm:$0xff]   ;;  %v4988_v33 = vld [vmem:[%s6750_s19 + $0x9a] sm:$0xff] }
 0x14b   : > { %2224 = vmatmul.mubr.bf16.gmra.mrb[120].mxu1 %v7099_v13  ;;  %v6333_v30 = vld [vmem:[%s8213_s3 + $0x10] sm:$0xff]   ;;  %5640 = vmatprep.subr.bf16.mxu1 %v6332_v22 }
 0x14c   : > { %v5204_v37 = vpop.f32.mrb[16].mxu0  ;;  %2231 = vmatprep.mubr.bf16.mxu1 %v788_v42  ;;  %v7243_v53 = vadd.f32 %v5315_v1, %v1658_v45  ;;  %v4987_v56 = vld [vmem:[%s6750_s19 + $0x92] sm:$0xff]  ;;  %5641 = vmatpush3.bf16.msra.mxu1 %v6333_v30 }
 0x14d   : > { %v5205_v38 = vpop.f32.mrb[17].mxu0  ;;  %v841_v21 = vpack.c.bf16 %v4988_v33, %v4987_v56 }
 0x14e   : > { %v5206_v54 = vadd.f32 %v5205_v38, %v5204_v37  ;;  %v5207_v3 = vpop.f32.mrb[18].mxu0  ;;  %v5316_v6 = vpop.f32.mrb[16].mxu1 }
 0x14f   : > { %v5208_v16 = vpop.f32.mrb[19].mxu0  ;;  %v5317_v23 = vpop.f32.mrb[17].mxu1 }
 0x150   : > { %v1663_v13 = vadd.f32 %v5206_v54, %v7180_v8  ;;  %v5209_v18 = vadd.f32 %v5208_v16, %v5207_v3  ;;  %v5318_v29 = vadd.f32 %v5317_v23, %v5316_v6  ;;  %v5319_v31 = vpop.f32.mrb[18].mxu1 }
 0x151   : > { %2071 = vmatmul.mubr.bf16.gmra.mrb[124].mxu0 %v787_v10  ;;  %v5320_v43 = vpop.f32.mrb[19].mxu1 }
 0x152   : > { %v1666_v40 = vadd.f32 %v5209_v18, %v7180_v8  ;;  %6124 = vmatprep.mubr.bf16.mxu0 %v837_v4  ;;  %v5321_v48 = vadd.f32 %v5320_v43, %v5319_v31  ;;  %v7251_v60 = vadd.f32 %v5318_v29, %v1663_v13  ;;  %v4989_v13 = vld [vmem:[%s6750_s19 + $0xaa] sm:$0xff]  ;;  %v4990_v18 = vld [vmem:[%s6750_s19 + $0xb2] sm:$0xff] }
 0x153   : > { %2232 = vmatmul.mubr.bf16.gmra.mrb[124].mxu1 %v724_v28  ;;  %v4991_v28 = vld [vmem:[%s6750_s19 + $0xc2] sm:$0xff]  ;;  %v4992_v29 = vld [vmem:[%s6750_s19 + $0xca] sm:$0xff]  ;;  %v842_v44 = vpack.c.bf16 %v4990_v18, %v4989_v13 }
 0x154   : > { %v5210_v63 = vpop.f32.mrb[20].mxu0  ;;  %v7253_v7 = vadd.f32 %v5321_v48, %v1666_v40  ;;  %v843_v57 = vpack.c.bf16 %v4992_v29, %v4991_v28  ;;  %v4999_v13 = vld [vmem:[%s6750_s19 + $0x122] sm:$0xff]  ;;  %v5000_v18 = vld [vmem:[%s6750_s19 + $0x12a] sm:$0xff] }
 0x155   : > { %v5211_v35 = vpop.f32.mrb[21].mxu0 }
 0x156   : > { %v5212_v10 = vadd.f32 %v5211_v35, %v5210_v63  ;;  %v5213_v12 = vpop.f32.mrb[22].mxu0  ;;  %v5322_v24 = vpop.f32.mrb[20].mxu1 }
 0x157   : > { %v5214_v26 = vpop.f32.mrb[23].mxu0  ;;  %v5323_v51 = vpop.f32.mrb[21].mxu1 }
 0x158   : > { %v1671_v27 = vadd.f32 %v5212_v10, %v7180_v8  ;;  %v5215_v50 = vadd.f32 %v5214_v26, %v5213_v12  ;;  %v5324_v49 = vadd.f32 %v5323_v51, %v5322_v24  ;;  %v5325_v62 = vpop.f32.mrb[22].mxu1  ;;  %v4993_v26 = vld [vmem:[%s6750_s19 + $0xda] sm:$0xff]  ;;  %v4994_v51 = vld [vmem:[%s6750_s19 + $0xe2] sm:$0xff] }
 0x159   : > { %6125 = vmatmul.mubr.bf16.vlgmr.msra.gmra.mrb[128].mxu0 %v838_v2  ;;  %v5326_v25 = vpop.f32.mrb[23].mxu1 }
 0x15a   : > { %v1674_v17 = vadd.f32 %v5215_v50, %v7180_v8  ;;  %6128 = vmatprep.mubr.bf16.mxu0 %v839_v14  ;;  %v5327_v32 = vadd.f32 %v5326_v25, %v5325_v62  ;;  %v7267_v42 = vadd.f32 %v5324_v49, %v1671_v27  ;;  %v6334_v49 = vld [vmem:[%s8213_s3 + $0x58] sm:$0xff]  }
 0x15b   : > { %v6335_v62 = vld [vmem:[%s8213_s3 + $0x18] sm:$0xff]   ;;  %5642 = vmatprep.subr.bf16.mxu1 %v6334_v49 }
 0x15c   : > { %v5216_v45 = vpop.f32.mrb[24].mxu0  ;;  %v7269_v0 = vadd.f32 %v5327_v32, %v1674_v17  ;;  %v4995_v17 = vld [vmem:[%s6750_s19 + $0xf2] sm:$0xff]  ;;  %v4996_v25 = vld [vmem:[%s6750_s19 + $0xfa] sm:$0xff]  ;;  %v844_v32 = vpack.c.bf16 %v4994_v51, %v4993_v26  ;;  %5643 = vmatpush3.bf16.msra.mxu1 %v6335_v62 }
 0x15d   : > { %v5217_v47 = vpop.f32.mrb[25].mxu0  ;;  %v6337_v51 = vld [vmem:[%s8213_s3 + $0x20] sm:$0xff]  }
 0x15e   : > { %v5218_v1 = vadd.f32 %v5217_v47, %v5216_v45  ;;  %v5219_v19 = vpop.f32.mrb[26].mxu0  ;;  %v5328_v37 = vpop.f32.mrb[24].mxu1  ;;  %v845_v47 = vpack.c.bf16 %v4996_v25, %v4995_v17  ;;  %v5004_v17 = vld [vmem:[%s6750_s19 + $0x15a] sm:$0xff] }
 0x15f   : > { %v5220_v38 = vpop.f32.mrb[27].mxu0  ;;  %v5329_v54 = vpop.f32.mrb[25].mxu1 }
 0x160   : > { %v1679_v39 = vadd.f32 %v5218_v1, %v7180_v8  ;;  %v5221_v52 = vadd.f32 %v5220_v38, %v5219_v19  ;;  %v5330_v3 = vadd.f32 %v5329_v54, %v5328_v37  ;;  %v5331_v4 = vpop.f32.mrb[26].mxu1 }
 0x161   : > { %6129 = vmatmul.mubr.bf16.gmra.mrb[132].mxu0 %v840_v58  ;;  %v5332_v16 = vpop.f32.mrb[27].mxu1 }
 0x162   : > { %v1682_v6 = vadd.f32 %v5221_v52, %v7180_v8  ;;  %6132 = vmatprep.mubr.bf16.mxu0 %v841_v21  ;;  %v5333_v23 = vadd.f32 %v5332_v16, %v5331_v4  ;;  %v7277_v31 = vadd.f32 %v5330_v3, %v1679_v39  ;;  %v4997_v3 = vld [vmem:[%s6750_s19 + $0x10a] sm:$0xff]  ;;  %v4998_v4 = vld [vmem:[%s6750_s19 + $0x112] sm:$0xff] }
 0x164   : > { %v5222_v40 = vpop.f32.mrb[28].mxu0  ;;  %v7279_v46 = vadd.f32 %v5333_v23, %v1682_v6 }
 0x165   : > { %v5223_v43 = vpop.f32.mrb[29].mxu0 }
 0x166   : > { %v5224_v48 = vadd.f32 %v5223_v43, %v5222_v40  ;;  %v5225_v55 = vpop.f32.mrb[30].mxu0  ;;  %v5334_v63 = vpop.f32.mrb[28].mxu1  ;;  %v846_v40 = vpack.c.bf16 %v4998_v4, %v4997_v3  ;;  %v5005_v3 = vld [vmem:[%s6750_s19 + $0x16a] sm:$0xff]  ;;  %v5006_v4 = vld [vmem:[%s6750_s19 + $0x172] sm:$0xff] }
 0x167   : > { %v5226_v35 = vpop.f32.mrb[31].mxu0  ;;  %v5335_v12 = vpop.f32.mrb[29].mxu1 }
 0x168   : > { %v1687_v2 = vadd.f32 %v5224_v48, %v7180_v8  ;;  %v5227_v10 = vadd.f32 %v5226_v35, %v5225_v55  ;;  %v5336_v14 = vadd.f32 %v5335_v12, %v5334_v63  ;;  %v5337_v24 = vpop.f32.mrb[30].mxu1  ;;  %v847_v48 = vpack.c.bf16 %v5000_v18, %v4999_v13 }
 0x169   : > { %6133 = vmatmul.mubr.bf16.gmra.mrb[136].mxu0 %v842_v44  ;;  %v5338_v50 = vpop.f32.mrb[31].mxu1 }
 0x16a   : > { %v1690_v27 = vadd.f32 %v5227_v10, %v7180_v8  ;;  %6136 = vmatprep.mubr.bf16.mxu0 %v843_v57  ;;  %v5339_v9 = vadd.f32 %v5338_v50, %v5337_v24  ;;  %v7293_v20 = vadd.f32 %v5336_v14, %v1687_v2  ;;  %v5001_v14 = vld [vmem:[%s6750_s19 + $0x13a] sm:$0xff] }
 0x16b   : > { %v6336_v50 = vld [vmem:[%s8213_s3 + $0x60] sm:$0xff]  }
 0x16c   : > { %v5228_v22 = vpop.f32.mrb[32].mxu0  ;;  %v7295_v56 = vadd.f32 %v5339_v9, %v1690_v27  ;;  %v5002_v27 = vld [vmem:[%s6750_s19 + $0x142] sm:$0xff]  ;;  %v5003_v9 = vld [vmem:[%s6750_s19 + $0x152] sm:$0xff]  ;;  %5644 = vmatprep.subr.bf16.mxu1 %v6336_v50 }
 0x16d   : > { %v5229_v30 = vpop.f32.mrb[33].mxu0  ;;  %5645 = vmatpush3.bf16.msra.mxu1 %v6337_v51  ;;  %v6339_v50 = vld [vmem:[%s8213_s3 + $0x28] sm:$0xff]  }
 0x16e   : > { %v5230_v33 = vadd.f32 %v5229_v30, %v5228_v22  ;;  %v5231_v45 = vpop.f32.mrb[34].mxu0  ;;  %v5340_v58 = vpop.f32.mrb[32].mxu1 }
 0x16f   : > { %v5232_v1 = vpop.f32.mrb[35].mxu0  ;;  %v5341_v37 = vpop.f32.mrb[33].mxu1 }
 0x170   : > { %v1695_v19 = vadd.f32 %v5230_v33, %v7180_v8  ;;  %v5233_v21 = vadd.f32 %v5232_v1, %v5231_v45  ;;  %v5342_v38 = vadd.f32 %v5341_v37, %v5340_v58  ;;  %v5343_v39 = vpop.f32.mrb[34].mxu1 }
 0x171   : > { %6137 = vmatmul.mubr.bf16.gmra.mrb[140].mxu0 %v844_v32  ;;  %v5344_v54 = vpop.f32.mrb[35].mxu1  ;;  %v848_v32 = vpack.c.bf16 %v5002_v27, %v5001_v14  ;;  %v6338_v27 = vld [vmem:[%s8213_s3 + $0x68] sm:$0xff]  }
 0x172   : > { %v1698_v52 = vadd.f32 %v5233_v21, %v7180_v8  ;;  %6140 = vmatprep.mubr.bf16.mxu0 %v845_v47  ;;  %v7301_v6 = vadd.f32 %v5342_v38, %v1695_v19  ;;  %v5345_v16 = vadd.f32 %v5344_v54, %v5343_v39  ;;  %v849_v47 = vpack.c.bf16 %v5004_v17, %v5003_v9 }
 0x173   : > { %5646 = vmatprep.subr.bf16.mxu1 %v6338_v27 }
 0x174   : > { %v5234_v23 = vpop.f32.mrb[36].mxu0  ;;  %v7305_v28 = vadd.f32 %v5345_v16, %v1698_v52  ;;  %5647 = vmatpush3.bf16.msra.mxu1 %v6339_v50 }
 0x175   : > { %v5235_v29 = vpop.f32.mrb[37].mxu0 }
 0x176   : > { %v5236_v43 = vadd.f32 %v5235_v29, %v5234_v23  ;;  %v5237_v44 = vpop.f32.mrb[38].mxu0  ;;  %v5346_v55 = vpop.f32.mrb[36].mxu1 }
 0x177   : > { %v5238_v57 = vpop.f32.mrb[39].mxu0  ;;  %v5347_v2 = vpop.f32.mrb[37].mxu1 }
 0x178   : > { %v1703_v63 = vadd.f32 %v5236_v43, %v7180_v8  ;;  %v5239_v35 = vadd.f32 %v5238_v57, %v5237_v44  ;;  %v5348_v10 = vadd.f32 %v5347_v2, %v5346_v55  ;;  %v5349_v12 = vpop.f32.mrb[38].mxu1 }
 0x179   : > { %6141 = vmatmul.mubr.bf16.gmra.mrb[144].mxu0 %v846_v40  ;;  %v5350_v26 = vpop.f32.mrb[39].mxu1  ;;  %v850_v40 = vpack.c.bf16 %v5006_v4, %v5005_v3 }
 0x17a   : > { %v1706_v24 = vadd.f32 %v5239_v35, %v7180_v8  ;;  %6144 = vmatprep.mubr.bf16.mxu0 %v847_v48  ;;  %v7317_v49 = vadd.f32 %v5348_v10, %v1703_v63  ;;  %v5351_v62 = vadd.f32 %v5350_v26, %v5349_v12  ;;  %v5009_v12 = vld [vmem:[%s6750_s19 + $0x19a] sm:$0xff]  ;;  %v5010_v26 = vld [vmem:[%s6750_s19 + $0x1a2] sm:$0xff] }
 0x17c   : > { %v5240_v25 = vpop.f32.mrb[40].mxu0  ;;  %v7321_v22 = vadd.f32 %v5351_v62, %v1706_v24 }
 0x17d   : > { %v5241_v30 = vpop.f32.mrb[41].mxu0 }
 0x17e   : > { %v5242_v33 = vadd.f32 %v5241_v30, %v5240_v25  ;;  %v5243_v45 = vpop.f32.mrb[42].mxu0  ;;  %v5352_v58 = vpop.f32.mrb[40].mxu1  ;;  %v852_v30 = vpack.c.bf16 %v5010_v26, %v5009_v12 }
 0x17f   : > { %v5244_v1 = vpop.f32.mrb[43].mxu0  ;;  %v5353_v37 = vpop.f32.mrb[41].mxu1 }
 0x180   : > { %v1711_v19 = vadd.f32 %v5242_v33, %v7180_v8  ;;  %v5245_v21 = vadd.f32 %v5244_v1, %v5243_v45  ;;  %v5354_v38 = vadd.f32 %v5353_v37, %v5352_v58  ;;  %v5355_v39 = vpop.f32.mrb[42].mxu1 }
 0x181   : > { %6145 = vmatmul.mubr.bf16.gmra.mrb[148].mxu0 %v848_v32  ;;  %v5356_v54 = vpop.f32.mrb[43].mxu1 }
 0x182   : > { %v1714_v52 = vadd.f32 %v5245_v21, %v7180_v8  ;;  %6148 = vmatprep.mubr.bf16.mxu0 %v849_v47  ;;  %v7327_v16 = vadd.f32 %v5354_v38, %v1711_v19  ;;  %v5357_v13 = vadd.f32 %v5356_v54, %v5355_v39 }
 0x184   : > { %v5246_v18 = vpop.f32.mrb[44].mxu0  ;;  %v7329_v23 = vadd.f32 %v5357_v13, %v1714_v52 }
 0x185   : > { %v5247_v29 = vpop.f32.mrb[45].mxu0 }
 0x186   : > { %v5248_v43 = vadd.f32 %v5247_v29, %v5246_v18  ;;  %v5249_v44 = vpop.f32.mrb[46].mxu0  ;;  %v5358_v48 = vpop.f32.mrb[44].mxu1 }
 0x187   : > { %v5250_v55 = vpop.f32.mrb[47].mxu0  ;;  %v5359_v35 = vpop.f32.mrb[45].mxu1 }
 0x188   : > { %v1719_v57 = vadd.f32 %v5248_v43, %v7180_v8  ;;  %v5251_v63 = vadd.f32 %v5250_v55, %v5249_v44  ;;  %v5360_v2 = vadd.f32 %v5359_v35, %v5358_v48  ;;  %v5361_v10 = vpop.f32.mrb[46].mxu1 }
 0x189   : > { %6149 = vmatmul.mubr.bf16.gmra.mrb[152].mxu0 %v850_v40  ;;  %v5362_v24 = vpop.f32.mrb[47].mxu1 }
 0x18a   : > { %v1722_v14 = vadd.f32 %v5251_v63, %v7180_v8  ;;  %6152 = vmatprep.mubr.bf16.mxu0 %v7222_v5  ;;  %v7342_v51 = vadd.f32 %v5360_v2, %v1719_v57  ;;  %v5363_v62 = vadd.f32 %v5362_v24, %v5361_v10  ;;  %v6340_v2 = vld [vmem:[%s8213_s3 + $0x70] sm:$0xff]  }
 0x18b   : > { %v6341_v10 = vld [vmem:[%s8213_s3 + $0x30] sm:$0xff]   ;;  %5648 = vmatprep.subr.bf16.mxu1 %v6340_v2 }
 0x18c   : > { %v5252_v9 = vpop.f32.mrb[48].mxu0  ;;  %v7344_v17 = vadd.f32 %v5363_v62, %v1722_v14  ;;  %5649 = vmatpush3.bf16.msra.mxu1 %v6341_v10  ;;  %v6502_v10 = vmov 0.0  }
 0x18d   : > { %v5253_v25 = vpop.f32.mrb[49].mxu0  ;;  %2433 = vst [vmem:[#allocation4] sm:$0xff] %v6502_v10  ;;  %2434 = vst [vmem:[#allocation4 + $0x8] sm:$0xff] %v6502_v10 }
 0x18e   : > { %v5254_v5 = vadd.f32 %v5253_v25, %v5252_v9  ;;  %v5255_v32 = vpop.f32.mrb[50].mxu0  ;;  %v5364_v33 = vpop.f32.mrb[48].mxu1  ;;  %v6342_v9 = vld [vmem:[%s8213_s3 + $0xc0] sm:$0xff]   ;;  %2435 = vst [vmem:[#allocation4 + $0x10] sm:$0x3] %v6502_v10  ;;  %2437 = vst [vmem:[#allocation4 + $0x198] sm:$0xff] %v6502_v10 }
 0x18f   : > { %v5256_v45 = vpop.f32.mrb[51].mxu0  ;;  %v5365_v1 = vpop.f32.mrb[49].mxu1  ;;  %5748 = vmatprep.subr.bf16.mxu0 %v6342_v9  ;;  %2438 = vst [vmem:[#allocation4 + $0x1a0] sm:$0xff] %v6502_v10  ;;  %2439 = vst [vmem:[#allocation4 + $0x1a8] sm:$0x3] %v6502_v10 }
 0x190   : > { %v1727_v47 = vadd.f32 %v5254_v5, %v7180_v8  ;;  %v5257_v58 = vadd.f32 %v5256_v45, %v5255_v32  ;;  %v5366_v19 = vadd.f32 %v5365_v1, %v5364_v33  ;;  %v5367_v21 = vpop.f32.mrb[50].mxu1  ;;  %v6343_v5 = vld [vmem:[%s8213_s3 + $0x80] sm:$0xff]   ;;  %2441 = vst [vmem:[#allocation4 + $0x18] sm:$0x1] %v6502_v10  ;;  %2442 = vst [vmem:[#allocation4 + $0x30] sm:$0x1] %v6502_v10 }
 0x191   : > { %6153 = vmatmul.mubr.bf16.gmra.mrb[156].mxu0 %v852_v30  ;;  %v5368_v38 = vpop.f32.mrb[51].mxu1  ;;  %2443 = vst [vmem:[#allocation4 + $0x48] sm:$0x1] %v6502_v10  ;;  %2444 = vst [vmem:[#allocation4 + $0x60] sm:$0x1] %v6502_v10 }
 0x192   : > { %v1730_v37 = vadd.f32 %v5257_v58, %v7180_v8  ;;  %v7348_v39 = vadd.f32 %v5366_v19, %v1727_v47  ;;  %v5369_v52 = vadd.f32 %v5368_v38, %v5367_v21  ;;  %5749 = vmatpush3.bf16.msra.mxu0 %v6343_v5  ;;  %v6344_v21 = vld [vmem:[%s8213_s3 + $0xc8] sm:$0xff]   ;;  %2445 = vst [vmem:[#allocation4 + $0x78] sm:$0x1] %v6502_v10  ;;  %2446 = vst [vmem:[#allocation4 + $0x90] sm:$0x1] %v6502_v10 }
 0x193   : > { %5750 = vmatprep.subr.bf16.mxu0 %v6344_v21  ;;  %2447 = vst [vmem:[#allocation4 + $0xa8] sm:$0x1] %v6502_v10  ;;  %2448 = vst [vmem:[#allocation4 + $0xc0] sm:$0x1] %v6502_v10 }
 0x194   : > { %v5258_v54 = vpop.f32.mrb[52].mxu0  ;;  %v7350_v3 = vadd.f32 %v5369_v52, %v1730_v37  ;;  %v6345_v52 = vld [vmem:[%s8213_s3 + $0x88] sm:$0xff]   ;;  %2449 = vst [vmem:[#allocation4 + $0xd8] sm:$0x1] %v6502_v10  ;;  %2450 = vst [vmem:[#allocation4 + $0xf0] sm:$0x1] %v6502_v10 }
 0x195   : > { %v5259_v4 = vpop.f32.mrb[53].mxu0  ;;  %2451 = vst [vmem:[#allocation4 + $0x108] sm:$0x1] %v6502_v10  ;;  %2452 = vst [vmem:[#allocation4 + $0x120] sm:$0x1] %v6502_v10 }
 0x196   : > { %v5260_v13 = vadd.f32 %v5259_v4, %v5258_v54  ;;  %v5261_v18 = vpop.f32.mrb[54].mxu0  ;;  %v5370_v29 = vpop.f32.mrb[52].mxu1  ;;  %5751 = vmatpush3.bf16.msra.mxu0 %v6345_v52  ;;  %2453 = vst [vmem:[#allocation4 + $0x138] sm:$0x1] %v6502_v10  ;;  %2454 = vst [vmem:[#allocation4 + $0x150] sm:$0x1] %v6502_v10 }
 0x197   : > { %v5262_v40 = vpop.f32.mrb[55].mxu0  ;;  %v5371_v48 = vpop.f32.mrb[53].mxu1  ;;  %2455 = vst [vmem:[#allocation4 + $0x168] sm:$0x1] %v6502_v10  ;;  %2456 = vst [vmem:[#allocation4 + $0x180] sm:$0x1] %v6502_v10 }
 0x198   : > { %v1735_v43 = vadd.f32 %v5260_v13, %v7180_v8  ;;  %v5263_v44 = vadd.f32 %v5262_v40, %v5261_v18  ;;  %v5372_v55 = vadd.f32 %v5371_v48, %v5370_v29  ;;  %v5373_v57 = vpop.f32.mrb[54].mxu1  ;;  %v6347_v40 = vld [vmem:[%s8213_s3 + $0xd0] sm:$0xff]   ;;  %2457 = vst [vmem:[#allocation4 + $0x29] sm:$0x1] %v6502_v10  ;;  %2458 = vst [vmem:[#allocation4 + $0x41] sm:$0x1] %v6502_v10 }
 0x199   : > { %v5374_v35 = vpop.f32.mrb[55].mxu1  ;;  %v6349_v48 = vld [vmem:[%s8213_s3 + $0x90] sm:$0xff]   ;;  %5752 = vmatprep.subr.bf16.mxu0 %v6347_v40  ;;  %2459 = vst [vmem:[#allocation4 + $0x59] sm:$0x1] %v6502_v10  ;;  %2460 = vst [vmem:[#allocation4 + $0x71] sm:$0x1] %v6502_v10 }
 0x19a   : > { %v1738_v63 = vadd.f32 %v5263_v44, %v7180_v8  ;;  %v7360_v12 = vadd.f32 %v5372_v55, %v1735_v43  ;;  %v5375_v14 = vadd.f32 %v5374_v35, %v5373_v57  ;;  %5753 = vmatpush3.bf16.msra.mxu0 %v6349_v48  ;;  %2461 = vst [vmem:[#allocation4 + $0x89] sm:$0x1] %v6502_v10  ;;  %2462 = vst [vmem:[#allocation4 + $0xa1] sm:$0x1] %v6502_v10  ;;  %v6354_v48 = vld [vmem:[%s8213_s3 + $0xe8] sm:$0xff]  }
 0x19b   : > { %2463 = vst [vmem:[#allocation4 + $0xb9] sm:$0x1] %v6502_v10  ;;  %2464 = vst [vmem:[#allocation4 + $0xd1] sm:$0x1] %v6502_v10 }
 0x19c   : > { %v5264_v24 = vpop.f32.mrb[56].mxu0  ;;  %v7362_v26 = vadd.f32 %v5375_v14, %v1738_v63  ;;  %2465 = vst [vmem:[#allocation4 + $0xe9] sm:$0x1] %v6502_v10  ;;  %2466 = vst [vmem:[#allocation4 + $0x101] sm:$0x1] %v6502_v10 }
 0x19d   : > { %v5265_v27 = vpop.f32.mrb[57].mxu0  ;;  %2467 = vst [vmem:[#allocation4 + $0x119] sm:$0x1] %v6502_v10  ;;  %2468 = vst [vmem:[#allocation4 + $0x131] sm:$0x1] %v6502_v10 }
 0x19e   : > { %v5266_v50 = vadd.f32 %v5265_v27, %v5264_v24  ;;  %v5267_v62 = vpop.f32.mrb[58].mxu0  ;;  %v5376_v25 = vpop.f32.mrb[56].mxu1  ;;  %2469 = vst [vmem:[#allocation4 + $0x149] sm:$0x1] %v6502_v10  ;;  %2470 = vst [vmem:[#allocation4 + $0x161] sm:$0x1] %v6502_v10 }
 0x19f   : > { %v5268_v30 = vpop.f32.mrb[59].mxu0  ;;  %v5377_v45 = vpop.f32.mrb[57].mxu1  ;;  %2471 = vst [vmem:[#allocation4 + $0x179] sm:$0x1] %v6502_v10  ;;  %2472 = vst [vmem:[#allocation4 + $0x191] sm:$0x1] %v6502_v10 }
 0x1a0   : > { %v1743_v32 = vadd.f32 %v5266_v50, %v7180_v8  ;;  %v5269_v33 = vadd.f32 %v5268_v30, %v5267_v62  ;;  %v5378_v47 = vadd.f32 %v5377_v45, %v5376_v25  ;;  %v5379_v58 = vpop.f32.mrb[58].mxu1  ;;  %v6346_v27 = vld [vmem:[%s8213_s3 + $0x78] sm:$0xff]  }
 0x1a1   : > { %v5380_v19 = vpop.f32.mrb[59].mxu1  ;;  %v6348_v50 = vld [vmem:[%s8213_s3 + $0x38] sm:$0xff]   ;;  %5650 = vmatprep.subr.bf16.mxu1 %v6346_v27 }
 0x1a2   : > { %v1746_v1 = vadd.f32 %v5269_v33, %v7180_v8  ;;  %v7375_v37 = vadd.f32 %v5378_v47, %v1743_v32  ;;  %v5381_v38 = vadd.f32 %v5380_v19, %v5379_v58  ;;  %v6350_v62 = vld [vmem:[%s8213_s3 + $0xd8] sm:$0xff]   ;;  %5651 = vmatpush3.bf16.msra.mxu1 %v6348_v50  ;;  %v6352_v47 = vld [vmem:[%s8213_s3 + $0xe0] sm:$0xff]  }
 0x1a3   : > { %5754 = vmatprep.subr.bf16.mxu0 %v6350_v62  ;;  %v6353_v19 = vld [vmem:[%s8213_s3 + $0xa0] sm:$0xff]   ;;  %v6358_v62 = vld [vmem:[%s8213_s3 + $0xb0] sm:$0xff]  }
 0x1a4   : > { %v5270_v54 = vpop.f32.mrb[60].mxu0  ;;  %v7380_v4 = vadd.f32 %v5381_v38, %v1746_v1 }
 0x1a5   : > { %v5271_v13 = vpop.f32.mrb[61].mxu0 }
 0x1a6   : > { %v5272_v18 = vadd.f32 %v5271_v13, %v5270_v54  ;;  %v5273_v29 = vpop.f32.mrb[62].mxu0  ;;  %v5382_v43 = vpop.f32.mrb[60].mxu1  ;;  %v2569_v54 = vld [vmem:[#allocation4 + $0x1] sm:$0xff]  ;;  %v2570_v13 = vld [vmem:[#allocation4 + $0x9] sm:$0xff] }
 0x1a7   : > { %v5274_v44 = vpop.f32.mrb[63].mxu0  ;;  %v5383_v63 = vpop.f32.mrb[61].mxu1  ;;  %v2601_v40 = vpack.c.bf16 %v2570_v13, %v2569_v54 }
 0x1a8   : > { %v1751_v55 = vadd.f32 %v5272_v18, %v7180_v8  ;;  %v5275_v57 = vadd.f32 %v5274_v44, %v5273_v29  ;;  %v5384_v35 = vadd.f32 %v5383_v63, %v5382_v43  ;;  %v5385_v2 = vpop.f32.mrb[62].mxu1 }
 0x1a9   : > { %v5386_v24 = vpop.f32.mrb[63].mxu1  ;;  %3841 = vmatprep.mubr.bf16.mxu1 %v2601_v40 }
 0x1aa   : > { %v1754_v14 = vadd.f32 %v5275_v57, %v7180_v8  ;;  %v7399_v9 = vadd.f32 %v5384_v35, %v1751_v55  ;;  %v5387_v25 = vadd.f32 %v5386_v24, %v5385_v2  ;;  %v6351_v8 = vld [vmem:[%s8213_s3 + $0x98] sm:$0xff]   ;;  %v6503_v35 = vmov 0.0|0.0   ;;  %v6356_v24 = vld [vmem:[%s8213_s3 + $0xf0] sm:$0xff]  }
 0x1ab   : > { %5755 = vmatpush3.bf16.msra.mxu0 %v6351_v8  ;;  %3842 = vmatmul.mubr.bf16.vlgmr.msra.gmra.mrb[128].mxu1 %v6503_v35 }
 0x1ac   : > { %v5404_v30 = vpop.f32.mrb[64].mxu0  ;;  %v7404_v5 = vadd.f32 %v5387_v25, %v1754_v14  ;;  %5756 = vmatprep.subr.bf16.mxu0 %v6352_v47 }
 0x1ad   : > { %v5405_v32 = vpop.f32.mrb[65].mxu0 }
 0x1ae   : > { %v5406_v33 = vadd.f32 %v5405_v32, %v5404_v30  ;;  %v5407_v45 = vpop.f32.mrb[66].mxu0  ;;  %v5516_v58 = vpop.f32.mrb[64].mxu1 }
 0x1af   : > { %v5408_v1 = vpop.f32.mrb[67].mxu0  ;;  %v5517_v52 = vpop.f32.mrb[65].mxu1  ;;  %5757 = vmatpush3.bf16.msra.mxu0 %v6353_v19 }
 0x1b0   : > { %v1953_v21 = vadd.f32 %v5406_v33, %v7187_v15  ;;  %v5409_v38 = vadd.f32 %v5408_v1, %v5407_v45  ;;  %v5518_v18 = vadd.f32 %v5517_v52, %v5516_v58  ;;  %v5519_v29 = vpop.f32.mrb[66].mxu1  ;;  %v6355_v15 = vld [vmem:[%s8213_s3 + $0xa8] sm:$0xff]   ;;  %5758 = vmatprep.subr.bf16.mxu0 %v6354_v48  ;;  %v6360_v58 = vld [vmem:[%s8213_s3 + $0xf8] sm:$0xff]  }
 0x1b1   : > { %v5520_v44 = vpop.f32.mrb[67].mxu1 }
 0x1b2   : > { %v1956_v43 = vadd.f32 %v5409_v38, %v7191_v36  ;;  %v5521_v55 = vadd.f32 %v5520_v44, %v5519_v29  ;;  %v7417_v57 = vadd.f32 %v5518_v18, %v1953_v21 }
 0x1b3   : > { %5759 = vmatpush3.bf16.msra.mxu0 %v6355_v15 }
 0x1b4   : > { %v5410_v63 = vpop.f32.mrb[68].mxu0  ;;  %v7422_v10 = vadd.f32 %v5521_v55, %v1956_v43  ;;  %5760 = vmatprep.subr.bf16.mxu0 %v6356_v24 }
 0x1b5   : > { %v5411_v2 = vpop.f32.mrb[69].mxu0 }
 0x1b6   : > { %v5412_v36 = vadd.f32 %v5411_v2, %v5410_v63  ;;  %v5413_v14 = vpop.f32.mrb[70].mxu0  ;;  %v5522_v27 = vpop.f32.mrb[68].mxu1 }
 0x1b7   : > { %v5414_v50 = vpop.f32.mrb[71].mxu0  ;;  %v5523_v30 = vpop.f32.mrb[69].mxu1  ;;  %5761 = vmatpush3.bf16.msra.mxu0 %v6358_v62 }
 0x1b8   : > { %v1961_v25 = vadd.f32 %v5412_v36, %v7203_v34  ;;  %v5415_v8 = vadd.f32 %v5414_v50, %v5413_v14  ;;  %v5524_v32 = vadd.f32 %v5523_v30, %v5522_v27  ;;  %v5525_v33 = vpop.f32.mrb[70].mxu1  ;;  %v6361_v34 = vld [vmem:[%s8213_s3 + $0xb8] sm:$0xff]   ;;  %5762 = vmatprep.subr.bf16.mxu0 %v6360_v58  ;;  %v6357_v36 = vld [vmem:[%s8213_s3 + $0x140] sm:$0xff]  }
 0x1b9   : > { %v5526_v47 = vpop.f32.mrb[71].mxu1  ;;  %v6359_v14 = vld [vmem:[%s8213_s3 + $0x100] sm:$0xff]   ;;  %5860 = vmatprep.subr.bf16.mxu1 %v6357_v36 }
 0x1ba   : > { %v1964_v45 = vadd.f32 %v5415_v8, %v7207_v41  ;;  %v5527_v1 = vadd.f32 %v5526_v47, %v5525_v33  ;;  %v7435_v19 = vadd.f32 %v5524_v32, %v1961_v25  ;;  %5861 = vmatpush3.bf16.msra.mxu1 %v6359_v14 }
 0x1bb   : > { %5763 = vmatpush3.bf16.msra.mxu0 %v6361_v34 }
 0x1bc   : > { %v5416_v21 = vpop.f32.mrb[72].mxu0  ;;  %v7440_v52 = vadd.f32 %v5527_v1, %v1964_v45 }
 0x1bd   : > { %v5417_v38 = vpop.f32.mrb[73].mxu0 }
 0x1be   : > { %v5418_v54 = vadd.f32 %v5417_v38, %v5416_v21  ;;  %v5419_v41 = vpop.f32.mrb[74].mxu0  ;;  %v5528_v13 = vpop.f32.mrb[72].mxu1  ;;  %v6362_v21 = vld [vmem:[%s8213_s3 + $0x148] sm:$0xff]  }
 0x1bf   : > { %v5420_v18 = vpop.f32.mrb[75].mxu0  ;;  %v5529_v43 = vpop.f32.mrb[73].mxu1  ;;  %v6363_v38 = vld [vmem:[%s8213_s3 + $0x108] sm:$0xff]   ;;  %5862 = vmatprep.subr.bf16.mxu1 %v6362_v21  ;;  %v6365_v21 = vld [vmem:[%s8213_s3 + $0x110] sm:$0xff]  }
 0x1c0   : > { %v1969_v29 = vadd.f32 %v5418_v54, %v7217_v61  ;;  %v5421_v40 = vadd.f32 %v5420_v18, %v5419_v41  ;;  %v5530_v44 = vadd.f32 %v5529_v43, %v5528_v13  ;;  %v5531_v48 = vpop.f32.mrb[74].mxu1  ;;  %5863 = vmatpush3.bf16.msra.mxu1 %v6363_v38 }
 0x1c1   : > { %v5532_v15 = vpop.f32.mrb[75].mxu1 }
 0x1c2   : > { %v1972_v55 = vadd.f32 %v5421_v40, %v7220_v59  ;;  %v5533_v63 = vadd.f32 %v5532_v15, %v5531_v48  ;;  %v7444_v35 = vadd.f32 %v5530_v44, %v1969_v29 }
 0x1c4   : > { %v5422_v2 = vpop.f32.mrb[76].mxu0  ;;  %v7452_v24 = vadd.f32 %v5533_v63, %v1972_v55 }
 0x1c5   : > { %v5423_v61 = vpop.f32.mrb[77].mxu0 }
 0x1c6   : > { %v5424_v27 = vadd.f32 %v5423_v61, %v5422_v2  ;;  %v5425_v50 = vpop.f32.mrb[78].mxu0  ;;  %v5534_v59 = vpop.f32.mrb[76].mxu1 }
 0x1c7   : > { %v5426_v62 = vpop.f32.mrb[79].mxu0  ;;  %v5535_v30 = vpop.f32.mrb[77].mxu1 }
 0x1c8   : > { %v1977_v25 = vadd.f32 %v5424_v27, %v7238_v11  ;;  %v5427_v8 = vadd.f32 %v5426_v62, %v5425_v50  ;;  %v5536_v32 = vadd.f32 %v5535_v30, %v5534_v59  ;;  %v5537_v33 = vpop.f32.mrb[78].mxu1 }
 0x1c9   : > { %v5538_v47 = vpop.f32.mrb[79].mxu1 }
 0x1ca   : > { %v1980_v45 = vadd.f32 %v5427_v8, %v7243_v53  ;;  %v5539_v58 = vadd.f32 %v5538_v47, %v5537_v33  ;;  %v7456_v1 = vadd.f32 %v5536_v32, %v1977_v25 }
 0x1cc   : > { %v5428_v34 = vpop.f32.mrb[80].mxu0  ;;  %v7464_v54 = vadd.f32 %v5539_v58, %v1980_v45 }
 0x1cd   : > { %v5429_v11 = vpop.f32.mrb[81].mxu0 }
 0x1ce   : > { %v5430_v41 = vadd.f32 %v5429_v11, %v5428_v34  ;;  %v5431_v13 = vpop.f32.mrb[82].mxu0  ;;  %v5540_v53 = vpop.f32.mrb[80].mxu1  ;;  %v6364_v34 = vld [vmem:[%s8213_s3 + $0x150] sm:$0xff]  }
 0x1cf   : > { %v5432_v18 = vpop.f32.mrb[83].mxu0  ;;  %v5541_v43 = vpop.f32.mrb[81].mxu1  ;;  %5864 = vmatprep.subr.bf16.mxu1 %v6364_v34  ;;  %v6367_v34 = vld [vmem:[%s8213_s3 + $0x118] sm:$0xff]  }
 0x1d0   : > { %v1985_v29 = vadd.f32 %v5430_v41, %v7251_v60  ;;  %v5433_v40 = vadd.f32 %v5432_v18, %v5431_v13  ;;  %v5542_v44 = vadd.f32 %v5541_v43, %v5540_v53  ;;  %v5543_v48 = vpop.f32.mrb[82].mxu1  ;;  %5865 = vmatpush3.bf16.msra.mxu1 %v6365_v21 }
 0x1d1   : > { %v5544_v15 = vpop.f32.mrb[83].mxu1 }
 0x1d2   : > { %v1988_v55 = vadd.f32 %v5433_v40, %v7253_v7  ;;  %v5545_v63 = vadd.f32 %v5544_v15, %v5543_v48  ;;  %v7468_v2 = vadd.f32 %v5542_v44, %v1985_v29 }
 0x1d4   : > { %v5434_v36 = vpop.f32.mrb[84].mxu0  ;;  %v7470_v61 = vadd.f32 %v5545_v63, %v1988_v55 }
 0x1d5   : > { %v5435_v14 = vpop.f32.mrb[85].mxu0 }
 0x1d6   : > { %v5436_v27 = vadd.f32 %v5435_v14, %v5434_v36  ;;  %v5437_v50 = vpop.f32.mrb[86].mxu0  ;;  %v5546_v59 = vpop.f32.mrb[84].mxu1 }
 0x1d7   : > { %v5438_v62 = vpop.f32.mrb[87].mxu0  ;;  %v5547_v8 = vpop.f32.mrb[85].mxu1 }
 0x1d8   : > { %v1993_v60 = vadd.f32 %v5436_v27, %v7267_v42  ;;  %v5439_v25 = vadd.f32 %v5438_v62, %v5437_v50  ;;  %v5548_v30 = vadd.f32 %v5547_v8, %v5546_v59  ;;  %v5549_v32 = vpop.f32.mrb[86].mxu1 }
 0x1d9   : > { %v5550_v33 = vpop.f32.mrb[87].mxu1 }
 0x1da   : > { %v1996_v7 = vadd.f32 %v5439_v25, %v7269_v0  ;;  %v5551_v45 = vadd.f32 %v5550_v33, %v5549_v32  ;;  %v7474_v47 = vadd.f32 %v5548_v30, %v1993_v60 }
 0x1dc   : > { %v5440_v58 = vpop.f32.mrb[88].mxu0  ;;  %v7482_v38 = vadd.f32 %v5551_v45, %v1996_v7 }
 0x1dd   : > { %v5441_v42 = vpop.f32.mrb[89].mxu0 }
 0x1de   : > { %v5442_v11 = vadd.f32 %v5441_v42, %v5440_v58  ;;  %v5443_v41 = vpop.f32.mrb[90].mxu0  ;;  %v5552_v0 = vpop.f32.mrb[88].mxu1  ;;  %v6366_v58 = vld [vmem:[%s8213_s3 + $0x158] sm:$0xff]  }
 0x1df   : > { %v5444_v13 = vpop.f32.mrb[91].mxu0  ;;  %v5553_v29 = vpop.f32.mrb[89].mxu1  ;;  %5866 = vmatprep.subr.bf16.mxu1 %v6366_v58 }
 0x1e0   : > { %v2001_v53 = vadd.f32 %v5442_v11, %v7277_v31  ;;  %v5445_v18 = vadd.f32 %v5444_v13, %v5443_v41  ;;  %v5554_v40 = vadd.f32 %v5553_v29, %v5552_v0  ;;  %v5555_v43 = vpop.f32.mrb[90].mxu1  ;;  %5867 = vmatpush3.bf16.msra.mxu1 %v6367_v34 }
 0x1e1   : > { %v5556_v48 = vpop.f32.mrb[91].mxu1 }
 0x1e2   : > { %v2004_v44 = vadd.f32 %v5445_v18, %v7279_v46  ;;  %v5557_v55 = vadd.f32 %v5556_v48, %v5555_v43  ;;  %v7486_v15 = vadd.f32 %v5554_v40, %v2001_v53  ;;  %v6368_v18 = vld [vmem:[%s8213_s3 + $0x1c0] sm:$0xff]  }
 0x1e3   : > { %5972 = vmatprep.subr.bf16.mxu0 %v6368_v18 }
 0x1e4   : > { %v5446_v63 = vpop.f32.mrb[92].mxu0  ;;  %v7488_v14 = vadd.f32 %v5557_v55, %v2004_v44 }
 0x1e5   : > { %v5447_v36 = vpop.f32.mrb[93].mxu0 }
 0x1e6   : > { %v5448_v27 = vadd.f32 %v5447_v36, %v5446_v63  ;;  %v5449_v50 = vpop.f32.mrb[94].mxu0  ;;  %v5558_v59 = vpop.f32.mrb[92].mxu1 }
 0x1e7   : > { %v5450_v62 = vpop.f32.mrb[95].mxu0  ;;  %v5559_v25 = vpop.f32.mrb[93].mxu1 }
 0x1e8   : > { %v2009_v31 = vadd.f32 %v5448_v27, %v7293_v20  ;;  %v5451_v60 = vadd.f32 %v5450_v62, %v5449_v50  ;;  %v5560_v8 = vadd.f32 %v5559_v25, %v5558_v59  ;;  %v5561_v30 = vpop.f32.mrb[94].mxu1 }
 0x1e9   : > { %v5562_v32 = vpop.f32.mrb[95].mxu1 }
 0x1ea   : > { %v2012_v46 = vadd.f32 %v5451_v60, %v7295_v56  ;;  %v5563_v7 = vadd.f32 %v5562_v32, %v5561_v30  ;;  %v7492_v33 = vadd.f32 %v5560_v8, %v2009_v31  ;;  %v6370_v31 = vld [vmem:[%s8213_s3 + $0x160] sm:$0xff]  }
 0x1eb   : > { %v6371_v8 = vld [vmem:[%s8213_s3 + $0x120] sm:$0xff]   ;;  %5868 = vmatprep.subr.bf16.mxu1 %v6370_v31 }
 0x1ec   : > { %v5452_v45 = vpop.f32.mrb[96].mxu0  ;;  %v7500_v21 = vadd.f32 %v5563_v7, %v2012_v46  ;;  %5869 = vmatpush3.bf16.msra.mxu1 %v6371_v8 }
 0x1ed   : > { %v5453_v20 = vpop.f32.mrb[97].mxu0 }
 0x1ee   : > { %v5454_v42 = vadd.f32 %v5453_v20, %v5452_v45  ;;  %v5455_v11 = vpop.f32.mrb[98].mxu0  ;;  %v5564_v56 = vpop.f32.mrb[96].mxu1 }
 0x1ef   : > { %v5456_v41 = vpop.f32.mrb[99].mxu0  ;;  %v5565_v53 = vpop.f32.mrb[97].mxu1 }
 0x1f0   : > { %v2017_v0 = vadd.f32 %v5454_v42, %v7301_v6  ;;  %v5457_v13 = vadd.f32 %v5456_v41, %v5455_v11  ;;  %v5566_v29 = vadd.f32 %v5565_v53, %v5564_v56  ;;  %v5567_v40 = vpop.f32.mrb[98].mxu1 }
 0x1f1   : > { %v5568_v44 = vpop.f32.mrb[99].mxu1 }
 0x1f2   : > { %v2020_v43 = vadd.f32 %v5457_v13, %v7305_v28  ;;  %v5569_v48 = vadd.f32 %v5568_v44, %v5567_v40  ;;  %v7507_v55 = vadd.f32 %v5566_v29, %v2017_v0 }
 0x1f4   : > { %v5458_v63 = vpop.f32.mrb[100].mxu0  ;;  %v7509_v27 = vadd.f32 %v5569_v48, %v2020_v43 }
 0x1f5   : > { %v5459_v36 = vpop.f32.mrb[101].mxu0 }
 0x1f6   : > { %v5460_v6 = vadd.f32 %v5459_v36, %v5458_v63  ;;  %v5461_v50 = vpop.f32.mrb[102].mxu0  ;;  %v5570_v59 = vpop.f32.mrb[100].mxu1 }
 0x1f7   : > { %v5462_v62 = vpop.f32.mrb[103].mxu0  ;;  %v5571_v25 = vpop.f32.mrb[101].mxu1 }
 0x1f8   : > { %v2025_v60 = vadd.f32 %v5460_v6, %v7317_v49  ;;  %v5463_v28 = vadd.f32 %v5462_v62, %v5461_v50  ;;  %v5572_v30 = vadd.f32 %v5571_v25, %v5570_v59  ;;  %v5573_v46 = vpop.f32.mrb[102].mxu1 }
 0x1f9   : > { %v5574_v7 = vpop.f32.mrb[103].mxu1 }
 0x1fa   : > { %v2028_v32 = vadd.f32 %v5463_v28, %v7321_v22  ;;  %v5575_v45 = vadd.f32 %v5574_v7, %v5573_v46  ;;  %v7519_v58 = vadd.f32 %v5572_v30, %v2025_v60  ;;  %v6375_v28 = vld [vmem:[%s8213_s3 + $0x128] sm:$0xff]  }
 0x1fc   : > { %v5464_v34 = vpop.f32.mrb[104].mxu0  ;;  %v7521_v42 = vadd.f32 %v5575_v45, %v2028_v32 }
 0x1fd   : > { %v5465_v20 = vpop.f32.mrb[105].mxu0 }
 0x1fe   : > { %v5466_v49 = vadd.f32 %v5465_v20, %v5464_v34  ;;  %v5467_v11 = vpop.f32.mrb[106].mxu0  ;;  %v5576_v56 = vpop.f32.mrb[104].mxu1 }
 0x1ff   : > { %v5468_v41 = vpop.f32.mrb[107].mxu0  ;;  %v5577_v53 = vpop.f32.mrb[105].mxu1 }
 0x200   : > { %v2033_v0 = vadd.f32 %v5466_v49, %v7327_v16  ;;  %v5469_v13 = vadd.f32 %v5468_v41, %v5467_v11  ;;  %v5578_v18 = vadd.f32 %v5577_v53, %v5576_v56  ;;  %v5579_v29 = vpop.f32.mrb[106].mxu1  ;;  %v6374_v16 = vld [vmem:[%s8213_s3 + $0x168] sm:$0xff]  }
 0x201   : > { %v5580_v40 = vpop.f32.mrb[107].mxu1  ;;  %5870 = vmatprep.subr.bf16.mxu1 %v6374_v16 }
 0x202   : > { %v2036_v22 = vadd.f32 %v5469_v13, %v7329_v23  ;;  %v5581_v43 = vadd.f32 %v5580_v40, %v5579_v29  ;;  %v7525_v44 = vadd.f32 %v5578_v18, %v2033_v0  ;;  %5871 = vmatpush3.bf16.msra.mxu1 %v6375_v28 }
 0x204   : > { %v5470_v48 = vpop.f32.mrb[108].mxu0  ;;  %v7527_v36 = vadd.f32 %v5581_v43, %v2036_v22 }
 0x205   : > { %v5471_v63 = vpop.f32.mrb[109].mxu0 }
 0x206   : > { %v5472_v6 = vadd.f32 %v5471_v63, %v5470_v48  ;;  %v5473_v50 = vpop.f32.mrb[110].mxu0  ;;  %v5582_v59 = vpop.f32.mrb[108].mxu1 }
 0x207   : > { %v5474_v62 = vpop.f32.mrb[111].mxu0  ;;  %v5583_v23 = vpop.f32.mrb[109].mxu1 }
 0x208   : > { %v2041_v31 = vadd.f32 %v5472_v6, %v7342_v51  ;;  %v5475_v60 = vadd.f32 %v5474_v62, %v5473_v50  ;;  %v5584_v25 = vadd.f32 %v5583_v23, %v5582_v59  ;;  %v5585_v8 = vpop.f32.mrb[110].mxu1 }
 0x209   : > { %v5586_v46 = vpop.f32.mrb[111].mxu1 }
 0x20a   : > { %v2044_v30 = vadd.f32 %v5475_v60, %v7344_v17  ;;  %v5587_v32 = vadd.f32 %v5586_v46, %v5585_v8  ;;  %v7537_v7 = vadd.f32 %v5584_v25, %v2041_v31  ;;  %v6379_v60 = vld [vmem:[%s8213_s3 + $0x130] sm:$0xff]  }
 0x20c   : > { %v5476_v45 = vpop.f32.mrb[112].mxu0  ;;  %v7539_v20 = vadd.f32 %v5587_v32, %v2044_v30 }
 0x20d   : > { %v5477_v34 = vpop.f32.mrb[113].mxu0 }
 0x20e   : > { %v5478_v51 = vadd.f32 %v5477_v34, %v5476_v45  ;;  %v5479_v49 = vpop.f32.mrb[114].mxu0  ;;  %v5588_v11 = vpop.f32.mrb[112].mxu1 }
 0x20f   : > { %v5480_v56 = vpop.f32.mrb[115].mxu0  ;;  %v5589_v13 = vpop.f32.mrb[113].mxu1 }
 0x210   : > { %v2049_v41 = vadd.f32 %v5478_v51, %v7348_v39  ;;  %v5481_v0 = vadd.f32 %v5480_v56, %v5479_v49  ;;  %v5590_v53 = vadd.f32 %v5589_v13, %v5588_v11  ;;  %v5591_v18 = vpop.f32.mrb[114].mxu1  ;;  %v6378_v39 = vld [vmem:[%s8213_s3 + $0x170] sm:$0xff]  }
 0x211   : > { %v5592_v29 = vpop.f32.mrb[115].mxu1  ;;  %5872 = vmatprep.subr.bf16.mxu1 %v6378_v39 }
 0x212   : > { %v2052_v17 = vadd.f32 %v5481_v0, %v7350_v3  ;;  %v5593_v22 = vadd.f32 %v5592_v29, %v5591_v18  ;;  %v7543_v40 = vadd.f32 %v5590_v53, %v2049_v41  ;;  %5873 = vmatpush3.bf16.msra.mxu1 %v6379_v60 }
 0x214   : > { %v5482_v43 = vpop.f32.mrb[116].mxu0  ;;  %v7545_v63 = vadd.f32 %v5593_v22, %v2052_v17 }
 0x215   : > { %v5483_v48 = vpop.f32.mrb[117].mxu0 }
 0x216   : > { %v5484_v6 = vadd.f32 %v5483_v48, %v5482_v43  ;;  %v5485_v50 = vpop.f32.mrb[118].mxu0  ;;  %v5594_v59 = vpop.f32.mrb[116].mxu1 }
 0x217   : > { %v5486_v62 = vpop.f32.mrb[119].mxu0  ;;  %v5595_v3 = vpop.f32.mrb[117].mxu1 }
 0x218   : > { %v2057_v16 = vadd.f32 %v5484_v6, %v7360_v12  ;;  %v5487_v31 = vadd.f32 %v5486_v62, %v5485_v50  ;;  %v5596_v23 = vadd.f32 %v5595_v3, %v5594_v59  ;;  %v5597_v28 = vpop.f32.mrb[118].mxu1 }
 0x219   : > { %v5598_v8 = vpop.f32.mrb[119].mxu1 }
 0x21a   : > { %v2060_v25 = vadd.f32 %v5487_v31, %v7362_v26  ;;  %v5599_v30 = vadd.f32 %v5598_v8, %v5597_v28  ;;  %v7555_v46 = vadd.f32 %v5596_v23, %v2057_v16  ;;  %v6383_v31 = vld [vmem:[%s8213_s3 + $0x138] sm:$0xff]  }
 0x21c   : > { %v5488_v32 = vpop.f32.mrb[120].mxu0  ;;  %v7557_v34 = vadd.f32 %v5599_v30, %v2060_v25 }
 0x21d   : > { %v5489_v45 = vpop.f32.mrb[121].mxu0 }
 0x21e   : > { %v5490_v12 = vadd.f32 %v5489_v45, %v5488_v32  ;;  %v5491_v51 = vpop.f32.mrb[122].mxu0  ;;  %v5600_v49 = vpop.f32.mrb[120].mxu1 }
 0x21f   : > { %v5492_v11 = vpop.f32.mrb[123].mxu0  ;;  %v5601_v0 = vpop.f32.mrb[121].mxu1 }
 0x220   : > { %v2065_v56 = vadd.f32 %v5490_v12, %v7375_v37  ;;  %v5493_v41 = vadd.f32 %v5492_v11, %v5491_v51  ;;  %v5602_v13 = vadd.f32 %v5601_v0, %v5600_v49  ;;  %v5603_v53 = vpop.f32.mrb[122].mxu1  ;;  %v6382_v37 = vld [vmem:[%s8213_s3 + $0x178] sm:$0xff]  }
 0x221   : > { %v5604_v18 = vpop.f32.mrb[123].mxu1  ;;  %5874 = vmatprep.subr.bf16.mxu1 %v6382_v37  ;;  %v2634_v37 = vld [vmem:[#allocation4 + $0xa] sm:$0xff] }
 0x222   : > { %v2068_v26 = vadd.f32 %v5493_v41, %v7380_v4  ;;  %v5605_v17 = vadd.f32 %v5604_v18, %v5603_v53  ;;  %v7561_v29 = vadd.f32 %v5602_v13, %v2065_v56  ;;  %5875 = vmatpush3.bf16.msra.mxu1 %v6383_v31 }
 0x224   : > { %v5494_v22 = vpop.f32.mrb[124].mxu0  ;;  %v7563_v48 = vadd.f32 %v5605_v17, %v2068_v26 }
 0x225   : > { %v5495_v43 = vpop.f32.mrb[125].mxu0 }
 0x226   : > { %v5496_v6 = vadd.f32 %v5495_v43, %v5494_v22  ;;  %v5497_v50 = vpop.f32.mrb[126].mxu0  ;;  %v5606_v59 = vpop.f32.mrb[124].mxu1 }
 0x227   : > { %v5498_v62 = vpop.f32.mrb[127].mxu0  ;;  %v5607_v4 = vpop.f32.mrb[125].mxu1 }
 0x228   : > { %v2073_v39 = vadd.f32 %v5496_v6, %v7399_v9  ;;  %v5499_v16 = vadd.f32 %v5498_v62, %v5497_v50  ;;  %v5608_v3 = vadd.f32 %v5607_v4, %v5606_v59  ;;  %v5609_v60 = vpop.f32.mrb[126].mxu1  ;;  %v7587_v6 = vld [vmem:[%s8213_s3 + $0x200] sm:$0xff]  }
 0x229   : > { %v5610_v28 = vpop.f32.mrb[127].mxu1  ;;  %v2633_v62 = vld [vmem:[#allocation4 + $0x2] sm:$0xff]  ;;  %6156 = vmatprep.subr.bf16.mxu1 %v7587_v6 }
 0x22a   : > { %v2076_v23 = vadd.f32 %v5499_v16, %v7404_v5  ;;  %v5611_v25 = vadd.f32 %v5610_v28, %v5609_v60  ;;  %v7573_v8 = vadd.f32 %v5608_v3, %v2073_v39  ;;  %v2665_v16 = vpack.c.bf16 %v2634_v37, %v2633_v62 }
 0x22c   : > { %v6126_v30 = vpop.f32.mrb[128].mxu0  ;;  %v7576_v45 = vadd.f32 %v5611_v25, %v2076_v23 }
 0x22d   : > { %v2283_v32 = vadd.f32 %v6126_v30, %v7435_v19  ;;  %v2274_v9 = vpop.f32.mrb[129].mxu0 }
 0x22e   : > { %v2275_v12 = vadd.f32 %v2274_v9, %v7417_v57  ;;  %v6127_v51 = vpop.f32.mrb[130].mxu0 }
 0x22f   : > { %v2403_v49 = vmax.f32 %v2283_v32, 0.0  ;;  %v2286_v11 = vadd.f32 %v6127_v51, %v7440_v52  ;;  %v2277_v56 = vpop.f32.mrb[131].mxu0  ;;  %v6372_v32 = vld [vmem:[%s8213_s3 + $0x1c8] sm:$0xff]  }
 0x230   : > { %v2401_v41 = vmax.f32 %v2275_v12, 0.0  ;;  %v2278_v5 = vadd.f32 %v2277_v56, %v7422_v10 }
 0x231   : > { %2475 = vst [vmem:[#allocation4 + $0x31] sm:$0xff] %v2403_v49  ;;  %v2404_v0 = vmax.f32 %v2286_v11, 0.0 }
 0x232   : > { %2473 = vst [vmem:[#allocation4 + $0x19] sm:$0xff] %v2401_v41  ;;  %v2402_v13 = vmax.f32 %v2278_v5, 0.0 }
 0x233   : > { %2476 = vst [vmem:[#allocation4 + $0x39] sm:$0xff] %v2404_v0  ;;  %v2603_v53 = vpack.c.bf16 %v2404_v0, %v2403_v49 }
 0x234   : > { %2474 = vst [vmem:[#allocation4 + $0x21] sm:$0xff] %v2402_v13  ;;  %v6130_v19 = vpop.f32.mrb[132].mxu0  ;;  %v2602_v26 = vpack.c.bf16 %v2402_v13, %v2401_v41 }
 0x235   : > { %v2299_v18 = vadd.f32 %v6130_v19, %v7456_v1  ;;  %v2290_v57 = vpop.f32.mrb[133].mxu0 }
 0x236   : > { %v2291_v17 = vadd.f32 %v2290_v57, %v7444_v35  ;;  %v6131_v22 = vpop.f32.mrb[134].mxu0  ;;  %3849 = vmatprep.mubr.bf16.mxu1 %v2602_v26  ;;  %v6377_v57 = vld [vmem:[%s8213_s3 + $0x190] sm:$0xff]  }
 0x237   : > { %v2407_v52 = vmax.f32 %v2299_v18, 0.0  ;;  %v2302_v43 = vadd.f32 %v6131_v22, %v7464_v54  ;;  %v2293_v10 = vpop.f32.mrb[135].mxu0 }
 0x238   : > { %v2405_v50 = vmax.f32 %v2291_v17, 0.0  ;;  %v2294_v59 = vadd.f32 %v2293_v10, %v7452_v24  ;;  %v6369_v24 = vld [vmem:[%s8213_s3 + $0x180] sm:$0xff]   ;;  %v2699_v30 = vld [vmem:[#allocation4 + $0x30] sm:$0xff]  ;;  %v6380_v10 = vld [vmem:[%s8213_s3 + $0x1d8] sm:$0xff]  }
 0x239   : > { %2479 = vst [vmem:[#allocation4 + $0x61] sm:$0xff] %v2407_v52  ;;  %v2408_v1 = vmax.f32 %v2302_v43, 0.0  ;;  %v2697_v39 = vld [vmem:[#allocation4 + $0x18] sm:$0xff] }
 0x23a   : > { %2477 = vst [vmem:[#allocation4 + $0x49] sm:$0xff] %v2405_v50  ;;  %v2406_v35 = vmax.f32 %v2294_v59, 0.0  ;;  %v2700_v4 = vld [vmem:[#allocation4 + $0x38] sm:$0xff] }
 0x23b   : > { %2480 = vst [vmem:[#allocation4 + $0x69] sm:$0xff] %v2408_v1  ;;  %v2698_v54 = vld [vmem:[#allocation4 + $0x20] sm:$0xff]  ;;  %v7591_v31 = vpack.c.bf16 %v2408_v1, %v2407_v52  ;;  %v7601_v51 = vpack.c.bf16 %v2700_v4, %v2699_v30  ;;  %v2637_v4 = vld [vmem:[#allocation4 + $0x32] sm:$0xff] }
 0x23c   : > { %2478 = vst [vmem:[#allocation4 + $0x51] sm:$0xff] %v2406_v35  ;;  %v6134_v3 = vpop.f32.mrb[136].mxu0  ;;  %v2729_v60 = vpack.c.bf16 %v2698_v54, %v2697_v39  ;;  %v2604_v23 = vpack.c.bf16 %v2406_v35, %v2405_v50  ;;  %v2635_v13 = vld [vmem:[#allocation4 + $0x1a] sm:$0xff] }
 0x23d   : > { %v2315_v28 = vadd.f32 %v6134_v3, %v7474_v47  ;;  %v2306_v25 = vpop.f32.mrb[137].mxu0  ;;  %v2638_v3 = vld [vmem:[#allocation4 + $0x3a] sm:$0xff] }
 0x23e   : > { %v2307_v9 = vadd.f32 %v2306_v25, %v7468_v2  ;;  %v6135_v12 = vpop.f32.mrb[138].mxu0  ;;  %4002 = vmatprep.mubr.bf16.mxu0 %v2729_v60  ;;  %3850 = vmatmul.mubr.bf16.gmra.mrb[132].mxu1 %v2729_v60  ;;  %v6373_v2 = vld [vmem:[%s8213_s3 + $0x188] sm:$0xff]  }
 0x23f   : > { %v2411_v49 = vmax.f32 %v2315_v28, 0.0  ;;  %v2318_v11 = vadd.f32 %v6135_v12, %v7482_v38  ;;  %v2309_v56 = vpop.f32.mrb[139].mxu0  ;;  %4003 = vmatmul.mubr.bf16.vlgmr.msra.gmra.mrb[160].mxu0 %v2665_v16  ;;  %3857 = vmatprep.mubr.bf16.mxu1 %v2603_v53  ;;  %v6376_v38 = vld [vmem:[%s8213_s3 + $0x1d0] sm:$0xff]   ;;  %v2636_v53 = vld [vmem:[#allocation4 + $0x22] sm:$0xff] }
 0x240   : > { %v2409_v47 = vmax.f32 %v2307_v9, 0.0  ;;  %v2310_v41 = vadd.f32 %v2309_v56, %v7470_v61  ;;  %4010 = vmatprep.mubr.bf16.mxu0 %v7601_v51  ;;  %5973 = vmatpush3.bf16.msra.mxu0 %v6369_v24  ;;  %v7620_v52 = vpack.c.bf16 %v2636_v53, %v2635_v13  ;;  %v6385_v28 = vld [vmem:[%s8213_s3 + $0x1a0] sm:$0xff]   ;;  %v6386_v12 = vld [vmem:[%s8213_s3 + $0x1e8] sm:$0xff]  }
 0x241   : > { %2483 = vst [vmem:[#allocation4 + $0x91] sm:$0xff] %v2411_v49  ;;  %v2412_v5 = vmax.f32 %v2318_v11, 0.0  ;;  %5974 = vmatprep.subr.bf16.mxu0 %v6372_v32  ;;  %v2701_v43 = vld [vmem:[#allocation4 + $0x48] sm:$0xff]  ;;  %v7647_v32 = vpack.c.bf16 %v2638_v3, %v2637_v4  ;;  %v2703_v9 = vld [vmem:[#allocation4 + $0x60] sm:$0xff] }
 0x242   : > { %2481 = vst [vmem:[#allocation4 + $0x79] sm:$0xff] %v2409_v47  ;;  %v2410_v0 = vmax.f32 %v2310_v41, 0.0 }
 0x243   : > { %2484 = vst [vmem:[#allocation4 + $0x99] sm:$0xff] %v2412_v5  ;;  %v2702_v61 = vld [vmem:[#allocation4 + $0x50] sm:$0xff]  ;;  %v7612_v19 = vpack.c.bf16 %v2412_v5, %v2411_v49 }
 0x244   : > { %2482 = vst [vmem:[#allocation4 + $0x81] sm:$0xff] %v2410_v0  ;;  %v6138_v26 = vpop.f32.mrb[140].mxu0  ;;  %v7614_v18 = vpack.c.bf16 %v2410_v0, %v2409_v47  ;;  %5975 = vmatpush3.bf16.msra.mxu0 %v6373_v2  ;;  %v7627_v62 = vpack.c.bf16 %v2702_v61, %v2701_v43  ;;  %v3020_v0 = vld [vmem:[#allocation4 + $0x4a] sm:$0xff]  ;;  %v3021_v13 = vld [vmem:[#allocation4 + $0x52] sm:$0xff] }
 0x245   : > { %v2331_v17 = vadd.f32 %v6138_v26, %v7492_v33  ;;  %v2322_v22 = vpop.f32.mrb[141].mxu0  ;;  %5976 = vmatprep.subr.bf16.mxu0 %v6376_v38 }
 0x246   : > { %v2323_v50 = vadd.f32 %v2322_v22, %v7486_v15  ;;  %v6139_v59 = vpop.f32.mrb[142].mxu0  ;;  %3858 = vmatmul.mubr.bf16.gmra.mrb[136].mxu1 %v7601_v51  ;;  %v6381_v15 = vld [vmem:[%s8213_s3 + $0x198] sm:$0xff]  }
 0x247   : > { %v2415_v37 = vmax.f32 %v2331_v17, 0.0  ;;  %v2334_v1 = vadd.f32 %v6139_v59, %v7500_v21  ;;  %v2325_v33 = vpop.f32.mrb[143].mxu0  ;;  %4011 = vmatmul.mubr.bf16.gmra.mrb[164].mxu0 %v7620_v52  ;;  %3865 = vmatprep.mubr.bf16.mxu1 %v2604_v23  ;;  %v6384_v21 = vld [vmem:[%s8213_s3 + $0x1e0] sm:$0xff]   ;;  %v7674_v17 = vpack.c.bf16 %v3021_v13, %v3020_v0 }
 0x248   : > { %v2413_v35 = vmax.f32 %v2323_v50, 0.0  ;;  %v2326_v39 = vadd.f32 %v2325_v33, %v7488_v14  ;;  %4018 = vmatprep.mubr.bf16.mxu0 %v7627_v62  ;;  %5977 = vmatpush3.bf16.msra.mxu0 %v6377_v57  ;;  %v2704_v14 = vld [vmem:[#allocation4 + $0x68] sm:$0xff]  ;;  %v6390_v57 = vld [vmem:[%s8213_s3 + $0x1b0] sm:$0xff]   ;;  %v6391_v50 = vld [vmem:[%s8213_s3 + $0x1f8] sm:$0xff]  }
 0x249   : > { %2487 = vst [vmem:[#allocation4 + $0xc1] sm:$0xff] %v2415_v37  ;;  %v2416_v54 = vmax.f32 %v2334_v1, 0.0  ;;  %5978 = vmatprep.subr.bf16.mxu0 %v6380_v10  ;;  %v7654_v56 = vpack.c.bf16 %v2704_v14, %v2703_v9  ;;  %v2705_v10 = vld [vmem:[#allocation4 + $0x78] sm:$0xff] }
 0x24a   : > { %2485 = vst [vmem:[#allocation4 + $0xa9] sm:$0xff] %v2413_v35  ;;  %v2414_v16 = vmax.f32 %v2326_v39, 0.0  ;;  %v2708_v4 = vld [vmem:[#allocation4 + $0x98] sm:$0xff] }
 0x24b   : > { %2488 = vst [vmem:[#allocation4 + $0xc9] sm:$0xff] %v2416_v54  ;;  %v7639_v60 = vpack.c.bf16 %v2416_v54, %v2415_v37 }
 0x24c   : > { %2486 = vst [vmem:[#allocation4 + $0xb1] sm:$0xff] %v2414_v16  ;;  %v6142_v23 = vpop.f32.mrb[144].mxu0  ;;  %v7641_v24 = vpack.c.bf16 %v2414_v16, %v2413_v35  ;;  %5979 = vmatpush3.bf16.msra.mxu0 %v6381_v15  ;;  %v2642_v16 = vld [vmem:[#allocation4 + $0x6a] sm:$0xff] }
 0x24d   : > { %v2347_v25 = vadd.f32 %v6142_v23, %v7519_v58  ;;  %v2338_v30 = vpop.f32.mrb[145].mxu0  ;;  %5980 = vmatprep.subr.bf16.mxu0 %v6384_v21  ;;  %v2641_v21 = vld [vmem:[#allocation4 + $0x62] sm:$0xff] }
 0x24e   : > { %v2339_v49 = vadd.f32 %v2338_v30, %v7507_v55  ;;  %v6143_v11 = vpop.f32.mrb[146].mxu0  ;;  %3866 = vmatmul.mubr.bf16.gmra.mrb[140].mxu1 %v7627_v62  ;;  %v6387_v55 = vld [vmem:[%s8213_s3 + $0x1a8] sm:$0xff]  }
 0x24f   : > { %v2419_v47 = vmax.f32 %v2347_v25, 0.0  ;;  %v2350_v41 = vadd.f32 %v6143_v11, %v7521_v42  ;;  %v2341_v58 = vpop.f32.mrb[147].mxu0  ;;  %4019 = vmatmul.mubr.bf16.gmra.mrb[168].mxu0 %v7647_v32  ;;  %3873 = vmatprep.mubr.bf16.mxu1 %v7591_v31  ;;  %v6388_v42 = vld [vmem:[%s8213_s3 + $0x1f0] sm:$0xff]  }
 0x250   : > { %v2417_v2 = vmax.f32 %v2339_v49, 0.0  ;;  %v2342_v5 = vadd.f32 %v2341_v58, %v7509_v27  ;;  %4026 = vmatprep.mubr.bf16.mxu0 %v7654_v56  ;;  %5981 = vmatpush3.bf16.msra.mxu0 %v6385_v28  ;;  %v2706_v27 = vld [vmem:[#allocation4 + $0x80] sm:$0xff]  ;;  %v7697_v28 = vpack.c.bf16 %v2642_v16, %v2641_v21  ;;  %v2707_v25 = vld [vmem:[#allocation4 + $0x90] sm:$0xff] }
 0x251   : > { %2491 = vst [vmem:[#allocation4 + $0xf1] sm:$0xff] %v2419_v47  ;;  %v2420_v38 = vmax.f32 %v2350_v41, 0.0  ;;  %5982 = vmatprep.subr.bf16.mxu0 %v6386_v12  ;;  %v7682_v1 = vpack.c.bf16 %v2706_v27, %v2705_v10  ;;  %v7701_v12 = vpack.c.bf16 %v2708_v4, %v2707_v25  ;;  %v2709_v13 = vld [vmem:[#allocation4 + $0xa8] sm:$0xff] }
 0x252   : > { %2489 = vst [vmem:[#allocation4 + $0xd9] sm:$0xff] %v2417_v2  ;;  %v2418_v31 = vmax.f32 %v2342_v5, 0.0  ;;  %v2644_v5 = vld [vmem:[#allocation4 + $0x82] sm:$0xff] }
 0x253   : > { %2492 = vst [vmem:[#allocation4 + $0xf9] sm:$0xff] %v2420_v38  ;;  %v7667_v53 = vpack.c.bf16 %v2420_v38, %v2419_v47  ;;  %v2649_v21 = vld [vmem:[#allocation4 + $0xc2] sm:$0xff] }
 0x254   : > { %2490 = vst [vmem:[#allocation4 + $0xe1] sm:$0xff] %v2418_v31  ;;  %v6146_v61 = vpop.f32.mrb[148].mxu0  ;;  %v7669_v26 = vpack.c.bf16 %v2418_v31, %v2417_v2  ;;  %5983 = vmatpush3.bf16.msra.mxu0 %v6387_v55  ;;  %v2643_v2 = vld [vmem:[#allocation4 + $0x7a] sm:$0xff]  ;;  %v2710_v55 = vld [vmem:[#allocation4 + $0xb0] sm:$0xff] }
 0x255   : > { %v2363_v22 = vadd.f32 %v6146_v61, %v7537_v7  ;;  %v2354_v43 = vpop.f32.mrb[149].mxu0  ;;  %5984 = vmatprep.subr.bf16.mxu0 %v6388_v42  ;;  %v7717_v61 = vpack.c.bf16 %v2710_v55, %v2709_v13 }
 0x256   : > { %v2355_v59 = vadd.f32 %v2354_v43, %v7525_v44  ;;  %v6147_v37 = vpop.f32.mrb[150].mxu0  ;;  %3874 = vmatmul.mubr.bf16.gmra.mrb[144].mxu1 %v7654_v56  ;;  %v6392_v44 = vld [vmem:[%s8213_s3 + $0x1b8] sm:$0xff]  }
 0x257   : > { %v2423_v33 = vmax.f32 %v2363_v22, 0.0  ;;  %v2366_v35 = vadd.f32 %v6147_v37, %v7539_v20  ;;  %v2357_v39 = vpop.f32.mrb[151].mxu0  ;;  %4027 = vmatmul.mubr.bf16.gmra.mrb[172].mxu0 %v7674_v17  ;;  %3881 = vmatprep.mubr.bf16.mxu1 %v7614_v18  ;;  %v2646_v37 = vld [vmem:[#allocation4 + $0x9a] sm:$0xff] }
 0x258   : > { %v2421_v7 = vmax.f32 %v2355_v59, 0.0  ;;  %v2358_v15 = vadd.f32 %v2357_v39, %v7527_v36  ;;  %4034 = vmatprep.mubr.bf16.mxu0 %v7682_v1  ;;  %5985 = vmatpush3.bf16.msra.mxu0 %v6390_v57  ;;  %v2645_v59 = vld [vmem:[#allocation4 + $0x92] sm:$0xff]  ;;  %v2711_v39 = vld [vmem:[#allocation4 + $0xc0] sm:$0xff] }
 0x259   : > { %2495 = vst [vmem:[#allocation4 + $0x121] sm:$0xff] %v2423_v33  ;;  %v2424_v54 = vmax.f32 %v2366_v35, 0.0  ;;  %5986 = vmatprep.subr.bf16.mxu0 %v6391_v50  ;;  %v7726_v35 = vpack.c.bf16 %v2646_v37, %v2645_v59 }
 0x25a   : > { %2493 = vst [vmem:[#allocation4 + $0x109] sm:$0xff] %v2421_v7  ;;  %v2422_v20 = vmax.f32 %v2358_v15, 0.0  ;;  %v2716_v16 = vld [vmem:[#allocation4 + $0xf8] sm:$0xff] }
 0x25b   : > { %2496 = vst [vmem:[#allocation4 + $0x129] sm:$0xff] %v2424_v54  ;;  %v7692_v18 = vpack.c.bf16 %v2424_v54, %v2423_v33  ;;  %v2712_v33 = vld [vmem:[#allocation4 + $0xc8] sm:$0xff]  ;;  %v2714_v15 = vld [vmem:[#allocation4 + $0xe0] sm:$0xff]  ;;  %v2713_v54 = vld [vmem:[#allocation4 + $0xd8] sm:$0xff] }
 0x25c   : > { %2494 = vst [vmem:[#allocation4 + $0x111] sm:$0xff] %v2422_v20  ;;  %v6150_v36 = vpop.f32.mrb[152].mxu0  ;;  %v7694_v3 = vpack.c.bf16 %v2422_v20, %v2421_v7  ;;  %5987 = vmatpush3.bf16.msra.mxu0 %v6392_v44  ;;  %v2648_v7 = vld [vmem:[#allocation4 + $0xb2] sm:$0xff]  ;;  %v7737_v20 = vpack.c.bf16 %v2714_v15, %v2713_v54 }
 0x25d   : > { %v2379_v14 = vadd.f32 %v6150_v36, %v7555_v46  ;;  %v2370_v23 = vpop.f32.mrb[153].mxu0  ;;  %v2715_v36 = vld [vmem:[#allocation4 + $0xf0] sm:$0xff] }
 0x25e   : > { %v2371_v30 = vadd.f32 %v2370_v23, %v7543_v40  ;;  %v6151_v9 = vpop.f32.mrb[154].mxu0  ;;  %3882 = vmatmul.mubr.bf16.gmra.mrb[148].mxu1 %v7682_v1  ;;  %v2651_v23 = vld [vmem:[#allocation4 + $0xda] sm:$0xff] }
 0x25f   : > { %v2427_v49 = vmax.f32 %v2379_v14, 0.0  ;;  %v2382_v11 = vadd.f32 %v6151_v9, %v7557_v34  ;;  %v2373_v47 = vpop.f32.mrb[155].mxu0  ;;  %4035 = vmatmul.mubr.bf16.gmra.mrb[176].mxu0 %v7697_v28  ;;  %3889 = vmatprep.mubr.bf16.mxu1 %v7612_v19  ;;  %v7745_v14 = vpack.c.bf16 %v2716_v16, %v2715_v36  ;;  %v2761_v36 = vld [vmem:[#allocation4 + $0x19] sm:$0xff] }
 0x260   : > { %v2425_v46 = vmax.f32 %v2371_v30, 0.0  ;;  %v2374_v41 = vadd.f32 %v2373_v47, %v7545_v63  ;;  %4042 = vmatprep.mubr.bf16.mxu0 %v7701_v12  ;;  %v7713_v63 = vpack.c.bf16 %v2644_v5, %v2643_v2 }
 0x261   : > { %2499 = vst [vmem:[#allocation4 + $0x151] sm:$0xff] %v2427_v49  ;;  %v2428_v40 = vmax.f32 %v2382_v11, 0.0  ;;  %v2717_v9 = vld [vmem:[#allocation4 + $0x108] sm:$0xff] }
 0x262   : > { %2497 = vst [vmem:[#allocation4 + $0x139] sm:$0xff] %v2425_v46  ;;  %v2426_v58 = vmax.f32 %v2374_v41, 0.0  ;;  %v2653_v41 = vld [vmem:[#allocation4 + $0xf2] sm:$0xff]  ;;  %v2720_v2 = vld [vmem:[#allocation4 + $0x128] sm:$0xff] }
 0x263   : > { %2500 = vst [vmem:[#allocation4 + $0x159] sm:$0xff] %v2428_v40  ;;  %v7708_v38 = vpack.c.bf16 %v2428_v40, %v2427_v49  ;;  %v2718_v25 = vld [vmem:[#allocation4 + $0x110] sm:$0xff]  ;;  %v2654_v40 = vld [vmem:[#allocation4 + $0xfa] sm:$0xff] }
 0x264   : > { %2498 = vst [vmem:[#allocation4 + $0x141] sm:$0xff] %v2426_v58  ;;  %v6154_v34 = vpop.f32.mrb[156].mxu0  ;;  %v7710_v42 = vpack.c.bf16 %v2426_v58, %v2425_v46  ;;  %v7753_v49 = vpack.c.bf16 %v2718_v25, %v2717_v9  ;;  %v7762_v55 = vpack.c.bf16 %v2654_v40, %v2653_v41  ;;  %v2954_v9 = vld [vmem:[#allocation4 + $0x31] sm:$0xff] }
 0x265   : > { %v2395_v19 = vadd.f32 %v6154_v34, %v7573_v8  ;;  %v2386_v0 = vpop.f32.mrb[157].mxu0  ;;  %v2719_v34 = vld [vmem:[#allocation4 + $0x120] sm:$0xff]  ;;  %v2830_v41 = vld [vmem:[#allocation4 + $0x52] sm:$0xff] }
 0x266   : > { %v2387_v31 = vadd.f32 %v2386_v0, %v7561_v29  ;;  %v6155_v27 = vpop.f32.mrb[158].mxu0  ;;  %3890 = vmatmul.mubr.bf16.gmra.mrb[152].mxu1 %v7701_v12  ;;  %v2656_v0 = vld [vmem:[#allocation4 + $0x112] sm:$0xff] }
 0x267   : > { %v2431_v57 = vmax.f32 %v2395_v19, 0.0  ;;  %v2398_v22 = vadd.f32 %v6155_v27, %v7576_v45  ;;  %v2389_v43 = vpop.f32.mrb[159].mxu0  ;;  %4043 = vmatmul.mubr.bf16.gmra.mrb[180].mxu0 %v7713_v63  ;;  %3897 = vmatprep.mubr.bf16.mxu1 %v7641_v24  ;;  %v7729_v24 = vpack.c.bf16 %v2712_v33, %v2711_v39  ;;  %v7765_v19 = vpack.c.bf16 %v2720_v2, %v2719_v34  ;;  %v2957_v40 = vld [vmem:[#allocation4 + $0x51] sm:$0xff]  ;;  %v2956_v2 = vld [vmem:[#allocation4 + $0x49] sm:$0xff] }
 0x268   : > { %v2429_v8 = vmax.f32 %v2387_v31, 0.0  ;;  %v2390_v10 = vadd.f32 %v2389_v43, %v7563_v48  ;;  %4050 = vmatprep.mubr.bf16.mxu0 %v7717_v61  ;;  %v2647_v48 = vld [vmem:[#allocation4 + $0xaa] sm:$0xff]  ;;  %v6395_v34 = vld [vmem:[%s8213_s3 + $0x218] sm:$0xff]  }
 0x269   : > { %2503 = vst [vmem:[#allocation4 + $0x181] sm:$0xff] %v2431_v57  ;;  %v2432_v29 = vmax.f32 %v2398_v22, 0.0  ;;  %v7734_v44 = vpack.c.bf16 %v2648_v7, %v2647_v48  ;;  %v2721_v27 = vld [vmem:[#allocation4 + $0x138] sm:$0xff]  ;;  %v2657_v22 = vld [vmem:[#allocation4 + $0x122] sm:$0xff] }
 0x26a   : > { %2501 = vst [vmem:[#allocation4 + $0x169] sm:$0xff] %v2429_v8  ;;  %v2430_v50 = vmax.f32 %v2390_v10, 0.0  ;;  %v2724_v43 = vld [vmem:[#allocation4 + $0x158] sm:$0xff]  ;;  %v2723_v10 = vld [vmem:[#allocation4 + $0x150] sm:$0xff] }
 0x26b   : > { %2504 = vst [vmem:[#allocation4 + $0x189] sm:$0xff] %v2432_v29  ;;  %v2722_v13 = vld [vmem:[#allocation4 + $0x140] sm:$0xff]  ;;  %v7781_v29 = vpack.c.bf16 %v2724_v43, %v2723_v10  ;;  %v2661_v48 = vld [vmem:[#allocation4 + $0x152] sm:$0xff] }
 0x26c   : > { %2502 = vst [vmem:[#allocation4 + $0x171] sm:$0xff] %v2430_v50  ;;  %v7724_v45 = vpack.c.bf16 %v2430_v50, %v2429_v8  ;;  %v7773_v57 = vpack.c.bf16 %v2722_v13, %v2721_v27  ;;  %v2659_v50 = vld [vmem:[#allocation4 + $0x13a] sm:$0xff]  ;;  %v6397_v13 = vld [vmem:[%s8213_s3 + $0x228] sm:$0xff]  }
 0x26d   : > { %v6399_v43 = vld [vmem:[%s8213_s3 + $0x238] sm:$0xff]  }
 0x26e   : > { %3898 = vmatmul.mubr.bf16.gmra.mrb[156].mxu1 %v7717_v61 }
 0x26f   : > { %4051 = vmatmul.mubr.bf16.gmra.mrb[184].mxu0 %v7726_v35  ;;  %3905 = vmatprep.mubr.bf16.mxu1 %v7639_v60  ;;  %v2650_v60 = vld [vmem:[#allocation4 + $0xca] sm:$0xff] }
 0x270   : > { %4058 = vmatprep.mubr.bf16.mxu0 %v7729_v24  ;;  %v7742_v4 = vpack.c.bf16 %v2650_v60, %v2649_v21  ;;  %v2727_v54 = vld [vmem:[#allocation4 + $0x180] sm:$0xff] }
 0x271   : > { %v2725_v33 = vld [vmem:[#allocation4 + $0x168] sm:$0xff] }
 0x272   : > { %v2728_v7 = vld [vmem:[#allocation4 + $0x188] sm:$0xff] }
 0x273   : > { %v2726_v59 = vld [vmem:[#allocation4 + $0x170] sm:$0xff]  ;;  %v7797_v21 = vpack.c.bf16 %v2728_v7, %v2727_v54  ;;  %v2762_v60 = vld [vmem:[#allocation4 + $0x21] sm:$0xff] }
 0x274   : > { %v7789_v39 = vpack.c.bf16 %v2726_v59, %v2725_v33  ;;  %v2664_v16 = vld [vmem:[#allocation4 + $0x172] sm:$0xff]  ;;  %v2964_v59 = vld [vmem:[#allocation4 + $0xa9] sm:$0xff] }
 0x276   : > { %3906 = vmatmul.mubr.bf16.gmra.mrb[160].mxu1 %v7729_v24 }
 0x277   : > { %4059 = vmatmul.mubr.bf16.gmra.mrb[188].mxu0 %v7734_v44  ;;  %3913 = vmatprep.mubr.bf16.mxu1 %v7669_v26  ;;  %v2652_v26 = vld [vmem:[#allocation4 + $0xe2] sm:$0xff] }
 0x278   : > { %4066 = vmatprep.mubr.bf16.mxu0 %v7737_v20  ;;  %v7750_v30 = vpack.c.bf16 %v2652_v26, %v2651_v23  ;;  %v2955_v23 = vld [vmem:[#allocation4 + $0x39] sm:$0xff]  ;;  %v2793_v26 = vpack.c.bf16 %v2762_v60, %v2761_v36 }
 0x27e   : > { %3914 = vmatmul.mubr.bf16.gmra.mrb[164].mxu1 %v7737_v20  ;;  %v5652_v11 = vpop.f32.mrb[128].mxu1 }
 0x27f   : > { %4067 = vmatmul.mubr.bf16.gmra.mrb[192].mxu0 %v7742_v4  ;;  %3921 = vmatprep.mubr.bf16.mxu1 %v7667_v53  ;;  %v5653_v53 = vpop.f32.mrb[129].mxu1 }
 0x280   : > { %4074 = vmatprep.mubr.bf16.mxu0 %v7745_v14  ;;  %v7758_v47 = vadd.f32 %v5653_v53, %v5652_v11  ;;  %v5655_v46 = vpop.f32.mrb[130].mxu1  ;;  %v6393_v11 = vld [vmem:[%s8213_s3 + $0x208] sm:$0xff]   ;;  %v2986_v53 = vpack.c.bf16 %v2955_v23, %v2954_v9 }
 0x281   : > { %v5656_v58 = vpop.f32.mrb[131].mxu1 }
 0x282   : > { %v7760_v5 = vadd.f32 %v5656_v58, %v5655_v46  ;;  %v2829_v46 = vld [vmem:[#allocation4 + $0x4a] sm:$0xff] }
 0x283   : > { %v2859_v58 = vpack.c.bf16 %v2830_v41, %v2829_v46  ;;  %v2978_v46 = vld [vmem:[#allocation4 + $0x151] sm:$0xff] }
 0x286   : > { %3922 = vmatmul.mubr.bf16.gmra.mrb[168].mxu1 %v7745_v14 }
 0x287   : > { %4075 = vmatmul.mubr.bf16.gmra.mrb[196].mxu0 %v7750_v30  ;;  %3929 = vmatprep.mubr.bf16.mxu1 %v7694_v3  ;;  %v2655_v3 = vld [vmem:[#allocation4 + $0x10a] sm:$0xff] }
 0x288   : > { %4082 = vmatprep.mubr.bf16.mxu0 %v7753_v49  ;;  %v7770_v31 = vpack.c.bf16 %v2656_v0, %v2655_v3  ;;  %v2959_v3 = vld [vmem:[#allocation4 + $0x69] sm:$0xff]  ;;  %v2958_v0 = vld [vmem:[#allocation4 + $0x61] sm:$0xff] }
 0x289   : > { %v2988_v27 = vpack.c.bf16 %v2959_v3, %v2958_v0 }
 0x28e   : > { %3930 = vmatmul.mubr.bf16.gmra.mrb[172].mxu1 %v7753_v49 }
 0x28f   : > { %4083 = vmatmul.mubr.bf16.gmra.mrb[200].mxu0 %v7762_v55  ;;  %3937 = vmatprep.mubr.bf16.mxu1 %v7692_v18  ;;  %v2658_v18 = vld [vmem:[#allocation4 + $0x12a] sm:$0xff] }
 0x290   : > { %4090 = vmatprep.mubr.bf16.mxu0 %v7765_v19  ;;  %v7778_v8 = vpack.c.bf16 %v2658_v18, %v2657_v22  ;;  %v2961_v22 = vld [vmem:[#allocation4 + $0x81] sm:$0xff]  ;;  %v2960_v18 = vld [vmem:[#allocation4 + $0x79] sm:$0xff] }
 0x291   : > { %v2989_v10 = vpack.c.bf16 %v2961_v22, %v2960_v18 }
 0x296   : > { %3938 = vmatmul.mubr.bf16.gmra.mrb[176].mxu1 %v7765_v19 }
 0x297   : > { %4091 = vmatmul.mubr.bf16.gmra.mrb[204].mxu0 %v7770_v31  ;;  %3945 = vmatprep.mubr.bf16.mxu1 %v7710_v42  ;;  %v2660_v42 = vld [vmem:[#allocation4 + $0x142] sm:$0xff] }
 0x298   : > { %4098 = vmatprep.mubr.bf16.mxu0 %v7773_v57  ;;  %v7786_v37 = vpack.c.bf16 %v2660_v42, %v2659_v50  ;;  %v2965_v42 = vld [vmem:[#allocation4 + $0xb1] sm:$0xff] }
 0x299   : > { %v2991_v33 = vpack.c.bf16 %v2965_v42, %v2964_v59 }
 0x29e   : > { %3946 = vmatmul.mubr.bf16.gmra.mrb[180].mxu1 %v7773_v57 }
 0x29f   : > { %4099 = vmatmul.mubr.bf16.gmra.mrb[208].mxu0 %v7778_v8  ;;  %3953 = vmatprep.mubr.bf16.mxu1 %v7708_v38  ;;  %v2662_v38 = vld [vmem:[#allocation4 + $0x15a] sm:$0xff] }
 0x2a0   : > { %4106 = vmatprep.mubr.bf16.mxu0 %v7781_v29  ;;  %v7794_v15 = vpack.c.bf16 %v2662_v38, %v2661_v48 }
 0x2a6   : > { %3954 = vmatmul.mubr.bf16.gmra.mrb[184].mxu1 %v7781_v29 }
 0x2a7   : > { %4107 = vmatmul.mubr.bf16.gmra.mrb[212].mxu0 %v7786_v37  ;;  %3961 = vmatprep.mubr.bf16.mxu1 %v7724_v45  ;;  %v2663_v45 = vld [vmem:[#allocation4 + $0x16a] sm:$0xff] }
 0x2a8   : > { %4114 = vmatprep.mubr.bf16.mxu0 %v7789_v39  ;;  %v7802_v25 = vpack.c.bf16 %v2664_v16, %v2663_v45 }
 0x2ae   : > { %3962 = vmatmul.mubr.bf16.gmra.mrb[188].mxu1 %v7789_v39 }
 0x2af   : > { %4115 = vmatmul.mubr.bf16.gmra.mrb[216].mxu0 %v7794_v15  ;;  %4163 = vmatprep.mubr.bf16.mxu1 %v7620_v52  ;;  %v6394_v52 = vld [vmem:[%s8213_s3 + $0x210] sm:$0xff]  }
 0x2b0   : > { %4122 = vmatprep.mubr.bf16.mxu0 %v7797_v21 }
 0x2b6   : > { %4164 = vmatmul.mubr.bf16.vlgmr.msra.gmra.mrb[192].mxu1 %v2793_v26  ;;  %v2979_v26 = vld [vmem:[#allocation4 + $0x159] sm:$0xff] }
 0x2b7   : > { %4123 = vmatmul.mubr.bf16.gmra.mrb[220].mxu0 %v7802_v25  ;;  %4171 = vmatprep.mubr.bf16.mxu1 %v7647_v32  ;;  %v2987_v32 = vpack.c.bf16 %v2957_v40, %v2956_v2  ;;  %v2998_v2 = vpack.c.bf16 %v2979_v26, %v2978_v46  ;;  %v3019_v26 = vld [vmem:[#allocation4 + $0x3a] sm:$0xff] }
 0x2b8   : > { %4324 = vmatprep.mubr.bf16.mxu0 %v2986_v53  ;;  %6157 = vmatpush3.bf16.msra.mxu1 %v7587_v6  ;;  %v6396_v6 = vld [vmem:[%s8213_s3 + $0x220] sm:$0xff]  }
 0x2b9   : > { %6158 = vmatprep.subr.bf16.mxu1 %v6393_v11 }
 0x2bc   : > { %6159 = vmatpush3.bf16.msra.mxu1 %v6393_v11 }
 0x2bd   : > { %6160 = vmatprep.subr.bf16.mxu1 %v6394_v52 }
 0x2be   : > { %4172 = vmatmul.mubr.bf16.gmra.mrb[196].mxu1 %v2986_v53 }
 0x2bf   : > { %4325 = vmatmul.mubr.bf16.vlgmr.msra.gmra.mrb[224].mxu0 %v7601_v51  ;;  %4179 = vmatprep.mubr.bf16.mxu1 %v2859_v58  ;;  %v6398_v51 = vld [vmem:[%s8213_s3 + $0x230] sm:$0xff]  }
 0x2c0   : > { %4332 = vmatprep.mubr.bf16.mxu0 %v2987_v32  ;;  %6161 = vmatpush3.bf16.msra.mxu1 %v6394_v52 }
 0x2c1   : > { %6162 = vmatprep.subr.bf16.mxu1 %v6395_v34 }
 0x2c4   : > { %6163 = vmatpush3.bf16.msra.mxu1 %v6395_v34 }
 0x2c5   : > { %6164 = vmatprep.subr.bf16.mxu1 %v6396_v6 }
 0x2c6   : > { %4180 = vmatmul.mubr.bf16.gmra.mrb[200].mxu1 %v2987_v32 }
 0x2c7   : > { %4333 = vmatmul.mubr.bf16.gmra.mrb[228].mxu0 %v7627_v62  ;;  %4187 = vmatprep.mubr.bf16.mxu1 %v7697_v28  ;;  %v2963_v62 = vld [vmem:[#allocation4 + $0x99] sm:$0xff]  ;;  %v2962_v28 = vld [vmem:[#allocation4 + $0x91] sm:$0xff] }
 0x2c8   : > { %4340 = vmatprep.mubr.bf16.mxu0 %v2988_v27  ;;  %6165 = vmatpush3.bf16.msra.mxu1 %v6396_v6  ;;  %v2990_v50 = vpack.c.bf16 %v2963_v62, %v2962_v28 }
 0x2c9   : > { %6166 = vmatprep.subr.bf16.mxu1 %v6397_v13 }
 0x2cc   : > { %6167 = vmatpush3.bf16.msra.mxu1 %v6397_v13 }
 0x2cd   : > { %6168 = vmatprep.subr.bf16.mxu1 %v6398_v51 }
 0x2ce   : > { %4188 = vmatmul.mubr.bf16.gmra.mrb[204].mxu1 %v2988_v27  ;;  %v2981_v27 = vld [vmem:[#allocation4 + $0x171] sm:$0xff] }
 0x2cf   : > { %4341 = vmatmul.mubr.bf16.gmra.mrb[232].mxu0 %v7654_v56  ;;  %4195 = vmatprep.mubr.bf16.mxu1 %v7713_v63  ;;  %v2967_v56 = vld [vmem:[#allocation4 + $0xc9] sm:$0xff]  ;;  %v2966_v63 = vld [vmem:[#allocation4 + $0xc1] sm:$0xff] }
 0x2d0   : > { %4348 = vmatprep.mubr.bf16.mxu0 %v2989_v10  ;;  %6169 = vmatpush3.bf16.msra.mxu1 %v6398_v51  ;;  %v2992_v48 = vpack.c.bf16 %v2967_v56, %v2966_v63  ;;  %v2855_v63 = vld [vmem:[#allocation4 + $0x182] sm:$0xff] }
 0x2d1   : > { %6170 = vmatprep.subr.bf16.mxu1 %v6399_v43 }
 0x2d4   : > { %6171 = vmatpush3.bf16.msra.mxu1 %v6399_v43 }
 0x2d6   : > { %4196 = vmatmul.mubr.bf16.gmra.mrb[208].mxu1 %v2989_v10 }
 0x2d7   : > { %4349 = vmatmul.mubr.bf16.gmra.mrb[236].mxu0 %v7682_v1  ;;  %4203 = vmatprep.mubr.bf16.mxu1 %v7726_v35  ;;  %v2969_v1 = vld [vmem:[#allocation4 + $0xe1] sm:$0xff]  ;;  %v2968_v35 = vld [vmem:[#allocation4 + $0xd9] sm:$0xff] }
 0x2d8   : > { %4356 = vmatprep.mubr.bf16.mxu0 %v2990_v50  ;;  %v2993_v38 = vpack.c.bf16 %v2969_v1, %v2968_v35 }
 0x2de   : > { %4204 = vmatmul.mubr.bf16.gmra.mrb[212].mxu1 %v2990_v50 }
 0x2df   : > { %4357 = vmatmul.mubr.bf16.gmra.mrb[240].mxu0 %v7701_v12  ;;  %4211 = vmatprep.mubr.bf16.mxu1 %v7734_v44  ;;  %v2971_v12 = vld [vmem:[#allocation4 + $0xf9] sm:$0xff]  ;;  %v2970_v44 = vld [vmem:[#allocation4 + $0xf1] sm:$0xff] }
 0x2e0   : > { %4364 = vmatprep.mubr.bf16.mxu0 %v2991_v33  ;;  %v2994_v7 = vpack.c.bf16 %v2971_v12, %v2970_v44  ;;  %v2983_v12 = vld [vmem:[#allocation4 + $0x189] sm:$0xff] }
 0x2e6   : > { %4212 = vmatmul.mubr.bf16.gmra.mrb[216].mxu1 %v2991_v33 }
 0x2e7   : > { %4365 = vmatmul.mubr.bf16.gmra.mrb[244].mxu0 %v7717_v61  ;;  %4219 = vmatprep.mubr.bf16.mxu1 %v7742_v4  ;;  %v2973_v61 = vld [vmem:[#allocation4 + $0x111] sm:$0xff]  ;;  %v2972_v4 = vld [vmem:[#allocation4 + $0x109] sm:$0xff] }
 0x2e8   : > { %4372 = vmatprep.mubr.bf16.mxu0 %v2992_v48  ;;  %v2995_v54 = vpack.c.bf16 %v2973_v61, %v2972_v4 }
 0x2ee   : > { %4220 = vmatmul.mubr.bf16.gmra.mrb[220].mxu1 %v2992_v48  ;;  %v2856_v48 = vld [vmem:[#allocation4 + $0x18a] sm:$0xff] }
 0x2ef   : > { %4373 = vmatmul.mubr.bf16.gmra.mrb[248].mxu0 %v7729_v24  ;;  %4227 = vmatprep.mubr.bf16.mxu1 %v7750_v30  ;;  %v2975_v24 = vld [vmem:[#allocation4 + $0x129] sm:$0xff]  ;;  %v2974_v30 = vld [vmem:[#allocation4 + $0x121] sm:$0xff] }
 0x2f0   : > { %4380 = vmatprep.mubr.bf16.mxu0 %v2993_v38  ;;  %v2996_v60 = vpack.c.bf16 %v2975_v24, %v2974_v30  ;;  %v2982_v24 = vld [vmem:[#allocation4 + $0x181] sm:$0xff] }
 0x2f6   : > { %4228 = vmatmul.mubr.bf16.gmra.mrb[224].mxu1 %v2993_v38 }
 0x2f7   : > { %4381 = vmatmul.mubr.bf16.gmra.mrb[252].mxu0 %v7737_v20  ;;  %4235 = vmatprep.mubr.bf16.mxu1 %v7762_v55  ;;  %v2977_v20 = vld [vmem:[#allocation4 + $0x141] sm:$0xff]  ;;  %v2976_v55 = vld [vmem:[#allocation4 + $0x139] sm:$0xff] }
 0x2f8   : > { %4388 = vmatprep.mubr.bf16.mxu0 %v2994_v7  ;;  %v2997_v45 = vpack.c.bf16 %v2977_v20, %v2976_v55  ;;  %v3000_v55 = vpack.c.bf16 %v2983_v12, %v2982_v24  ;;  %v3024_v12 = vld [vmem:[#allocation4 + $0x7a] sm:$0xff] }
 0x2fe   : > { %4236 = vmatmul.mubr.bf16.gmra.mrb[228].mxu1 %v2994_v7 }
 0x2ff   : > { %4389 = vmatmul.mubr.bf16.gmra.mrb[0].mxu0 %v7745_v14  ;;  %4243 = vmatprep.mubr.bf16.mxu1 %v7770_v31  ;;  %v7852_v14 = vld [vmem:[%s8215_s5] ss:$0 sm:$0xff] }
 0x300   : > { %4396 = vmatprep.mubr.bf16.mxu0 %v2995_v54  ;;  %v3844_v9 = vadd.f32 %v7758_v47, %v7852_v14  ;;  %v3847_v41 = vadd.f32 %v7760_v5, %v7852_v14 }
 0x306   : > { %4244 = vmatmul.mubr.bf16.gmra.mrb[232].mxu1 %v2995_v54 }
 0x307   : > { %4397 = vmatmul.mubr.bf16.gmra.mrb[4].mxu0 %v7753_v49  ;;  %4251 = vmatprep.mubr.bf16.mxu1 %v7778_v8 }
 0x308   : > { %4404 = vmatprep.mubr.bf16.mxu0 %v2996_v60 }
 0x30e   : > { %4252 = vmatmul.mubr.bf16.gmra.mrb[236].mxu1 %v2996_v60 }
 0x30f   : > { %4405 = vmatmul.mubr.bf16.gmra.mrb[8].mxu0 %v7765_v19  ;;  %4259 = vmatprep.mubr.bf16.mxu1 %v7786_v37 }
 0x310   : > { %4412 = vmatprep.mubr.bf16.mxu0 %v2997_v45 }
 0x311   : > { %v5658_v31 = vpop.f32.mrb[132].mxu1 }
 0x312   : > { %v5764_v16 = vpop.f32.mrb[160].mxu0  ;;  %v5659_v49 = vpop.f32.mrb[133].mxu1 }
 0x313   : > { %v5660_v36 = vadd.f32 %v5659_v49, %v5658_v31  ;;  %v5765_v8 = vpop.f32.mrb[161].mxu0  ;;  %v5661_v23 = vpop.f32.mrb[134].mxu1  ;;  %v2985_v49 = vld [vmem:[#allocation4 + $0x1a1] sm:$0xff] }
 0x314   : > { %v5766_v11 = vadd.f32 %v5765_v8, %v5764_v16  ;;  %v5767_v19 = vpop.f32.mrb[162].mxu0  ;;  %v5662_v53 = vpop.f32.mrb[135].mxu1  ;;  %v2984_v16 = vld [vmem:[#allocation4 + $0x199] sm:$0xff] }
 0x315   : > { %v5663_v37 = vadd.f32 %v5662_v53, %v5661_v23  ;;  %v5768_v52 = vpop.f32.mrb[163].mxu0  ;;  %v3852_v5 = vadd.f32 %v5660_v36, %v7852_v14  ;;  %v3018_v23 = vld [vmem:[#allocation4 + $0x32] sm:$0xff]  ;;  %v3001_v46 = vpack.c.bf16 %v2985_v49, %v2984_v16 }
 0x316   : > { %v7858_v40 = vadd.f32 %v5766_v11, %v3844_v9  ;;  %v5769_v58 = vadd.f32 %v5768_v52, %v5767_v19  ;;  %4260 = vmatmul.mubr.bf16.gmra.mrb[240].mxu1 %v2997_v45 }
 0x317   : > { %4413 = vmatmul.mubr.bf16.gmra.mrb[12].mxu0 %v7773_v57  ;;  %4267 = vmatprep.mubr.bf16.mxu1 %v7794_v15  ;;  %v2980_v57 = vld [vmem:[#allocation4 + $0x169] sm:$0xff]  ;;  %v3855_v15 = vadd.f32 %v5663_v37, %v7852_v14 }
 0x318   : > { %v7862_v34 = vadd.f32 %v5769_v58, %v3847_v41  ;;  %4420 = vmatprep.mubr.bf16.mxu0 %v2998_v2  ;;  %v2999_v50 = vpack.c.bf16 %v2981_v27, %v2980_v57 }
 0x319   : > { %v5664_v47 = vpop.f32.mrb[136].mxu1 }
 0x31a   : > { %v5770_v32 = vpop.f32.mrb[164].mxu0  ;;  %v5665_v6 = vpop.f32.mrb[137].mxu1 }
 0x31b   : > { %v5666_v3 = vadd.f32 %v5665_v6, %v5664_v47  ;;  %v5771_v0 = vpop.f32.mrb[165].mxu0  ;;  %v5667_v13 = vpop.f32.mrb[138].mxu1 }
 0x31c   : > { %v5772_v51 = vadd.f32 %v5771_v0, %v5770_v32  ;;  %v5773_v22 = vpop.f32.mrb[166].mxu0  ;;  %v5668_v18 = vpop.f32.mrb[139].mxu1 }
 0x31d   : > { %v5669_v43 = vadd.f32 %v5668_v18, %v5667_v13  ;;  %v5774_v10 = vpop.f32.mrb[167].mxu0  ;;  %v3860_v44 = vadd.f32 %v5666_v3, %v7852_v14 }
 0x31e   : > { %v7866_v62 = vadd.f32 %v5772_v51, %v3852_v5  ;;  %v5775_v28 = vadd.f32 %v5774_v10, %v5773_v22  ;;  %4268 = vmatmul.mubr.bf16.gmra.mrb[244].mxu1 %v2998_v2  ;;  %v3050_v2 = vpack.c.bf16 %v3019_v26, %v3018_v23  ;;  %v3022_v5 = vld [vmem:[#allocation4 + $0x62] sm:$0xff]  ;;  %v3023_v51 = vld [vmem:[#allocation4 + $0x6a] sm:$0xff] }
 0x31f   : > { %4421 = vmatmul.mubr.bf16.gmra.mrb[16].mxu0 %v7781_v29  ;;  %4275 = vmatprep.mubr.bf16.mxu1 %v7802_v25  ;;  %v7873_v25 = vpack.c.bf16 %v2856_v48, %v2855_v63  ;;  %v3863_v30 = vadd.f32 %v5669_v43, %v7852_v14  ;;  %v6400_v10 = vld [vmem:[#allocation4] sm:$0xff] }
 0x320   : > { %v7870_v42 = vadd.f32 %v5775_v28, %v3855_v15  ;;  %4428 = vmatprep.mubr.bf16.mxu0 %v2999_v50  ;;  %v2937_v57 = vpack.c.bf16 %v6400_v10, %v6400_v10 }
 0x321   : > { %v5670_v59 = vpop.f32.mrb[140].mxu1 }
 0x322   : > { %v5776_v33 = vpop.f32.mrb[168].mxu0  ;;  %v5671_v56 = vpop.f32.mrb[141].mxu1 }
 0x323   : > { %v5672_v1 = vadd.f32 %v5671_v56, %v5670_v59  ;;  %v5777_v35 = vpop.f32.mrb[169].mxu0  ;;  %v5673_v38 = vpop.f32.mrb[142].mxu1  ;;  %v3052_v56 = vpack.c.bf16 %v3023_v51, %v3022_v5 }
 0x324   : > { %v5778_v7 = vadd.f32 %v5777_v35, %v5776_v33  ;;  %v5779_v61 = vpop.f32.mrb[170].mxu0  ;;  %v5674_v4 = vpop.f32.mrb[143].mxu1 }
 0x325   : > { %v5675_v29 = vadd.f32 %v5674_v4, %v5673_v38  ;;  %v5780_v54 = vpop.f32.mrb[171].mxu0  ;;  %v3868_v53 = vadd.f32 %v5672_v1, %v7852_v14  ;;  %v3026_v4 = vld [vmem:[#allocation4 + $0x92] sm:$0xff] }
 0x326   : > { %v7876_v60 = vadd.f32 %v5778_v7, %v3860_v44  ;;  %v5781_v20 = vadd.f32 %v5780_v54, %v5779_v61  ;;  %4276 = vmatmul.mubr.bf16.gmra.mrb[248].mxu1 %v2999_v50  ;;  %v3025_v44 = vld [vmem:[#allocation4 + $0x82] sm:$0xff] }
 0x327   : > { %4429 = vmatmul.mubr.bf16.gmra.mrb[20].mxu0 %v7789_v39  ;;  %4283 = vmatprep.mubr.bf16.mxu1 %v7873_v25  ;;  %v3871_v47 = vadd.f32 %v5675_v29, %v7852_v14  ;;  %v3027_v29 = vld [vmem:[#allocation4 + $0x9a] sm:$0xff] }
 0x328   : > { %v7880_v45 = vadd.f32 %v5781_v20, %v3863_v30  ;;  %4436 = vmatprep.mubr.bf16.mxu0 %v3000_v55 }
 0x329   : > { %v5676_v31 = vpop.f32.mrb[144].mxu1 }
 0x32a   : > { %v5782_v36 = vpop.f32.mrb[172].mxu0  ;;  %v5677_v8 = vpop.f32.mrb[145].mxu1 }
 0x32b   : > { %v5678_v9 = vadd.f32 %v5677_v8, %v5676_v31  ;;  %v5783_v11 = vpop.f32.mrb[173].mxu0  ;;  %v5679_v19 = vpop.f32.mrb[146].mxu1  ;;  %v3054_v8 = vpack.c.bf16 %v3027_v29, %v3026_v4 }
 0x32c   : > { %v5784_v37 = vadd.f32 %v5783_v11, %v5782_v36  ;;  %v5785_v52 = vpop.f32.mrb[174].mxu0  ;;  %v5680_v39 = vpop.f32.mrb[147].mxu1 }
 0x32d   : > { %v5681_v41 = vadd.f32 %v5680_v39, %v5679_v19  ;;  %v5786_v58 = vpop.f32.mrb[175].mxu0  ;;  %v3876_v15 = vadd.f32 %v5678_v9, %v7852_v14 }
 0x32e   : > { %v7884_v32 = vadd.f32 %v5784_v37, %v3868_v53  ;;  %v5787_v6 = vadd.f32 %v5786_v58, %v5785_v52  ;;  %4284 = vmatmul.mubr.bf16.gmra.mrb[252].mxu1 %v3000_v55  ;;  %v3028_v53 = vld [vmem:[#allocation4 + $0xaa] sm:$0xff]  ;;  %v3029_v37 = vld [vmem:[#allocation4 + $0xb2] sm:$0xff] }
 0x32f   : > { %4437 = vmatmul.mubr.bf16.gmra.mrb[24].mxu0 %v7797_v21  ;;  %6172 = vmatprep.mubr.bf16.mxu1 %v3050_v2  ;;  %v3879_v63 = vadd.f32 %v5681_v41, %v7852_v14  ;;  %v3031_v41 = vld [vmem:[#allocation4 + $0xca] sm:$0xff]  ;;  %v3055_v5 = vpack.c.bf16 %v3029_v37, %v3028_v53 }
 0x330   : > { %v7887_v3 = vadd.f32 %v5787_v6, %v3871_v47  ;;  %4444 = vmatprep.mubr.bf16.mxu0 %v3001_v46  ;;  %v3030_v46 = vld [vmem:[#allocation4 + $0xc2] sm:$0xff] }
 0x331   : > { %v5682_v0 = vpop.f32.mrb[148].mxu1 }
 0x332   : > { %v5788_v13 = vpop.f32.mrb[176].mxu0  ;;  %v5683_v27 = vpop.f32.mrb[149].mxu1 }
 0x333   : > { %v5684_v22 = vadd.f32 %v5683_v27, %v5682_v0  ;;  %v5789_v18 = vpop.f32.mrb[177].mxu0  ;;  %v5685_v43 = vpop.f32.mrb[150].mxu1 }
 0x334   : > { %v5790_v28 = vadd.f32 %v5789_v18, %v5788_v13  ;;  %v5791_v50 = vpop.f32.mrb[178].mxu0  ;;  %v5686_v59 = vpop.f32.mrb[151].mxu1  ;;  %v3056_v18 = vpack.c.bf16 %v3031_v41, %v3030_v46 }
 0x335   : > { %v5687_v21 = vadd.f32 %v5686_v59, %v5685_v43  ;;  %v5792_v33 = vpop.f32.mrb[179].mxu0  ;;  %v3884_v20 = vadd.f32 %v5684_v22, %v7852_v14  ;;  %v3033_v59 = vld [vmem:[#allocation4 + $0xe2] sm:$0xff] }
 0x336   : > { %v7891_v48 = vadd.f32 %v5790_v28, %v3876_v15  ;;  %v5793_v1 = vadd.f32 %v5792_v33, %v5791_v50  ;;  %6173 = vmatmul.mubr.bf16.vlgmr.msra.gmra.mrb[0].mxu1 %v7674_v17  ;;  %v3053_v17 = vpack.c.bf16 %v3025_v44, %v3024_v12  ;;  %v3032_v50 = vld [vmem:[#allocation4 + $0xda] sm:$0xff] }
 0x337   : > { %4445 = vmatmul.mubr.bf16.gmra.mrb[28].mxu0 %v2937_v57  ;;  %6176 = vmatprep.mubr.bf16.mxu1 %v3052_v56  ;;  %v3887_v23 = vadd.f32 %v5687_v21, %v7852_v14  ;;  %v3034_v56 = vld [vmem:[#allocation4 + $0xf2] sm:$0xff]  ;;  %v3057_v29 = vpack.c.bf16 %v3033_v59, %v3032_v50  ;;  %v3043_v59 = vld [vmem:[#allocation4 + $0x15a] sm:$0xff] }
 0x338   : > { %v7894_v35 = vadd.f32 %v5793_v1, %v3879_v63  ;;  %v3035_v63 = vld [vmem:[#allocation4 + $0xfa] sm:$0xff]  ;;  %v3042_v50 = vld [vmem:[#allocation4 + $0x152] sm:$0xff] }
 0x339   : > { %v5688_v38 = vpop.f32.mrb[152].mxu1 }
 0x33a   : > { %v5794_v7 = vpop.f32.mrb[180].mxu0  ;;  %v5689_v61 = vpop.f32.mrb[153].mxu1 }
 0x33b   : > { %v5690_v54 = vadd.f32 %v5689_v61, %v5688_v38  ;;  %v5795_v24 = vpop.f32.mrb[181].mxu0  ;;  %v5691_v30 = vpop.f32.mrb[154].mxu1 }
 0x33c   : > { %v5796_v55 = vadd.f32 %v5795_v24, %v5794_v7  ;;  %v5797_v31 = vpop.f32.mrb[182].mxu0  ;;  %v5692_v16 = vpop.f32.mrb[155].mxu1 }
 0x33d   : > { %v5693_v49 = vadd.f32 %v5692_v16, %v5691_v30  ;;  %v5798_v36 = vpop.f32.mrb[183].mxu0  ;;  %v3892_v6 = vadd.f32 %v5690_v54, %v7852_v14  ;;  %v3058_v30 = vpack.c.bf16 %v3035_v63, %v3034_v56 }
 0x33e   : > { %v7898_v26 = vadd.f32 %v5796_v55, %v3884_v20  ;;  %v5799_v9 = vadd.f32 %v5798_v36, %v5797_v31  ;;  %6177 = vmatmul.mubr.bf16.gmra.mrb[4].mxu1 %v3053_v17  ;;  %v3037_v36 = vld [vmem:[#allocation4 + $0x112] sm:$0xff] }
 0x33f   : > { %6180 = vmatprep.mubr.bf16.mxu1 %v3054_v8  ;;  %v3895_v43 = vadd.f32 %v5693_v49, %v7852_v14  ;;  %v3036_v49 = vld [vmem:[#allocation4 + $0x10a] sm:$0xff] }
 0x340   : > { %v7900_v11 = vadd.f32 %v5799_v9, %v3887_v23  ;;  %v3038_v9 = vld [vmem:[#allocation4 + $0x122] sm:$0xff] }
 0x341   : > { %v5694_v19 = vpop.f32.mrb[156].mxu1 }
 0x342   : > { %v5800_v52 = vpop.f32.mrb[184].mxu0  ;;  %v5695_v39 = vpop.f32.mrb[157].mxu1 }
 0x343   : > { %v5696_v58 = vadd.f32 %v5695_v39, %v5694_v19  ;;  %v5801_v2 = vpop.f32.mrb[185].mxu0  ;;  %v5697_v47 = vpop.f32.mrb[158].mxu1  ;;  %v3039_v19 = vld [vmem:[#allocation4 + $0x12a] sm:$0xff] }
 0x344   : > { %v5802_v0 = vadd.f32 %v5801_v2, %v5800_v52  ;;  %v5803_v13 = vpop.f32.mrb[186].mxu0  ;;  %v5698_v27 = vpop.f32.mrb[159].mxu1  ;;  %v3059_v2 = vpack.c.bf16 %v3037_v36, %v3036_v49 }
 0x345   : > { %v5699_v51 = vadd.f32 %v5698_v27, %v5697_v47  ;;  %v5804_v22 = vpop.f32.mrb[187].mxu0  ;;  %v3900_v44 = vadd.f32 %v5696_v58, %v7852_v14 }
 0x346   : > { %v7904_v10 = vadd.f32 %v5802_v0, %v3892_v6  ;;  %v5805_v57 = vadd.f32 %v5804_v22, %v5803_v13  ;;  %6181 = vmatmul.mubr.bf16.gmra.mrb[8].mxu1 %v3055_v5  ;;  %v3060_v0 = vpack.c.bf16 %v3039_v19, %v3038_v9 }
 0x347   : > { %6184 = vmatprep.mubr.bf16.mxu1 %v3056_v18  ;;  %v3903_v20 = vadd.f32 %v5699_v51, %v7852_v14  ;;  %v3040_v18 = vld [vmem:[#allocation4 + $0x13a] sm:$0xff] }
 0x348   : > { %v7906_v15 = vadd.f32 %v5805_v57, %v3895_v43  ;;  %v3041_v43 = vld [vmem:[#allocation4 + $0x142] sm:$0xff] }
 0x349   : > { %v5700_v28 = vpop.f32.mrb[160].mxu1 }
 0x34a   : > { %v5806_v21 = vpop.f32.mrb[188].mxu0  ;;  %v5701_v33 = vpop.f32.mrb[161].mxu1 }
 0x34b   : > { %v5702_v1 = vadd.f32 %v5701_v33, %v5700_v28  ;;  %v5807_v38 = vpop.f32.mrb[189].mxu0  ;;  %v5703_v12 = vpop.f32.mrb[162].mxu1 }
 0x34c   : > { %v5808_v7 = vadd.f32 %v5807_v38, %v5806_v21  ;;  %v5809_v61 = vpop.f32.mrb[190].mxu0  ;;  %v5704_v4 = vpop.f32.mrb[163].mxu1 }
 0x34d   : > { %v5705_v54 = vadd.f32 %v5704_v4, %v5703_v12  ;;  %v5810_v24 = vpop.f32.mrb[191].mxu0  ;;  %v3908_v39 = vadd.f32 %v5702_v1, %v7852_v14  ;;  %v3062_v4 = vpack.c.bf16 %v3043_v59, %v3042_v50 }
 0x34e   : > { %v7910_v55 = vadd.f32 %v5808_v7, %v3900_v44  ;;  %v5811_v31 = vadd.f32 %v5810_v24, %v5809_v61  ;;  %6185 = vmatmul.mubr.bf16.gmra.mrb[12].mxu1 %v3057_v29  ;;  %v3061_v44 = vpack.c.bf16 %v3041_v43, %v3040_v18 }
 0x34f   : > { %6188 = vmatprep.mubr.bf16.mxu1 %v3058_v30  ;;  %v3911_v13 = vadd.f32 %v5705_v54, %v7852_v14 }
 0x350   : > { %v7912_v16 = vadd.f32 %v5811_v31, %v3903_v20  ;;  %v3044_v31 = vld [vmem:[#allocation4 + $0x16a] sm:$0xff] }
 0x351   : > { %v5706_v17 = vpop.f32.mrb[164].mxu1 }
 0x352   : > { %v5812_v8 = vpop.f32.mrb[192].mxu0  ;;  %v5707_v23 = vpop.f32.mrb[165].mxu1 }
 0x353   : > { %v5708_v53 = vadd.f32 %v5707_v23, %v5706_v17  ;;  %v5813_v37 = vpop.f32.mrb[193].mxu0  ;;  %v5709_v52 = vpop.f32.mrb[166].mxu1  ;;  %v3045_v17 = vld [vmem:[#allocation4 + $0x172] sm:$0xff] }
 0x354   : > { %v5814_v46 = vadd.f32 %v5813_v37, %v5812_v8  ;;  %v5815_v41 = vpop.f32.mrb[194].mxu0  ;;  %v5710_v58 = vpop.f32.mrb[167].mxu1 }
 0x355   : > { %v5711_v47 = vadd.f32 %v5710_v58, %v5709_v52  ;;  %v5816_v6 = vpop.f32.mrb[195].mxu0  ;;  %v3916_v63 = vadd.f32 %v5708_v53, %v7852_v14 }
 0x356   : > { %v7916_v27 = vadd.f32 %v5814_v46, %v3908_v39  ;;  %v5817_v5 = vadd.f32 %v5816_v6, %v5815_v41  ;;  %6189 = vmatmul.mubr.bf16.gmra.mrb[16].mxu1 %v3059_v2  ;;  %v3063_v39 = vpack.c.bf16 %v3045_v17, %v3044_v31  ;;  %v3048_v6 = vld [vmem:[#allocation4 + $0x19a] sm:$0xff] }
 0x357   : > { %6192 = vmatprep.mubr.bf16.mxu1 %v3060_v0  ;;  %v3919_v29 = vadd.f32 %v5711_v47, %v7852_v14  ;;  %v3049_v0 = vld [vmem:[#allocation4 + $0x1a2] sm:$0xff] }
 0x358   : > { %v7918_v51 = vadd.f32 %v5817_v5, %v3911_v13  ;;  %v3065_v43 = vpack.c.bf16 %v3049_v0, %v3048_v6 }
 0x359   : > { %v5712_v22 = vpop.f32.mrb[168].mxu1 }
 0x35a   : > { %v5818_v57 = vpop.f32.mrb[196].mxu0  ;;  %v5713_v28 = vpop.f32.mrb[169].mxu1 }
 0x35b   : > { %v5714_v21 = vadd.f32 %v5713_v28, %v5712_v22  ;;  %v5819_v33 = vpop.f32.mrb[197].mxu0  ;;  %v5715_v56 = vpop.f32.mrb[170].mxu1 }
 0x35c   : > { %v5820_v1 = vadd.f32 %v5819_v33, %v5818_v57  ;;  %v5821_v38 = vpop.f32.mrb[198].mxu0  ;;  %v5716_v12 = vpop.f32.mrb[171].mxu1 }
 0x35d   : > { %v5717_v7 = vadd.f32 %v5716_v12, %v5715_v56  ;;  %v5822_v61 = vpop.f32.mrb[199].mxu0  ;;  %v3924_v19 = vadd.f32 %v5714_v21, %v7852_v14 }
 0x35e   : > { %v7922_v54 = vadd.f32 %v5820_v1, %v3916_v63  ;;  %v5823_v24 = vadd.f32 %v5822_v61, %v5821_v38  ;;  %6193 = vmatmul.mubr.bf16.gmra.mrb[20].mxu1 %v3061_v44 }
 0x35f   : > { %6196 = vmatprep.mubr.bf16.mxu1 %v3062_v4  ;;  %v3927_v58 = vadd.f32 %v5717_v7, %v7852_v14 }
 0x360   : > { %v7924_v30 = vadd.f32 %v5823_v24, %v3919_v29 }
 0x361   : > { %v5718_v20 = vpop.f32.mrb[172].mxu1 }
 0x362   : > { %v5824_v49 = vpop.f32.mrb[200].mxu0  ;;  %v5719_v36 = vpop.f32.mrb[173].mxu1 }
 0x363   : > { %v5720_v8 = vadd.f32 %v5719_v36, %v5718_v20  ;;  %v5825_v23 = vpop.f32.mrb[201].mxu0  ;;  %v5721_v9 = vpop.f32.mrb[174].mxu1 }
 0x364   : > { %v5826_v53 = vadd.f32 %v5825_v23, %v5824_v49  ;;  %v5827_v37 = vpop.f32.mrb[202].mxu0  ;;  %v5722_v52 = vpop.f32.mrb[175].mxu1 }
 0x365   : > { %v5723_v46 = vadd.f32 %v5722_v52, %v5721_v9  ;;  %v5828_v41 = vpop.f32.mrb[203].mxu0  ;;  %v3932_v59 = vadd.f32 %v5720_v8, %v7852_v14 }
 0x366   : > { %v7928_v2 = vadd.f32 %v5826_v53, %v3924_v19  ;;  %v5829_v47 = vadd.f32 %v5828_v41, %v5827_v37  ;;  %6197 = vmatmul.mubr.bf16.gmra.mrb[24].mxu1 %v3063_v39 }
 0x367   : > { %6200 = vmatprep.mubr.bf16.mxu1 %v7873_v25  ;;  %v3935_v25 = vadd.f32 %v5723_v46, %v7852_v14 }
 0x368   : > { %v7931_v13 = vadd.f32 %v5829_v47, %v3927_v58 }
 0x369   : > { %v5724_v5 = vpop.f32.mrb[176].mxu1 }
 0x36a   : > { %v5830_v22 = vpop.f32.mrb[204].mxu0  ;;  %v5725_v18 = vpop.f32.mrb[177].mxu1 }
 0x36b   : > { %v5726_v57 = vadd.f32 %v5725_v18, %v5724_v5  ;;  %v5831_v28 = vpop.f32.mrb[205].mxu0  ;;  %v5727_v50 = vpop.f32.mrb[178].mxu1 }
 0x36c   : > { %v5832_v21 = vadd.f32 %v5831_v28, %v5830_v22  ;;  %v5833_v33 = vpop.f32.mrb[206].mxu0  ;;  %v5728_v56 = vpop.f32.mrb[179].mxu1 }
 0x36d   : > { %v5729_v63 = vadd.f32 %v5728_v56, %v5727_v50  ;;  %v5834_v1 = vpop.f32.mrb[207].mxu0  ;;  %v3940_v31 = vadd.f32 %v5726_v57, %v7852_v14 }
 0x36e   : > { %v7935_v38 = vadd.f32 %v5832_v21, %v3932_v59  ;;  %v5835_v12 = vadd.f32 %v5834_v1, %v5833_v33  ;;  %6201 = vmatmul.mubr.bf16.gmra.mrb[28].mxu1 %v3065_v43 }
 0x36f   : > { %v3943_v9 = vadd.f32 %v5729_v63, %v7852_v14 }
 0x370   : > { %v7937_v44 = vadd.f32 %v5835_v12, %v3935_v25 }
 0x371   : > { %v5730_v7 = vpop.f32.mrb[180].mxu1 }
 0x372   : > { %v5836_v61 = vpop.f32.mrb[208].mxu0  ;;  %v5731_v4 = vpop.f32.mrb[181].mxu1 }
 0x373   : > { %v5732_v29 = vadd.f32 %v5731_v4, %v5730_v7  ;;  %v5837_v24 = vpop.f32.mrb[209].mxu0  ;;  %v5733_v20 = vpop.f32.mrb[182].mxu1 }
 0x374   : > { %v5838_v17 = vadd.f32 %v5837_v24, %v5836_v61  ;;  %v5839_v49 = vpop.f32.mrb[210].mxu0  ;;  %v5734_v36 = vpop.f32.mrb[183].mxu1 }
 0x375   : > { %v5735_v8 = vadd.f32 %v5734_v36, %v5733_v20  ;;  %v5840_v23 = vpop.f32.mrb[211].mxu0  ;;  %v3948_v6 = vadd.f32 %v5732_v29, %v7852_v14 }
 0x376   : > { %v7941_v19 = vadd.f32 %v5838_v17, %v3940_v31  ;;  %v5841_v53 = vadd.f32 %v5840_v23, %v5839_v49 }
 0x377   : > { %v3951_v57 = vadd.f32 %v5735_v8, %v7852_v14 }
 0x378   : > { %v7943_v37 = vadd.f32 %v5841_v53, %v3943_v9 }
 0x379   : > { %v5736_v52 = vpop.f32.mrb[184].mxu1 }
 0x37a   : > { %v5842_v39 = vpop.f32.mrb[212].mxu0  ;;  %v5737_v46 = vpop.f32.mrb[185].mxu1 }
 0x37b   : > { %v5738_v41 = vadd.f32 %v5737_v46, %v5736_v52  ;;  %v5843_v58 = vpop.f32.mrb[213].mxu0  ;;  %v5739_v47 = vpop.f32.mrb[186].mxu1 }
 0x37c   : > { %v5844_v0 = vadd.f32 %v5843_v58, %v5842_v39  ;;  %v5845_v5 = vpop.f32.mrb[214].mxu0  ;;  %v5740_v22 = vpop.f32.mrb[187].mxu1 }
 0x37d   : > { %v5741_v18 = vadd.f32 %v5740_v22, %v5739_v47  ;;  %v5846_v43 = vpop.f32.mrb[215].mxu0  ;;  %v3956_v12 = vadd.f32 %v5738_v41, %v7852_v14 }
 0x37e   : > { %v7947_v28 = vadd.f32 %v5844_v0, %v3948_v6  ;;  %v5847_v50 = vadd.f32 %v5846_v43, %v5845_v5 }
 0x37f   : > { %v3959_v20 = vadd.f32 %v5741_v18, %v7852_v14 }
 0x380   : > { %v7949_v59 = vadd.f32 %v5847_v50, %v3951_v57 }
 0x381   : > { %v5742_v21 = vpop.f32.mrb[188].mxu1 }
 0x382   : > { %v5848_v33 = vpop.f32.mrb[216].mxu0  ;;  %v5743_v56 = vpop.f32.mrb[189].mxu1 }
 0x383   : > { %v5744_v63 = vadd.f32 %v5743_v56, %v5742_v21  ;;  %v5849_v1 = vpop.f32.mrb[217].mxu0  ;;  %v5745_v25 = vpop.f32.mrb[190].mxu1 }
 0x384   : > { %v5850_v7 = vadd.f32 %v5849_v1, %v5848_v33  ;;  %v5851_v61 = vpop.f32.mrb[218].mxu0  ;;  %v5746_v4 = vpop.f32.mrb[191].mxu1 }
 0x385   : > { %v5747_v29 = vadd.f32 %v5746_v4, %v5745_v25  ;;  %v5852_v24 = vpop.f32.mrb[219].mxu0  ;;  %v3964_v39 = vadd.f32 %v5744_v63, %v7852_v14 }
 0x386   : > { %v7953_v31 = vadd.f32 %v5850_v7, %v3956_v12  ;;  %v5853_v17 = vadd.f32 %v5852_v24, %v5851_v61 }
 0x387   : > { %v3967_v5 = vadd.f32 %v5747_v29, %v7852_v14 }
 0x388   : > { %v7955_v49 = vadd.f32 %v5853_v17, %v3959_v20 }
 0x389   : > { %v5876_v36 = vpop.f32.mrb[192].mxu1 }
 0x38a   : > { %v5854_v8 = vpop.f32.mrb[220].mxu0  ;;  %v5877_v23 = vpop.f32.mrb[193].mxu1 }
 0x38b   : > { %v5855_v9 = vpop.f32.mrb[221].mxu0  ;;  %v5878_v53 = vadd.f32 %v5877_v23, %v5876_v36  ;;  %v5879_v52 = vpop.f32.mrb[194].mxu1 }
 0x38c   : > { %v5856_v46 = vadd.f32 %v5855_v9, %v5854_v8  ;;  %v5857_v41 = vpop.f32.mrb[222].mxu0  ;;  %v5880_v58 = vpop.f32.mrb[195].mxu1 }
 0x38d   : > { %v4166_v47 = vadd.f32 %v5878_v53, %v7858_v40  ;;  %v5858_v6 = vpop.f32.mrb[223].mxu0  ;;  %v5881_v0 = vadd.f32 %v5880_v58, %v5879_v52 }
 0x38e   : > { %v7960_v22 = vadd.f32 %v5856_v46, %v3964_v39  ;;  %v5859_v18 = vadd.f32 %v5858_v6, %v5857_v41 }
 0x38f   : > { %v4169_v43 = vadd.f32 %v5881_v0, %v7862_v34 }
 0x390   : > { %v7963_v57 = vadd.f32 %v5859_v18, %v3967_v5 }
 0x391   : > { %v5882_v50 = vpop.f32.mrb[196].mxu1 }
 0x392   : > { %v5988_v21 = vpop.f32.mrb[224].mxu0  ;;  %v5883_v33 = vpop.f32.mrb[197].mxu1 }
 0x393   : > { %v5884_v56 = vadd.f32 %v5883_v33, %v5882_v50  ;;  %v5989_v63 = vpop.f32.mrb[225].mxu0  ;;  %v5885_v1 = vpop.f32.mrb[198].mxu1 }
 0x394   : > { %v5990_v25 = vadd.f32 %v5989_v63, %v5988_v21  ;;  %v5991_v12 = vpop.f32.mrb[226].mxu0  ;;  %v5886_v40 = vpop.f32.mrb[199].mxu1 }
 0x395   : > { %v4174_v7 = vadd.f32 %v5884_v56, %v7866_v62  ;;  %v5887_v61 = vadd.f32 %v5886_v40, %v5885_v1  ;;  %v5992_v14 = vpop.f32.mrb[227].mxu0 }
 0x396   : > { %v5993_v4 = vadd.f32 %v5992_v14, %v5991_v12  ;;  %v7966_v29 = vadd.f32 %v5990_v25, %v4166_v47 }
 0x397   : > { %v4177_v34 = vadd.f32 %v5887_v61, %v7870_v42 }
 0x398   : > { %v7969_v24 = vadd.f32 %v5993_v4, %v4169_v43 }
 0x399   : > { %v5888_v20 = vpop.f32.mrb[200].mxu1 }
 0x39a   : > { %v5994_v17 = vpop.f32.mrb[228].mxu0  ;;  %v5889_v36 = vpop.f32.mrb[201].mxu1 }
 0x39b   : > { %v5890_v8 = vadd.f32 %v5889_v36, %v5888_v20  ;;  %v5995_v23 = vpop.f32.mrb[229].mxu0  ;;  %v5891_v9 = vpop.f32.mrb[202].mxu1 }
 0x39c   : > { %v5996_v53 = vadd.f32 %v5995_v23, %v5994_v17  ;;  %v5997_v52 = vpop.f32.mrb[230].mxu0  ;;  %v5892_v39 = vpop.f32.mrb[203].mxu1 }
 0x39d   : > { %v4182_v62 = vadd.f32 %v5890_v8, %v7876_v60  ;;  %v5893_v46 = vadd.f32 %v5892_v39, %v5891_v9  ;;  %v5998_v41 = vpop.f32.mrb[231].mxu0 }
 0x39e   : > { %v5999_v58 = vadd.f32 %v5998_v41, %v5997_v52  ;;  %v7972_v47 = vadd.f32 %v5996_v53, %v4174_v7 }
 0x39f   : > { %v4185_v42 = vadd.f32 %v5893_v46, %v7880_v45 }
 0x3a0   : > { %v7975_v6 = vadd.f32 %v5999_v58, %v4177_v34 }
 0x3a1   : > { %v5894_v0 = vpop.f32.mrb[204].mxu1 }
 0x3a2   : > { %v6000_v5 = vpop.f32.mrb[232].mxu0  ;;  %v5895_v18 = vpop.f32.mrb[205].mxu1 }
 0x3a3   : > { %v5896_v43 = vadd.f32 %v5895_v18, %v5894_v0  ;;  %v6001_v50 = vpop.f32.mrb[233].mxu0  ;;  %v5897_v21 = vpop.f32.mrb[206].mxu1 }
 0x3a4   : > { %v6002_v33 = vadd.f32 %v6001_v50, %v6000_v5  ;;  %v6003_v56 = vpop.f32.mrb[234].mxu0  ;;  %v5898_v63 = vpop.f32.mrb[207].mxu1 }
 0x3a5   : > { %v4190_v60 = vadd.f32 %v5896_v43, %v7884_v32  ;;  %v5899_v1 = vadd.f32 %v5898_v63, %v5897_v21  ;;  %v6004_v25 = vpop.f32.mrb[235].mxu0 }
 0x3a6   : > { %v6005_v12 = vadd.f32 %v6004_v25, %v6003_v56  ;;  %v7978_v40 = vadd.f32 %v6002_v33, %v4182_v62 }
 0x3a7   : > { %v4193_v45 = vadd.f32 %v5899_v1, %v7887_v3 }
 0x3a8   : > { %v7981_v7 = vadd.f32 %v6005_v12, %v4185_v42 }
 0x3a9   : > { %v5900_v61 = vpop.f32.mrb[208].mxu1 }
 0x3aa   : > { %v6006_v14 = vpop.f32.mrb[236].mxu0  ;;  %v5901_v4 = vpop.f32.mrb[209].mxu1 }
 0x3ab   : > { %v5902_v34 = vadd.f32 %v5901_v4, %v5900_v61  ;;  %v6007_v20 = vpop.f32.mrb[237].mxu0  ;;  %v5903_v17 = vpop.f32.mrb[210].mxu1 }
 0x3ac   : > { %v6008_v36 = vadd.f32 %v6007_v20, %v6006_v14  ;;  %v6009_v8 = vpop.f32.mrb[238].mxu0  ;;  %v5904_v23 = vpop.f32.mrb[211].mxu1 }
 0x3ad   : > { %v4198_v32 = vadd.f32 %v5902_v34, %v7891_v48  ;;  %v5905_v9 = vadd.f32 %v5904_v23, %v5903_v17  ;;  %v6010_v53 = vpop.f32.mrb[239].mxu0 }
 0x3ae   : > { %v6011_v52 = vadd.f32 %v6010_v53, %v6009_v8  ;;  %v7984_v39 = vadd.f32 %v6008_v36, %v4190_v60 }
 0x3af   : > { %v4201_v3 = vadd.f32 %v5905_v9, %v7894_v35 }
 0x3b0   : > { %v7987_v62 = vadd.f32 %v6011_v52, %v4193_v45 }
 0x3b1   : > { %v5906_v46 = vpop.f32.mrb[212].mxu1 }
 0x3b2   : > { %v6012_v41 = vpop.f32.mrb[240].mxu0  ;;  %v5907_v58 = vpop.f32.mrb[213].mxu1 }
 0x3b3   : > { %v5908_v42 = vadd.f32 %v5907_v58, %v5906_v46  ;;  %v6013_v0 = vpop.f32.mrb[241].mxu0  ;;  %v5909_v5 = vpop.f32.mrb[214].mxu1 }
 0x3b4   : > { %v6014_v18 = vadd.f32 %v6013_v0, %v6012_v41  ;;  %v6015_v43 = vpop.f32.mrb[242].mxu0  ;;  %v5910_v50 = vpop.f32.mrb[215].mxu1 }
 0x3b5   : > { %v4206_v48 = vadd.f32 %v5908_v42, %v7898_v26  ;;  %v5911_v21 = vadd.f32 %v5910_v50, %v5909_v5  ;;  %v6016_v33 = vpop.f32.mrb[243].mxu0 }
 0x3b6   : > { %v6017_v56 = vadd.f32 %v6016_v33, %v6015_v43  ;;  %v7990_v63 = vadd.f32 %v6014_v18, %v4198_v32 }
 0x3b7   : > { %v4209_v35 = vadd.f32 %v5911_v21, %v7900_v11 }
 0x3b8   : > { %v7993_v60 = vadd.f32 %v6017_v56, %v4201_v3 }
 0x3b9   : > { %v5912_v1 = vpop.f32.mrb[216].mxu1 }
 0x3ba   : > { %v6018_v25 = vpop.f32.mrb[244].mxu0  ;;  %v5913_v12 = vpop.f32.mrb[217].mxu1 }
 0x3bb   : > { %v5914_v45 = vadd.f32 %v5913_v12, %v5912_v1  ;;  %v6019_v61 = vpop.f32.mrb[245].mxu0  ;;  %v5915_v14 = vpop.f32.mrb[218].mxu1 }
 0x3bc   : > { %v6020_v4 = vadd.f32 %v6019_v61, %v6018_v25  ;;  %v6021_v34 = vpop.f32.mrb[246].mxu0  ;;  %v5916_v20 = vpop.f32.mrb[219].mxu1 }
 0x3bd   : > { %v4214_v26 = vadd.f32 %v5914_v45, %v7904_v10  ;;  %v5917_v17 = vadd.f32 %v5916_v20, %v5915_v14  ;;  %v6022_v36 = vpop.f32.mrb[247].mxu0 }
 0x3be   : > { %v6023_v8 = vadd.f32 %v6022_v36, %v6021_v34  ;;  %v7996_v23 = vadd.f32 %v6020_v4, %v4206_v48 }
 0x3bf   : > { %v4217_v11 = vadd.f32 %v5917_v17, %v7906_v15 }
 0x3c0   : > { %v7999_v32 = vadd.f32 %v6023_v8, %v4209_v35 }
 0x3c1   : > { %v5918_v9 = vpop.f32.mrb[220].mxu1 }
 0x3c2   : > { %v6024_v53 = vpop.f32.mrb[248].mxu0  ;;  %v5919_v52 = vpop.f32.mrb[221].mxu1 }
 0x3c3   : > { %v5920_v3 = vadd.f32 %v5919_v52, %v5918_v9  ;;  %v6025_v46 = vpop.f32.mrb[249].mxu0  ;;  %v5921_v41 = vpop.f32.mrb[222].mxu1 }
 0x3c4   : > { %v6026_v58 = vadd.f32 %v6025_v46, %v6024_v53  ;;  %v6027_v42 = vpop.f32.mrb[250].mxu0  ;;  %v5922_v0 = vpop.f32.mrb[223].mxu1 }
 0x3c5   : > { %v4222_v10 = vadd.f32 %v5920_v3, %v7910_v55  ;;  %v5923_v5 = vadd.f32 %v5922_v0, %v5921_v41  ;;  %v6028_v18 = vpop.f32.mrb[251].mxu0 }
 0x3c6   : > { %v6029_v43 = vadd.f32 %v6028_v18, %v6027_v42  ;;  %v8002_v50 = vadd.f32 %v6026_v58, %v4214_v26 }
 0x3c7   : > { %v4225_v15 = vadd.f32 %v5923_v5, %v7912_v16 }
 0x3c8   : > { %v8005_v48 = vadd.f32 %v6029_v43, %v4217_v11 }
 0x3c9   : > { %v5924_v21 = vpop.f32.mrb[224].mxu1 }
 0x3ca   : > { %v6030_v33 = vpop.f32.mrb[252].mxu0  ;;  %v5925_v56 = vpop.f32.mrb[225].mxu1 }
 0x3cb   : > { %v5926_v35 = vadd.f32 %v5925_v56, %v5924_v21  ;;  %v6031_v1 = vpop.f32.mrb[253].mxu0  ;;  %v5927_v25 = vpop.f32.mrb[226].mxu1 }
 0x3cc   : > { %v6032_v12 = vadd.f32 %v6031_v1, %v6030_v33  ;;  %v6033_v45 = vpop.f32.mrb[254].mxu0  ;;  %v5928_v61 = vpop.f32.mrb[227].mxu1 }
 0x3cd   : > { %v4230_v55 = vadd.f32 %v5926_v35, %v7916_v27  ;;  %v5929_v14 = vadd.f32 %v5928_v61, %v5927_v25  ;;  %v6034_v4 = vpop.f32.mrb[255].mxu0 }
 0x3ce   : > { %v6035_v34 = vadd.f32 %v6034_v4, %v6033_v45  ;;  %v8008_v20 = vadd.f32 %v6032_v12, %v4222_v10 }
 0x3cf   : > { %v4233_v16 = vadd.f32 %v5929_v14, %v7918_v51 }
 0x3d0   : > { %v8011_v26 = vadd.f32 %v6035_v34, %v4225_v15 }
 0x3d1   : > { %v5930_v17 = vpop.f32.mrb[228].mxu1 }
 0x3d2   : > { %v6036_v36 = vpop.f32.mrb[0].mxu0  ;;  %v5931_v8 = vpop.f32.mrb[229].mxu1 }
 0x3d3   : > { %v5932_v11 = vadd.f32 %v5931_v8, %v5930_v17  ;;  %v6037_v9 = vpop.f32.mrb[1].mxu0  ;;  %v5933_v53 = vpop.f32.mrb[230].mxu1 }
 0x3d4   : > { %v6038_v52 = vadd.f32 %v6037_v9, %v6036_v36  ;;  %v6039_v3 = vpop.f32.mrb[2].mxu0  ;;  %v5934_v46 = vpop.f32.mrb[231].mxu1 }
 0x3d5   : > { %v4238_v27 = vadd.f32 %v5932_v11, %v7922_v54  ;;  %v5935_v41 = vadd.f32 %v5934_v46, %v5933_v53  ;;  %v6040_v58 = vpop.f32.mrb[3].mxu0 }
 0x3d6   : > { %v6041_v42 = vadd.f32 %v6040_v58, %v6039_v3  ;;  %v8014_v0 = vadd.f32 %v6038_v52, %v4230_v55 }
 0x3d7   : > { %v4241_v51 = vadd.f32 %v5935_v41, %v7924_v30 }
 0x3d8   : > { %v8017_v10 = vadd.f32 %v6041_v42, %v4233_v16 }
 0x3d9   : > { %v5936_v5 = vpop.f32.mrb[232].mxu1 }
 0x3da   : > { %v6042_v18 = vpop.f32.mrb[4].mxu0  ;;  %v5937_v43 = vpop.f32.mrb[233].mxu1 }
 0x3db   : > { %v5938_v15 = vadd.f32 %v5937_v43, %v5936_v5  ;;  %v6043_v21 = vpop.f32.mrb[5].mxu0  ;;  %v5939_v33 = vpop.f32.mrb[234].mxu1 }
 0x3dc   : > { %v6044_v56 = vadd.f32 %v6043_v21, %v6042_v18  ;;  %v6045_v35 = vpop.f32.mrb[6].mxu0  ;;  %v5940_v1 = vpop.f32.mrb[235].mxu1 }
 0x3dd   : > { %v4246_v54 = vadd.f32 %v5938_v15, %v7928_v2  ;;  %v5941_v25 = vadd.f32 %v5940_v1, %v5939_v33  ;;  %v6046_v12 = vpop.f32.mrb[7].mxu0 }
 0x3de   : > { %v6047_v45 = vadd.f32 %v6046_v12, %v6045_v35  ;;  %v8020_v61 = vadd.f32 %v6044_v56, %v4238_v27 }
 0x3df   : > { %v4249_v30 = vadd.f32 %v5941_v25, %v7931_v13 }
 0x3e0   : > { %v8023_v55 = vadd.f32 %v6047_v45, %v4241_v51 }
 0x3e1   : > { %v5942_v14 = vpop.f32.mrb[236].mxu1 }
 0x3e2   : > { %v6048_v4 = vpop.f32.mrb[8].mxu0  ;;  %v5943_v34 = vpop.f32.mrb[237].mxu1 }
 0x3e3   : > { %v5944_v16 = vadd.f32 %v5943_v34, %v5942_v14  ;;  %v6049_v17 = vpop.f32.mrb[9].mxu0  ;;  %v5945_v36 = vpop.f32.mrb[238].mxu1 }
 0x3e4   : > { %v6050_v8 = vadd.f32 %v6049_v17, %v6048_v4  ;;  %v6051_v11 = vpop.f32.mrb[10].mxu0  ;;  %v5946_v9 = vpop.f32.mrb[239].mxu1 }
 0x3e5   : > { %v4254_v2 = vadd.f32 %v5944_v16, %v7935_v38  ;;  %v5947_v53 = vadd.f32 %v5946_v9, %v5945_v36  ;;  %v6052_v52 = vpop.f32.mrb[11].mxu0 }
 0x3e6   : > { %v6053_v3 = vadd.f32 %v6052_v52, %v6051_v11  ;;  %v8026_v46 = vadd.f32 %v6050_v8, %v4246_v54 }
 0x3e7   : > { %v4257_v13 = vadd.f32 %v5947_v53, %v7937_v44 }
 0x3e8   : > { %v8029_v27 = vadd.f32 %v6053_v3, %v4249_v30 }
 0x3e9   : > { %v5948_v41 = vpop.f32.mrb[240].mxu1 }
 0x3ea   : > { %v6054_v58 = vpop.f32.mrb[12].mxu0  ;;  %v5949_v42 = vpop.f32.mrb[241].mxu1 }
 0x3eb   : > { %v5950_v51 = vadd.f32 %v5949_v42, %v5948_v41  ;;  %v6055_v5 = vpop.f32.mrb[13].mxu0  ;;  %v5951_v18 = vpop.f32.mrb[242].mxu1 }
 0x3ec   : > { %v6056_v43 = vadd.f32 %v6055_v5, %v6054_v58  ;;  %v6057_v15 = vpop.f32.mrb[14].mxu0  ;;  %v5952_v21 = vpop.f32.mrb[243].mxu1 }
 0x3ed   : > { %v4262_v38 = vadd.f32 %v5950_v51, %v7941_v19  ;;  %v5953_v33 = vadd.f32 %v5952_v21, %v5951_v18  ;;  %v6058_v56 = vpop.f32.mrb[15].mxu0 }
 0x3ee   : > { %v6059_v35 = vadd.f32 %v6058_v56, %v6057_v15  ;;  %v8032_v1 = vadd.f32 %v6056_v43, %v4254_v2 }
 0x3ef   : > { %v4265_v44 = vadd.f32 %v5953_v33, %v7943_v37 }
 0x3f0   : > { %v8035_v54 = vadd.f32 %v6059_v35, %v4257_v13 }
 0x3f1   : > { %v5954_v25 = vpop.f32.mrb[244].mxu1 }
 0x3f2   : > { %v6060_v12 = vpop.f32.mrb[16].mxu0  ;;  %v5955_v45 = vpop.f32.mrb[245].mxu1 }
 0x3f3   : > { %v5956_v30 = vadd.f32 %v5955_v45, %v5954_v25  ;;  %v6061_v14 = vpop.f32.mrb[17].mxu0  ;;  %v5957_v4 = vpop.f32.mrb[246].mxu1 }
 0x3f4   : > { %v6062_v34 = vadd.f32 %v6061_v14, %v6060_v12  ;;  %v6063_v16 = vpop.f32.mrb[18].mxu0  ;;  %v5958_v17 = vpop.f32.mrb[247].mxu1 }
 0x3f5   : > { %v4270_v19 = vadd.f32 %v5956_v30, %v7947_v28  ;;  %v5959_v36 = vadd.f32 %v5958_v17, %v5957_v4  ;;  %v6064_v8 = vpop.f32.mrb[19].mxu0 }
 0x3f6   : > { %v6065_v11 = vadd.f32 %v6064_v8, %v6063_v16  ;;  %v8038_v9 = vadd.f32 %v6062_v34, %v4262_v38  ;;  %v4616_v8 = vld [vmem:[%s6652_s13 + $0x10] sm:$0xff] }
 0x3f7   : > { %v4273_v37 = vadd.f32 %v5959_v36, %v7949_v59 }
 0x3f8   : > { %v8041_v2 = vadd.f32 %v6065_v11, %v4265_v44 }
 0x3f9   : > { %v5960_v53 = vpop.f32.mrb[248].mxu1 }
 0x3fa   : > { %v6066_v52 = vpop.f32.mrb[20].mxu0  ;;  %v5961_v3 = vpop.f32.mrb[249].mxu1 }
 0x3fb   : > { %v5962_v13 = vadd.f32 %v5961_v3, %v5960_v53  ;;  %v6067_v41 = vpop.f32.mrb[21].mxu0  ;;  %v5963_v58 = vpop.f32.mrb[250].mxu1 }
 0x3fc   : > { %v6068_v42 = vadd.f32 %v6067_v41, %v6066_v52  ;;  %v6069_v51 = vpop.f32.mrb[22].mxu0  ;;  %v5964_v5 = vpop.f32.mrb[251].mxu1  ;;  %v4614_v52 = vld [vmem:[%s6652_s13] sm:$0xff]  ;;  %v4617_v41 = vld [vmem:[%s6652_s13 + $0x18] sm:$0xff] }
 0x3fd   : > { %v4278_v28 = vadd.f32 %v5962_v13, %v7953_v31  ;;  %v5965_v18 = vadd.f32 %v5964_v5, %v5963_v58  ;;  %v6070_v43 = vpop.f32.mrb[23].mxu0 }
 0x3fe   : > { %v6071_v15 = vadd.f32 %v6070_v43, %v6069_v51  ;;  %v8044_v21 = vadd.f32 %v6068_v42, %v4270_v19 }
 0x3ff   : > { %v4281_v59 = vadd.f32 %v5965_v18, %v7955_v49 }
 0x400   : > { %v8047_v38 = vadd.f32 %v6071_v15, %v4273_v37 }
 0x401   : > { %v5966_v33 = vpop.f32.mrb[252].mxu1 }
 0x402   : > { %v6072_v56 = vpop.f32.mrb[24].mxu0  ;;  %v5967_v35 = vpop.f32.mrb[253].mxu1 }
 0x403   : > { %v5968_v44 = vadd.f32 %v5967_v35, %v5966_v33  ;;  %v6073_v25 = vpop.f32.mrb[25].mxu0  ;;  %v5969_v12 = vpop.f32.mrb[254].mxu1 }
 0x404   : > { %v6074_v45 = vadd.f32 %v6073_v25, %v6072_v56  ;;  %v6075_v30 = vpop.f32.mrb[26].mxu0  ;;  %v5970_v31 = vpop.f32.mrb[255].mxu1  ;;  %v4620_v56 = vld [vmem:[%s6652_s13 + $0x30] sm:$0xff]  ;;  %v4618_v25 = vld [vmem:[%s6652_s13 + $0x20] sm:$0xff] }
 0x405   : > { %v4286_v14 = vadd.f32 %v5968_v44, %v7960_v22  ;;  %v5971_v4 = vadd.f32 %v5970_v31, %v5969_v12  ;;  %v6076_v34 = vpop.f32.mrb[27].mxu0 }
 0x406   : > { %v6077_v16 = vadd.f32 %v6076_v34, %v6075_v30  ;;  %v8050_v49 = vadd.f32 %v6074_v45, %v4278_v28  ;;  %v4615_v28 = vld [vmem:[%s6652_s13 + $0x8] sm:$0xff]  ;;  %v4621_v30 = vld [vmem:[%s6652_s13 + $0x38] sm:$0xff] }
 0x407   : > { %v4289_v17 = vadd.f32 %v5971_v4, %v7963_v57  ;;  %v4619_v34 = vld [vmem:[%s6652_s13 + $0x28] sm:$0xff] }
 0x408   : > { %v8053_v19 = vadd.f32 %v6077_v16, %v4281_v59 }
 0x409   : > { %v6174_v36 = vpop.f32.mrb[0].mxu1 }
 0x40a   : > { %v6078_v11 = vpop.f32.mrb[28].mxu0  ;;  %v4496_v37 = vadd.f32 %v6174_v36, %v7972_v47  ;;  %v4487_v53 = vpop.f32.mrb[1].mxu1 }
 0x40b   : > { %v6079_v22 = vpop.f32.mrb[29].mxu0  ;;  %v4488_v3 = vadd.f32 %v4487_v53, %v7966_v29  ;;  %v6175_v13 = vpop.f32.mrb[2].mxu1 }
 0x40c   : > { %v4648_v58 = vadd.f32 %v4616_v8, %v4496_v37  ;;  %v6080_v42 = vadd.f32 %v6079_v22, %v6078_v11  ;;  %v6081_v51 = vpop.f32.mrb[30].mxu0  ;;  %v4499_v57 = vadd.f32 %v6175_v13, %v7975_v6  ;;  %v4490_v5 = vpop.f32.mrb[3].mxu1  ;;  %v4624_v8 = vld [vmem:[%s6652_s13 + $0x50] sm:$0xff]  ;;  %v4622_v37 = vld [vmem:[%s6652_s13 + $0x40] sm:$0xff] }
 0x40d   : > { %v4646_v18 = vadd.f32 %v4614_v52, %v4488_v3  ;;  %v6082_v43 = vpop.f32.mrb[31].mxu0  ;;  %v4491_v47 = vadd.f32 %v4490_v5, %v7969_v24  ;;  %v4625_v52 = vld [vmem:[%s6652_s13 + $0x58] sm:$0xff] }
 0x40e   : > { %4680 = vst [vmem:[%s8065_s8 + $0x10] sm:$0xff] %v4648_v58  ;;  %v4649_v29 = vadd.f32 %v4617_v41, %v4499_v57  ;;  %v6083_v15 = vadd.f32 %v6082_v43, %v6081_v51  ;;  %v8068_v6 = vadd.f32 %v6080_v42, %v4286_v14  ;;  %v4623_v41 = vld [vmem:[%s6652_s13 + $0x48] sm:$0xff]  ;;  %v4628_v57 = vld [vmem:[%s6652_s13 + $0x70] sm:$0xff]  ;;  %v4629_v43 = vld [vmem:[%s6652_s13 + $0x78] sm:$0xff] }
 0x40f   : > { %4678 = vst [vmem:[%s8065_s8] sm:$0xff] %v4646_v18  ;;  %v4647_v59 = vadd.f32 %v4615_v28, %v4491_v47  ;;  %v4626_v28 = vld [vmem:[%s6652_s13 + $0x60] sm:$0xff] }
 0x410   : > { %4681 = vst [vmem:[%s8065_s8 + $0x18] sm:$0xff] %v4649_v29  ;;  %v8072_v33 = vadd.f32 %v6083_v15, %v4289_v17 }
 0x411   : > { %4679 = vst [vmem:[%s8065_s8 + $0x8] sm:$0xff] %v4647_v59  ;;  %v6178_v24 = vpop.f32.mrb[4].mxu1  ;;  %v4627_v59 = vld [vmem:[%s6652_s13 + $0x68] sm:$0xff] }
 0x412   : > { %v4512_v35 = vadd.f32 %v6178_v24, %v7984_v39  ;;  %v4503_v44 = vpop.f32.mrb[5].mxu1 }
 0x413   : > { %v4504_v12 = vadd.f32 %v4503_v44, %v7978_v40  ;;  %v6179_v45 = vpop.f32.mrb[6].mxu1  ;;  %v4632_v44 = vld [vmem:[%s6652_s13 + $0x90] sm:$0xff] }
 0x414   : > { %v4652_v31 = vadd.f32 %v4620_v56, %v4512_v35  ;;  %v4515_v14 = vadd.f32 %v6179_v45, %v7987_v62  ;;  %v4506_v4 = vpop.f32.mrb[7].mxu1 }
 0x415   : > { %v4650_v16 = vadd.f32 %v4618_v25, %v4504_v12  ;;  %v4507_v17 = vadd.f32 %v4506_v4, %v7981_v7  ;;  %v4630_v12 = vld [vmem:[%s6652_s13 + $0x80] sm:$0xff] }
 0x416   : > { %4684 = vst [vmem:[%s8065_s8 + $0x30] sm:$0xff] %v4652_v31  ;;  %v4653_v39 = vadd.f32 %v4621_v30, %v4515_v14  ;;  %v4633_v30 = vld [vmem:[%s6652_s13 + $0x98] sm:$0xff] }
 0x417   : > { %4682 = vst [vmem:[%s8065_s8 + $0x20] sm:$0xff] %v4650_v16  ;;  %v4651_v36 = vadd.f32 %v4619_v34, %v4507_v17  ;;  %v4631_v34 = vld [vmem:[%s6652_s13 + $0x88] sm:$0xff] }
 0x418   : > { %4685 = vst [vmem:[%s8065_s8 + $0x38] sm:$0xff] %v4653_v39 }
 0x419   : > { %4683 = vst [vmem:[%s8065_s8 + $0x28] sm:$0xff] %v4651_v36  ;;  %v6182_v40 = vpop.f32.mrb[8].mxu1  ;;  %v4636_v36 = vld [vmem:[%s6652_s13 + $0xb0] sm:$0xff] }
 0x41a   : > { %v4528_v11 = vadd.f32 %v6182_v40, %v7996_v23  ;;  %v4519_v62 = vpop.f32.mrb[9].mxu1 }
 0x41b   : > { %v4520_v53 = vadd.f32 %v4519_v62, %v7990_v63  ;;  %v6183_v7 = vpop.f32.mrb[10].mxu1  ;;  %v4637_v62 = vld [vmem:[%s6652_s13 + $0xb8] sm:$0xff] }
 0x41c   : > { %v4656_v22 = vadd.f32 %v4624_v8, %v4528_v11  ;;  %v4531_v3 = vadd.f32 %v6183_v7, %v7999_v32  ;;  %v4522_v13 = vpop.f32.mrb[11].mxu1  ;;  %v4634_v8 = vld [vmem:[%s6652_s13 + $0xa0] sm:$0xff] }
 0x41d   : > { %v4654_v58 = vadd.f32 %v4622_v37, %v4520_v53  ;;  %v4523_v42 = vadd.f32 %v4522_v13, %v7993_v60 }
 0x41e   : > { %4688 = vst [vmem:[%s8065_s8 + $0x50] sm:$0xff] %v4656_v22  ;;  %v4657_v23 = vadd.f32 %v4625_v52, %v4531_v3  ;;  %v4635_v52 = vld [vmem:[%s6652_s13 + $0xa8] sm:$0xff] }
 0x41f   : > { %4686 = vst [vmem:[%s8065_s8 + $0x40] sm:$0xff] %v4654_v58  ;;  %v4655_v51 = vadd.f32 %v4623_v41, %v4523_v42  ;;  %v4640_v41 = vld [vmem:[%s6652_s13 + $0xd0] sm:$0xff]  ;;  %v4638_v42 = vld [vmem:[%s6652_s13 + $0xc0] sm:$0xff] }
 0x420   : > { %4689 = vst [vmem:[%s8065_s8 + $0x58] sm:$0xff] %v4657_v23 }
 0x421   : > { %4687 = vst [vmem:[%s8065_s8 + $0x48] sm:$0xff] %v4655_v51  ;;  %v6186_v63 = vpop.f32.mrb[12].mxu1  ;;  %v4641_v51 = vld [vmem:[%s6652_s13 + $0xd8] sm:$0xff] }
 0x422   : > { %v4544_v5 = vadd.f32 %v6186_v63, %v8008_v20  ;;  %v4535_v32 = vpop.f32.mrb[13].mxu1 }
 0x423   : > { %v4536_v18 = vadd.f32 %v4535_v32, %v8002_v50  ;;  %v6187_v60 = vpop.f32.mrb[14].mxu1  ;;  %v4639_v32 = vld [vmem:[%s6652_s13 + $0xc8] sm:$0xff] }
 0x424   : > { %v4660_v47 = vadd.f32 %v4628_v57, %v4544_v5  ;;  %v4547_v29 = vadd.f32 %v6187_v60, %v8011_v26  ;;  %v4538_v15 = vpop.f32.mrb[15].mxu1 }
 0x425   : > { %v4658_v24 = vadd.f32 %v4626_v28, %v4536_v18  ;;  %v4539_v56 = vadd.f32 %v4538_v15, %v8005_v48 }
 0x426   : > { %4692 = vst [vmem:[%s8065_s8 + $0x70] sm:$0xff] %v4660_v47  ;;  %v4661_v20 = vadd.f32 %v4629_v43, %v4547_v29  ;;  %v4644_v43 = vld [vmem:[%s6652_s13 + $0xf0] sm:$0xff]  ;;  %v4642_v29 = vld [vmem:[%s6652_s13 + $0xe0] sm:$0xff] }
 0x427   : > { %4690 = vst [vmem:[%s8065_s8 + $0x60] sm:$0xff] %v4658_v24  ;;  %v4659_v35 = vadd.f32 %v4627_v59, %v4539_v56 }
 0x428   : > { %4693 = vst [vmem:[%s8065_s8 + $0x78] sm:$0xff] %v4661_v20 }
 0x429   : > { %4691 = vst [vmem:[%s8065_s8 + $0x68] sm:$0xff] %v4659_v35  ;;  %v6190_v50 = vpop.f32.mrb[16].mxu1  ;;  %v4643_v35 = vld [vmem:[%s6652_s13 + $0xe8] sm:$0xff] }
 0x42a   : > { %v4560_v25 = vadd.f32 %v6190_v50, %v8020_v61  ;;  %v4551_v26 = vpop.f32.mrb[17].mxu1 }
 0x42b   : > { %v4552_v45 = vadd.f32 %v4551_v26, %v8014_v0  ;;  %v6191_v48 = vpop.f32.mrb[18].mxu1 }
 0x42c   : > { %v4664_v31 = vadd.f32 %v4632_v44, %v4560_v25  ;;  %v4563_v14 = vadd.f32 %v6191_v48, %v8023_v55  ;;  %v4554_v4 = vpop.f32.mrb[19].mxu1 }
 0x42d   : > { %v4662_v16 = vadd.f32 %v4630_v12, %v4552_v45  ;;  %v4555_v17 = vadd.f32 %v4554_v4, %v8017_v10 }
 0x42e   : > { %4696 = vst [vmem:[%s8065_s8 + $0x90] sm:$0xff] %v4664_v31  ;;  %v4665_v61 = vadd.f32 %v4633_v30, %v4563_v14 }
 0x42f   : > { %4694 = vst [vmem:[%s8065_s8 + $0x80] sm:$0xff] %v4662_v16  ;;  %v4663_v39 = vadd.f32 %v4631_v34, %v4555_v17 }
 0x430   : > { %4697 = vst [vmem:[%s8065_s8 + $0x98] sm:$0xff] %v4665_v61 }
 0x431   : > { %4695 = vst [vmem:[%s8065_s8 + $0x88] sm:$0xff] %v4663_v39  ;;  %v6194_v0 = vpop.f32.mrb[20].mxu1 }
 0x432   : > { %v4576_v40 = vadd.f32 %v6194_v0, %v8032_v1  ;;  %v4567_v55 = vpop.f32.mrb[21].mxu1 }
 0x433   : > { %v4568_v11 = vadd.f32 %v4567_v55, %v8026_v46  ;;  %v6195_v10 = vpop.f32.mrb[22].mxu1 }
 0x434   : > { %v4668_v37 = vadd.f32 %v4636_v36, %v4576_v40  ;;  %v4579_v53 = vadd.f32 %v6195_v10, %v8035_v54  ;;  %v4570_v7 = vpop.f32.mrb[23].mxu1 }
 0x435   : > { %v4666_v22 = vadd.f32 %v4634_v8, %v4568_v11  ;;  %v4571_v3 = vadd.f32 %v4570_v7, %v8029_v27 }
 0x436   : > { %4700 = vst [vmem:[%s8065_s8 + $0xb0] sm:$0xff] %v4668_v37  ;;  %v4669_v1 = vadd.f32 %v4637_v62, %v4579_v53 }
 0x437   : > { %4698 = vst [vmem:[%s8065_s8 + $0xa0] sm:$0xff] %v4666_v22  ;;  %v4667_v13 = vadd.f32 %v4635_v52, %v4571_v3 }
 0x438   : > { %4701 = vst [vmem:[%s8065_s8 + $0xb8] sm:$0xff] %v4669_v1 }
 0x439   : > { %4699 = vst [vmem:[%s8065_s8 + $0xa8] sm:$0xff] %v4667_v13  ;;  %v6198_v46 = vpop.f32.mrb[24].mxu1 }
 0x43a   : > { %v4592_v58 = vadd.f32 %v6198_v46, %v8044_v21  ;;  %v4583_v54 = vpop.f32.mrb[25].mxu1 }
 0x43b   : > { %v4584_v23 = vadd.f32 %v4583_v54, %v8038_v9  ;;  %v6199_v27 = vpop.f32.mrb[26].mxu1 }
 0x43c   : > { %v4672_v63 = vadd.f32 %v4640_v41, %v4592_v58  ;;  %v4595_v57 = vadd.f32 %v6199_v27, %v8047_v38  ;;  %v4586_v5 = vpop.f32.mrb[27].mxu1 }
 0x43d   : > { %v4670_v28 = vadd.f32 %v4638_v42, %v4584_v23  ;;  %v4587_v21 = vadd.f32 %v4586_v5, %v8041_v2  ;;  %v4645_v2 = vld [vmem:[%s6652_s13 + $0xf8] sm:$0xff]  ;;  %s6431_s13 = scalar_lea.vmem %s8163_s20, 4096 }
 0x43e   : > { %4704 = vst [vmem:[%s8065_s8 + $0xd0] sm:$0xff] %v4672_v63  ;;  %v4673_v18 = vadd.f32 %v4641_v51, %v4595_v57  ;;  %p6432_p11 = scmp.ne.s32.totalorder %s8163_s20, %s6431_s13  ;;  %p6439_p0 = scmp.lt.s32.totalorder %s6437_s18, %s6431_s13 }
 0x43f   : > { %4702 = vst [vmem:[%s8065_s8 + $0xc0] sm:$0xff] %v4670_v28  ;;  %v4671_v60 = vadd.f32 %v4639_v32, %v4587_v21 }
 0x440   : > { %4705 = vst [vmem:[%s8065_s8 + $0xd8] sm:$0xff] %v4673_v18  ;;  %p6433_p13 = pnand %p6432_p11, %p8223_p12  ;;  %p6440_p2 = por %p6439_p0, %p6438_p10 }
 0x441   : > { %4703 = vst [vmem:[%s8065_s8 + $0xc8] sm:$0xff] %v4671_v60  ;;  %v6202_v9 = vpop.f32.mrb[28].mxu1 }
 0x442   : > { %v4608_v38 = vadd.f32 %v6202_v9, %v8068_v6  ;;  %v4599_v47 = vpop.f32.mrb[29].mxu1  ;;  %p6434_p8 = pneg %p6433_p13 }
 0x443   : > { %v4600_v15 = vadd.f32 %v4599_v47, %v8050_v49  ;;  %v6203_v59 = vpop.f32.mrb[30].mxu1 }
 0x444   : > { %v4676_v24 = vadd.f32 %v4644_v43, %v4608_v38  ;;  %v4611_v56 = vadd.f32 %v6203_v59, %v8072_v33  ;;  %v4602_v20 = vpop.f32.mrb[31].mxu1  ;;  %p6441_p4 = pnand %p6440_p2, %p6434_p8 }
 0x445   : > { %v4674_v50 = vadd.f32 %v4642_v29, %v4600_v15  ;;  %v4603_v6 = vadd.f32 %v4602_v20, %v8053_v19 }
 0x446   : > { %4708 = vst [vmem:[%s8065_s8 + $0xf0] sm:$0xff] %v4676_v24  ;;  %v4677_v44 = vadd.f32 %v4645_v2, %v4611_v56 }
 0x447   : > { %4706 = vst [vmem:[%s8065_s8 + $0xe0] sm:$0xff] %v4674_v50  ;;  %v4675_v49 = vadd.f32 %v4643_v35, %v4603_v6 }
 0x448   : > { %4709 = vst [vmem:[%s8065_s8 + $0xf8] sm:$0xff] %v4677_v44 }
 0x449   : > { %4707 = vst [vmem:[%s8065_s8 + $0xe8] sm:$0xff] %v4675_v49 }
 0x44a   : > { %6444 = shalt.err (!%p6441_p4)
}
 0x44b   : > { %s6445_s11 = scalar_lea.hbm %s8161_s12, 4096  ;;  %s6449_s17 = scalar_lea.hbm %s8216_s6, 8192 }
 0x44c   : > { %p6446_p5 = scmp.ne.s32.totalorder %s8161_s12, %s6445_s11  ;;  %p6450_p1 = scmp.lt.u32.totalorder %s8161_s12, %s8216_s6 }
 0x44d   : > { %p6451_p3 = scmp.lt.u32.totalorder %s6449_s17, %s6445_s11  ;;  %p6453_p11 = scmp.lt.u32.totalorder %s6445_s11, %s8161_s12 }
 0x44e   : > { %p6447_p7 = pnand %p6446_p5, %p8223_p12 }
 0x44f   : > { %p6452_p6 = por %p6451_p3, %p6450_p1 }
 0x450   : > { %p6448_p9 = pneg %p6447_p7 }
 0x451   : > { %p6454_p13 = por %p6453_p11, %p6452_p6 }
 0x453   : > { %p6455_p8 = pnand %p6454_p13, %p6448_p9 }
 0x455   : > { %6458 = shalt.err (!%p6455_p8)
}
 0x456   : > { %s6505_s26 = smov 128   ;;  %s6506_s28 = smov 8  }
 0x457   : > { %6207 = dma.vmem_to_hbm [thread:$0]  (%p8223_p12), %s8163_s20, 4096, %s8161_s12, %s4711_s25, %s6505_s26, %s6505_s26, %s6506_s28  }
 0x458 PF: > { %s4739_s13 = sand.u32 1, %s6485_s21   ;;  %p8224_p10 = scmp.ne.s32.totalorder %s8221_s10, 0 }
 0x459   : > { %p8225_p0 = scmp.ge.s32.totalorder %s6497_s24, 2  ;;  %s4740_s16 = scalar_lea.sflag [#allocation7], %s4739_s13 }
 0x45b   : > { %p6214_p2 = pnand %p8225_p0, %p8224_p10 }
 0x45d   : > { %6480 = dma.done.wait (!%p6214_p2), %s4740_s16, 4096  }
 0x45e   : > { %6482 = vsyncadd (!%p6214_p2), %s4740_s16, 4294963200  ;;  %p19_p4 = scmp.ge.s32.totalorder %s6567_s27, 4   ;;  %s8226_s21 = smov %s6489_s22 }
 0x45f   : > { %s8227_s22 = smov %s6493_s23  ;;  %s8228_s23 = smov %s6579_s30 }
 0x460   : > { %s8229_s24 = smov %s6567_s27  ;;  %21 = sbr.rel (!%p19_p4) target bundleno = 5 (0x5), region = 97 }
 0x467   :  { %4745 = vsyncpa [#allocation6], 1 }
 0x468   :  { %4747 = vsyncpa [#allocation6 + $0x1], 1 }
 0x469   :  { %4748 = vsyncpa [#allocation7], 1 }
 0x46a   :  { %4750 = vsyncpa [#allocation7 + $0x1], 1 }

</bundles_post_ra>
